<compile_context>
chip_gen: v7x
topology: tpu7x:2x2x1
jax: 0.10.0
libtpu: 0.0.40
codegen_flags: <defaults>
</compile_context>

<pallas_src>
import jax
import jax.numpy as jnp
import numpy as np
from jax.experimental import pallas as pl
from jax.experimental.pallas import tpu as pltpu

BN_EPS = 1e-5

FEAT = 1280    # backbone feature width (stand-in)
H_FC = 512     # efn._fc out: 500 padded -> 512
H_M1 = 512     # meta hidden 1: 500 padded -> 512
H_M2 = 256     # meta hidden 2: 250 padded -> 256
X_PAD = 16     # pooled(3) + meta(9) = 12 input features, zero-padded -> 16
TB_MAX = 512   # max batch-lane tile


def nn_fused_kernel(x_ref,                      # [16, TB]  rows 0:3 pooled, rows 3:12 meta
                    wa_ref, ba_ref,             # [1024,16], [1024,1]  rows 0:512 = cnn fold, 512:1024 = meta L1+BN
                    w2_ref, b2_ref,             # [256,512] bf16, [256,1]  meta L2 + BN fold (transposed)
                    whc_ref, whm_ref, bo_ref,   # [512,1], [256,1], [1,1]  output head Linear(750,1)
                    out_ref):                   # [1, TB]
    f32 = jnp.float32

    # Combined first layer: cnn fold (stem @ _fc) and meta Linear(9,500)+BN share one MXU dot.
    y = jnp.dot(wa_ref[...], x_ref[...], preferred_element_type=f32) + ba_ref[...]   # [1024, TB]
    cnn = y[0:H_FC, :]                                   # [512, TB]  efn._fc output (no ReLU)
    h = jnp.maximum(y[H_FC:, :], 0.0)                    # [512, TB]  ReLU; Dropout = identity (eval)

    # meta Linear(500,250)+BN fold: MXU bf16 weights/activations, f32 accumulation.
    h2 = jnp.dot(w2_ref[...], h.astype(jnp.bfloat16),
                 preferred_element_type=f32) + b2_ref[...]                            # [256, TB]
    others = jnp.maximum(h2, 0.0)

    # Output head Linear(750,1) over cat(cnn, others): f32 VPU broadcast-mul + sublane reduce,
    # producing a lane-dense [1, TB] row (unmasked stores on writeback).
    out = (jnp.sum(cnn * whc_ref[...], axis=0, keepdims=True)
           + jnp.sum(others * whm_ref[...], axis=0, keepdims=True)
           + bo_ref[...])                                                             # [1, TB]
    out_ref[...] = out.astype(out_ref.dtype)


def _resident(shape):
    """Weight spec: full block, constant index_map -> stays resident in VMEM."""
    n = len(shape)
    return pl.BlockSpec(shape, lambda i, _n=n: (0,) * _n)


def nn_forward(meta, images, kparams):
    """meta: [B, 9] f32; images: [B, 3, H, W] f32 (NCHW). Returns [B, 1] f32."""
    B = meta.shape[0]

    # Global average pool stays in XLA: the image never enters the kernel / VMEM.
    pooled = jnp.mean(images.astype(jnp.float32), axis=(2, 3))            # [B, 3]
    x = jnp.concatenate([pooled, meta.astype(jnp.float32)], axis=1)       # [B, 12]

    # Batch lives in the LANE dimension: pad to a lane multiple and pick the tile.
    b128 = max(128, ((B + 127) // 128) * 128)
    tb = min(TB_MAX, b128)
    # Keep >= 2 grid steps when the batch allows it so the "parallel" axis shards across
    # v7x's two TensorCores (no effect on single-TC v5e/v6e).
    if b128 > 128 and b128 // tb < 2:
        tb = max(128, ((b128 // 2) // 128) * 128)
    b_pad = ((b128 + tb - 1) // tb) * tb

    x = jnp.pad(x, ((0, b_pad - B), (0, X_PAD - x.shape[1])))             # [b_pad, 16]
    x_t = x.T                                                             # [16, b_pad] feature-major

    weights = (kparams["wa"], kparams["ba"],
               kparams["w2t"], kparams["b2t"],
               kparams["wh_cnn"], kparams["wh_meta"], kparams["b_out"])

    out_row = pl.pallas_call(
        nn_fused_kernel,
        out_shape=jax.ShapeDtypeStruct((1, b_pad), jnp.float32),
        grid=(b_pad // tb,),
        in_specs=[pl.BlockSpec((X_PAD, tb), lambda i: (0, i))]
                 + [_resident(w.shape) for w in weights],
        out_specs=pl.BlockSpec((1, tb), lambda i: (0, i)),
        compiler_params=pltpu.CompilerParams(
            dimension_semantics=("parallel",),
            vmem_limit_bytes=32 << 20,
        ),
    )(x_t, *weights)
    return out_row[0, :B].reshape(B, 1)


def init_params(key):
    """Parameters matching the PyTorch module's shapes (unfolded, unpadded)."""
    ks = jax.random.split(key, 8)

    def lin(k, fan_in, fan_out):
        bound = 1.0 / (fan_in ** 0.5)
        kw, kb = jax.random.split(k)
        w = jax.random.uniform(kw, (fan_in, fan_out), jnp.float32, -bound, bound)
        b = jax.random.uniform(kb, (1, fan_out), jnp.float32, -bound, bound)
        return w, b

    p = {}
    # backbone stand-in stem: 3 -> 1280
    p["w_stem"], p["b_stem"] = lin(ks[0], 3, FEAT)
    # efn._fc: Linear(1280, 500)
    p["w_fc"], p["b_fc"] = lin(ks[1], FEAT, 500)
    # meta: Linear(9, 500) + BN(500)   (non-trivial running stats to exercise folding)
    p["w1"], p["b1"] = lin(ks[2], 9, 500)
    p["g1"] = jnp.ones((1, 500), jnp.float32)
    p["beta1"] = jnp.zeros((1, 500), jnp.float32)
    p["mu1"] = 0.1 * jax.random.normal(ks[5], (1, 500), jnp.float32)
    p["var1"] = jax.random.uniform(ks[6], (1, 500), jnp.float32, 0.5, 1.5)
    # meta: Linear(500, 250) + BN(250)
    p["w2"], p["b2"] = lin(ks[3], 500, 250)
    p["g2"] = jnp.ones((1, 250), jnp.float32)
    p["beta2"] = jnp.zeros((1, 250), jnp.float32)
    p["mu2"] = 0.1 * jax.random.normal(ks[7], (1, 250), jnp.float32)
    p["var2"] = jax.random.uniform(ks[4], (1, 250), jnp.float32, 0.5, 1.5)
    # output: Linear(750, 1) split into cnn (first 500 rows) and meta (last 250 rows)
    w_out, b_out = lin(jax.random.fold_in(key, 99), 750, 1)
    p["w_out_cnn"] = w_out[:500, :]
    p["w_out_meta"] = w_out[500:, :]
    p["b_out"] = b_out
    return p


def fold_and_pad(p):
    """Fold (a) the linear stem into efn._fc, (b) eval-mode BatchNorms into the preceding
    Linears, transpose to feature-major, and zero-pad to lane-aligned sizes. Exact rewrite."""
    kp = {}

    # --- cnn branch: stand-in stem (3->1280) folded into efn._fc (1280->500) ---
    w_cnn = p["w_stem"] @ p["w_fc"]                              # [3, 500]
    b_cnn = p["b_stem"] @ p["w_fc"] + p["b_fc"]                  # [1, 500]

    # --- meta layer 1 + BN fold ---
    s1 = p["g1"] * jax.lax.rsqrt(p["var1"] + BN_EPS)
    w1 = p["w1"] * s1                                            # [9, 500]
    b1 = (p["b1"] - p["mu1"]) * s1 + p["beta1"]                  # [1, 500]

    # Combined first-layer weight (feature-major): rows 0:512 cnn fold, rows 512:1024 meta L1.
    wa = jnp.zeros((H_FC + H_M1, X_PAD), jnp.float32)
    wa = wa.at[0:500, 0:3].set(w_cnn.T)
    wa = wa.at[H_FC:H_FC + 500, 3:12].set(w1.T)
    ba = jnp.zeros((H_FC + H_M1, 1), jnp.float32)
    ba = ba.at[0:500, 0].set(b_cnn[0])
    ba = ba.at[H_FC:H_FC + 500, 0].set(b1[0])
    kp["wa"], kp["ba"] = wa, ba

    # --- meta layer 2 + BN fold (transposed, bf16 for the MXU) ---
    s2 = p["g2"] * jax.lax.rsqrt(p["var2"] + BN_EPS)
    w2 = p["w2"] * s2                                            # [500, 250]
    b2 = (p["b2"] - p["mu2"]) * s2 + p["beta2"]                  # [1, 250]
    w2t = jnp.zeros((H_M2, H_M1), jnp.float32).at[0:250, 0:500].set(w2.T)
    kp["w2t"] = w2t.astype(jnp.bfloat16)
    kp["b2t"] = jnp.zeros((H_M2, 1), jnp.float32).at[0:250, 0].set(b2[0])

    # --- output head Linear(750, 1), split rows, kept as f32 columns for the VPU head ---
    kp["wh_cnn"] = jnp.zeros((H_FC, 1), jnp.float32).at[0:500, :].set(p["w_out_cnn"])
    kp["wh_meta"] = jnp.zeros((H_M2, 1), jnp.float32).at[0:250, :].set(p["w_out_meta"])
    kp["b_out"] = p["b_out"]                                     # [1, 1]
    return kp


def nn_reference(meta, images, p):
    """Pure-JAX f32 reference with unfolded BN / unpadded shapes."""
    pooled = jnp.mean(images, axis=(2, 3))
    feat = pooled @ p["w_stem"] + p["b_stem"]
    cnn = feat @ p["w_fc"] + p["b_fc"]
    h = meta @ p["w1"] + p["b1"]
    h = p["g1"] * (h - p["mu1"]) * jax.lax.rsqrt(p["var1"] + BN_EPS) + p["beta1"]
    h = jnp.maximum(h, 0.0)
    h = h @ p["w2"] + p["b2"]
    h = p["g2"] * (h - p["mu2"]) * jax.lax.rsqrt(p["var2"] + BN_EPS) + p["beta2"]
    others = jnp.maximum(h, 0.0)
    return cnn @ p["w_out_cnn"] + others @ p["w_out_meta"] + p["b_out"]


if __name__ == "__main__":
    key = jax.random.PRNGKey(0)
    k_meta, k_img, k_par = jax.random.split(key, 3)

    B, C, H, W = 8, 3, 16, 16
    meta = jax.random.normal(k_meta, (B, 9), jnp.float32)
    images = jax.random.uniform(k_img, (B, C, H, W), jnp.float32)  # NCHW, like PyTorch
    params = init_params(k_par)
    kparams = fold_and_pad(params)

    out = jax.jit(nn_forward)(meta, images, kparams)
    out = jax.block_until_ready(out)
    assert out.shape == (B, 1) and out.dtype == jnp.float32

    ref = nn_reference(meta, images, params)
    # Slightly relaxed tolerance: w2/activations go through bf16 on the MXU (f32 accumulate).
    np.testing.assert_allclose(np.asarray(out), np.asarray(ref), rtol=2e-3, atol=2e-3)
    print("KERNEL_OK")
</pallas_src>

<mosaic_0001>
module attributes {stable_mosaic.version = 11 : i64} {
  func.func @nn_fused_kernel(%arg0: i32, %arg1: memref<16x128xf32, #tpu.memory_space<vmem>>, %arg2: memref<1024x16xf32, #tpu.memory_space<vmem>>, %arg3: memref<1024x1xf32, #tpu.memory_space<vmem>>, %arg4: memref<256x512xbf16, #tpu.memory_space<vmem>>, %arg5: memref<256x1xf32, #tpu.memory_space<vmem>>, %arg6: memref<512x1xf32, #tpu.memory_space<vmem>>, %arg7: memref<256x1xf32, #tpu.memory_space<vmem>>, %arg8: memref<1x1xf32, #tpu.memory_space<vmem>>, %arg9: memref<1x128xf32, #tpu.memory_space<vmem>>) attributes {dimension_semantics = [#tpu.dimension_semantics<parallel>], iteration_bounds = array<i64: 1>, scalar_prefetch = 0 : i64, scratch_operands = 0 : i64, tpu.core_type = #tpu.core_type<tc>, window_params = [{transform_indices = @transform_0, window_bounds = array<i64: 16, 128>}, {pipeline_mode = #tpu.pipeline_mode<synchronous>, transform_indices = @transform_1, window_bounds = array<i64: 1024, 16>}, {pipeline_mode = #tpu.pipeline_mode<synchronous>, transform_indices = @transform_2, window_bounds = array<i64: 1024, 1>}, {pipeline_mode = #tpu.pipeline_mode<synchronous>, transform_indices = @transform_3, window_bounds = array<i64: 256, 512>}, {pipeline_mode = #tpu.pipeline_mode<synchronous>, transform_indices = @transform_4, window_bounds = array<i64: 256, 1>}, {pipeline_mode = #tpu.pipeline_mode<synchronous>, transform_indices = @transform_5, window_bounds = array<i64: 512, 1>}, {pipeline_mode = #tpu.pipeline_mode<synchronous>, transform_indices = @transform_6, window_bounds = array<i64: 256, 1>}, {pipeline_mode = #tpu.pipeline_mode<synchronous>, transform_indices = @transform_7, window_bounds = array<i64: 1, 1>}, {transform_indices = @transform_8, window_bounds = array<i64: 1, 128>}]} {
    %c0 = arith.constant 0 : index
    %c0_0 = arith.constant 0 : index
    %0 = vector.load %arg2[%c0, %c0_0] : memref<1024x16xf32, #tpu.memory_space<vmem>>, vector<1024x16xf32>
    %c0_1 = arith.constant 0 : index
    %c0_2 = arith.constant 0 : index
    %1 = vector.load %arg1[%c0_1, %c0_2] : memref<16x128xf32, #tpu.memory_space<vmem>>, vector<16x128xf32>
    %cst = arith.constant dense<0.000000e+00> : vector<1024x128xf32>
    %2 = tpu.matmul %0, %1, %cst {dimension_numbers = #tpu.dot_dimension_numbers<[1], [0], [0], [1], [0, 0, 1, 1], [], []>} : vector<1024x16xf32>, vector<16x128xf32>, vector<1024x128xf32> -> vector<1024x128xf32>
    %c0_3 = arith.constant 0 : index
    %c0_4 = arith.constant 0 : index
    %3 = vector.load %arg3[%c0_3, %c0_4] : memref<1024x1xf32, #tpu.memory_space<vmem>>, vector<1024x1xf32>
    %4 = vector.broadcast %3 : vector<1024x1xf32> to vector<1024x128xf32>
    %5 = arith.addf %2, %4 : vector<1024x128xf32>
    %6 = vector.extract_strided_slice %5 {offsets = [0, 0], sizes = [512, 128], strides = [1, 1]} : vector<1024x128xf32> to vector<512x128xf32>
    %7 = vector.extract_strided_slice %5 {offsets = [512, 0], sizes = [512, 128], strides = [1, 1]} : vector<1024x128xf32> to vector<512x128xf32>
    %cst_5 = arith.constant 0.000000e+00 : f32
    %8 = vector.broadcast %cst_5 : f32 to vector<512x128xf32>
    %9 = arith.maximumf %7, %8 : vector<512x128xf32>
    %c0_6 = arith.constant 0 : index
    %c0_7 = arith.constant 0 : index
    %10 = vector.load %arg4[%c0_6, %c0_7] : memref<256x512xbf16, #tpu.memory_space<vmem>>, vector<256x512xbf16>
    %11 = arith.truncf %9 : vector<512x128xf32> to vector<512x128xbf16>
    %cst_8 = arith.constant dense<0.000000e+00> : vector<256x128xf32>
    %12 = tpu.matmul %10, %11, %cst_8 {dimension_numbers = #tpu.dot_dimension_numbers<[1], [0], [0], [1], [0, 0, 1, 1], [], []>} : vector<256x512xbf16>, vector<512x128xbf16>, vector<256x128xf32> -> vector<256x128xf32>
    %c0_9 = arith.constant 0 : index
    %c0_10 = arith.constant 0 : index
    %13 = vector.load %arg5[%c0_9, %c0_10] : memref<256x1xf32, #tpu.memory_space<vmem>>, vector<256x1xf32>
    %14 = vector.broadcast %13 : vector<256x1xf32> to vector<256x128xf32>
    %15 = arith.addf %12, %14 : vector<256x128xf32>
    %cst_11 = arith.constant 0.000000e+00 : f32
    %16 = vector.broadcast %cst_11 : f32 to vector<256x128xf32>
    %17 = arith.maximumf %15, %16 : vector<256x128xf32>
    %c0_12 = arith.constant 0 : index
    %c0_13 = arith.constant 0 : index
    %18 = vector.load %arg6[%c0_12, %c0_13] : memref<512x1xf32, #tpu.memory_space<vmem>>, vector<512x1xf32>
    %19 = vector.broadcast %18 : vector<512x1xf32> to vector<512x128xf32>
    %20 = arith.mulf %6, %19 : vector<512x128xf32>
    %cst_14 = arith.constant dense<0.000000e+00> : vector<128xf32>
    %21 = vector.multi_reduction <add>, %20, %cst_14 [0] : vector<512x128xf32> to vector<128xf32>
    %22 = vector.shape_cast %21 : vector<128xf32> to vector<1x128xf32>
    %c0_15 = arith.constant 0 : index
    %c0_16 = arith.constant 0 : index
    %23 = vector.load %arg7[%c0_15, %c0_16] : memref<256x1xf32, #tpu.memory_space<vmem>>, vector<256x1xf32>
    %24 = vector.broadcast %23 : vector<256x1xf32> to vector<256x128xf32>
    %25 = arith.mulf %17, %24 : vector<256x128xf32>
    %cst_17 = arith.constant dense<0.000000e+00> : vector<128xf32>
    %26 = vector.multi_reduction <add>, %25, %cst_17 [0] : vector<256x128xf32> to vector<128xf32>
    %27 = vector.shape_cast %26 : vector<128xf32> to vector<1x128xf32>
    %28 = arith.addf %22, %27 : vector<1x128xf32>
    %c0_18 = arith.constant 0 : index
    %c0_19 = arith.constant 0 : index
    %29 = vector.load %arg8[%c0_18, %c0_19] : memref<1x1xf32, #tpu.memory_space<vmem>>, vector<1x1xf32>
    %30 = vector.broadcast %29 : vector<1x1xf32> to vector<1x128xf32>
    %31 = arith.addf %28, %30 : vector<1x128xf32>
    %c0_20 = arith.constant 0 : index
    %c0_21 = arith.constant 0 : index
    %32 = vector.load %arg9[%c0_20, %c0_21] : memref<1x128xf32, #tpu.memory_space<vmem>>, vector<1x128xf32>
    tpu.vector_store %arg9[%c0_20, %c0_21], %31 {strides = array<i32>} : memref<1x128xf32, #tpu.memory_space<vmem>>, vector<1x128xf32>,
    return
  }
  func.func @transform_0(%arg0: i32) -> (i32, i32) {
    %c0_i32 = arith.constant 0 : i32
    %c0_i32_0 = arith.constant 0 : i32
    return %c0_i32, %arg0 : i32, i32
  }
  func.func @transform_1(%arg0: i32) -> (i32, i32) {
    %c0_i32 = arith.constant 0 : i32
    %c0_i32_0 = arith.constant 0 : i32
    %c0_i32_1 = arith.constant 0 : i32
    return %c0_i32, %c0_i32_0 : i32, i32
  }
  func.func @transform_2(%arg0: i32) -> (i32, i32) {
    %c0_i32 = arith.constant 0 : i32
    %c0_i32_0 = arith.constant 0 : i32
    %c0_i32_1 = arith.constant 0 : i32
    return %c0_i32, %c0_i32_0 : i32, i32
  }
  func.func @transform_3(%arg0: i32) -> (i32, i32) {
    %c0_i32 = arith.constant 0 : i32
    %c0_i32_0 = arith.constant 0 : i32
    %c0_i32_1 = arith.constant 0 : i32
    return %c0_i32, %c0_i32_0 : i32, i32
  }
  func.func @transform_4(%arg0: i32) -> (i32, i32) {
    %c0_i32 = arith.constant 0 : i32
    %c0_i32_0 = arith.constant 0 : i32
    %c0_i32_1 = arith.constant 0 : i32
    return %c0_i32, %c0_i32_0 : i32, i32
  }
  func.func @transform_5(%arg0: i32) -> (i32, i32) {
    %c0_i32 = arith.constant 0 : i32
    %c0_i32_0 = arith.constant 0 : i32
    %c0_i32_1 = arith.constant 0 : i32
    return %c0_i32, %c0_i32_0 : i32, i32
  }
  func.func @transform_6(%arg0: i32) -> (i32, i32) {
    %c0_i32 = arith.constant 0 : i32
    %c0_i32_0 = arith.constant 0 : i32
    %c0_i32_1 = arith.constant 0 : i32
    return %c0_i32, %c0_i32_0 : i32, i32
  }
  func.func @transform_7(%arg0: i32) -> (i32, i32) {
    %c0_i32 = arith.constant 0 : i32
    %c0_i32_0 = arith.constant 0 : i32
    %c0_i32_1 = arith.constant 0 : i32
    return %c0_i32, %c0_i32_0 : i32, i32
  }
  func.func @transform_8(%arg0: i32) -> (i32, i32) {
    %c0_i32 = arith.constant 0 : i32
    %c0_i32_0 = arith.constant 0 : i32
    return %c0_i32, %arg0 : i32, i32
  }
}

</mosaic_0001>

<bundles_post_ra>
// kernel: nn_forward.1
= control target key start
LH: loop header
LB: loop body
LE: loop exit
PB: predicated region body
PF: predicated region fallthrough
CT: control target
= control target key end

     0   :  { %v4702_v0 = vmov 0   ;;  %vm930_vm0 = vcmask 130048   ;;  %s7102_s2 = inlined_call_operand.vmem [shape: f32[1024,1], index: 2, kind: input, shape index: {}]   ;;  %s7103_s0 = inlined_call_operand.vmem [shape: f32[16,128], index: 0, kind: input, shape index: {}]   ;;  %s7104_s1 = inlined_call_operand.vmem [shape: f32[1024,16], index: 1, kind: input, shape index: {}]   ;;  %s7105_s4 = inlined_call_operand.vmem [shape: f32[256,1], index: 4, kind: input, shape index: {}]   ;;  %s7106_s3 = inlined_call_operand.vmem [shape: bf16[256,512], index: 3, kind: input, shape index: {}]   ;;  %s7107_s5 = inlined_call_operand.vmem [shape: f32[512,1], index: 5, kind: input, shape index: {}]   ;;  %s7108_s7 = inlined_call_operand.<no memory space> [shape: f32[1,1], index: 7, kind: input, shape index: {}]   ;;  %s7109_s6 = inlined_call_operand.vmem [shape: f32[256,1], index: 6, kind: input, shape index: {}]   ;;  %s7110_s8 = inlined_call_operand.vmem [shape: f32[1,128], index: 8, kind: output, shape index: {}]  }
   0x1   :  { %4605 = vset.pattern.permute.xlu1 %v4702_v0  ;;  %4604 = vset.pattern.permute.xlu0 %v4702_v0  ;;  %v164_v1 = vld [vmem:[%s7102_s2 + $0x10] sm:$0xff]  ;;  %v162_v2 = vld [vmem:[%s7102_s2] sm:$0xff]  ;;  %v161_v4 = vld [vmem:[%s7103_s0 + $0x8] sm:$0xff] }
   0x2   :  { %v160_v3 = vld [vmem:[%s7103_s0] sm:$0xff]  ;;  %302 = vperm.xlu1 %4605, %v164_v1   ;;  %292 = vperm.xlu0 %4604, %v162_v2   ;;  %v165_v6 = vld [vmem:[%s7102_s2 + $0x18] sm:$0xff]  ;;  %v163_v8 = vld [vmem:[%s7102_s2 + $0x8] sm:$0xff] }
   0x3   :  { %v4583_v5 = vpack.c.bf16 %v161_v4, %v160_v3  ;;  %v32_v7 = vld [vmem:[%s7104_s1] sm:$0xff]  ;;  %v33_v9 = vld [vmem:[%s7104_s1 + $0x8] sm:$0xff]  ;;  %v34_v11 = vld [vmem:[%s7104_s1 + $0x10] sm:$0xff] }
   0x4   :  { %4391 = vmatprep.mubr.msk.f32.mxu0 %vm930_vm0, %v32_v7  ;;  %v167_v10 = vld [vmem:[%s7102_s2 + $0x28] sm:$0xff]  ;;  %v166_v12 = vld [vmem:[%s7102_s2 + $0x20] sm:$0xff]  ;;  %v35_v13 = vld [vmem:[%s7104_s1 + $0x18] sm:$0xff] }
   0x5   :  { %4584 = vmatprep.subr.bf16.mxu0 %v4583_v5  ;;  %v169_v14 = vld [vmem:[%s7102_s2 + $0x38] sm:$0xff]  ;;  %v36_v15 = vld [vmem:[%s7104_s1 + $0x20] sm:$0xff]  ;;  %v168_v16 = vld [vmem:[%s7102_s2 + $0x30] sm:$0xff] }
   0x6   :  { %4586 = vmatpush3.bf16.msra.mxu0 %v4583_v5  ;;  %307 = vperm.xlu1 %4605, %v165_v6   ;;  %v37_v17 = vld [vmem:[%s7104_s1 + $0x28] sm:$0xff]  ;;  %v38_v19 = vld [vmem:[%s7104_s1 + $0x30] sm:$0xff]  ;;  %v170_v20 = vld [vmem:[%s7102_s2 + $0x40] sm:$0xff] }
   0x7   :  { %297 = vperm.xlu0 %4604, %v163_v8   ;;  %v171_v18 = vld [vmem:[%s7102_s2 + $0x48] sm:$0xff]  ;;  %v39_v21 = vld [vmem:[%s7104_s1 + $0x38] sm:$0xff]  ;;  %v40_v23 = vld [vmem:[%s7104_s1 + $0x40] sm:$0xff] }
   0x8   :  { %v173_v22 = vld [vmem:[%s7102_s2 + $0x58] sm:$0xff]  ;;  %v172_v24 = vld [vmem:[%s7102_s2 + $0x50] sm:$0xff]  ;;  %v41_v25 = vld [vmem:[%s7104_s1 + $0x48] sm:$0xff] }
   0x9   :  { %4392 = vmatmul.mubr.msk.f32.vlgmr.msra.gmra.mrb[0].mxu0 %vm930_vm0, %v33_v9  ;;  %v175_v26 = vld [vmem:[%s7102_s2 + $0x68] sm:$0xff]  ;;  %v42_v27 = vld [vmem:[%s7104_s1 + $0x50] sm:$0xff]  ;;  %v174_v28 = vld [vmem:[%s7102_s2 + $0x60] sm:$0xff] }
   0xa   :  { %317 = vperm.xlu1 %4605, %v167_v10   ;;  %4394 = vmatprep.mubr.msk.f32.mxu0 %vm930_vm0, %v34_v11  ;;  %v43_v29 = vld [vmem:[%s7104_s1 + $0x58] sm:$0xff]  ;;  %v44_v31 = vld [vmem:[%s7104_s1 + $0x60] sm:$0xff]  ;;  %v176_v32 = vld [vmem:[%s7102_s2 + $0x70] sm:$0xff] }
   0xb   :  { %312 = vperm.xlu0 %4604, %v166_v12   ;;  %v177_v30 = vld [vmem:[%s7102_s2 + $0x78] sm:$0xff]  ;;  %v45_v33 = vld [vmem:[%s7104_s1 + $0x68] sm:$0xff]  ;;  %v46_v35 = vld [vmem:[%s7104_s1 + $0x70] sm:$0xff] }
   0xc   :  { %v179_v34 = vld [vmem:[%s7102_s2 + $0x88] sm:$0xff]  ;;  %v178_v36 = vld [vmem:[%s7102_s2 + $0x80] sm:$0xff]  ;;  %v47_v37 = vld [vmem:[%s7104_s1 + $0x78] sm:$0xff] }
   0xd   :  { %4395 = vmatmul.mubr.msk.f32.gmra.mrb[2].mxu0 %vm930_vm0, %v35_v13  ;;  %v181_v38 = vld [vmem:[%s7102_s2 + $0x98] sm:$0xff]  ;;  %v48_v39 = vld [vmem:[%s7104_s1 + $0x80] sm:$0xff]  ;;  %v180_v40 = vld [vmem:[%s7102_s2 + $0x90] sm:$0xff] }
   0xe   :  { %327 = vperm.xlu1 %4605, %v169_v14   ;;  %4397 = vmatprep.mubr.msk.f32.mxu0 %vm930_vm0, %v36_v15  ;;  %v49_v41 = vld [vmem:[%s7104_s1 + $0x88] sm:$0xff]  ;;  %v50_v43 = vld [vmem:[%s7104_s1 + $0x90] sm:$0xff]  ;;  %v182_v44 = vld [vmem:[%s7102_s2 + $0xa0] sm:$0xff] }
   0xf   :  { %322 = vperm.xlu0 %4604, %v168_v16   ;;  %v183_v42 = vld [vmem:[%s7102_s2 + $0xa8] sm:$0xff]  ;;  %v51_v45 = vld [vmem:[%s7104_s1 + $0x98] sm:$0xff]  ;;  %v52_v47 = vld [vmem:[%s7104_s1 + $0xa0] sm:$0xff] }
  0x10   :  { %v185_v46 = vld [vmem:[%s7102_s2 + $0xb8] sm:$0xff]  ;;  %v184_v48 = vld [vmem:[%s7102_s2 + $0xb0] sm:$0xff]  ;;  %v53_v49 = vld [vmem:[%s7104_s1 + $0xa8] sm:$0xff] }
  0x11   :  { %4398 = vmatmul.mubr.msk.f32.gmra.mrb[4].mxu0 %vm930_vm0, %v37_v17  ;;  %v187_v50 = vld [vmem:[%s7102_s2 + $0xc8] sm:$0xff]  ;;  %v54_v51 = vld [vmem:[%s7104_s1 + $0xb0] sm:$0xff]  ;;  %v186_v52 = vld [vmem:[%s7102_s2 + $0xc0] sm:$0xff] }
  0x12   :  { %337 = vperm.xlu1 %4605, %v171_v18   ;;  %4400 = vmatprep.mubr.msk.f32.mxu0 %vm930_vm0, %v38_v19  ;;  %v55_v53 = vld [vmem:[%s7104_s1 + $0xb8] sm:$0xff]  ;;  %v56_v55 = vld [vmem:[%s7104_s1 + $0xc0] sm:$0xff]  ;;  %v188_v56 = vld [vmem:[%s7102_s2 + $0xd0] sm:$0xff] }
  0x13   :  { %332 = vperm.xlu0 %4604, %v170_v20   ;;  %v189_v54 = vld [vmem:[%s7102_s2 + $0xd8] sm:$0xff]  ;;  %v57_v57 = vld [vmem:[%s7104_s1 + $0xc8] sm:$0xff]  ;;  %v58_v59 = vld [vmem:[%s7104_s1 + $0xd0] sm:$0xff] }
  0x14   :  { %v191_v58 = vld [vmem:[%s7102_s2 + $0xe8] sm:$0xff]  ;;  %v190_v60 = vld [vmem:[%s7102_s2 + $0xe0] sm:$0xff]  ;;  %v59_v61 = vld [vmem:[%s7104_s1 + $0xd8] sm:$0xff] }
  0x15   :  { %4401 = vmatmul.mubr.msk.f32.gmra.mrb[6].mxu0 %vm930_vm0, %v39_v21  ;;  %v193_v62 = vld [vmem:[%s7102_s2 + $0xf8] sm:$0xff]  ;;  %v60_v63 = vld [vmem:[%s7104_s1 + $0xe0] sm:$0xff]  ;;  %v192_v0 = vld [vmem:[%s7102_s2 + $0xf0] sm:$0xff] }
  0x16   :  { %347 = vperm.xlu1 %4605, %v173_v22   ;;  %4403 = vmatprep.mubr.msk.f32.mxu0 %vm930_vm0, %v40_v23  ;;  %v61_v1 = vld [vmem:[%s7104_s1 + $0xe8] sm:$0xff]  ;;  %v62_v3 = vld [vmem:[%s7104_s1 + $0xf0] sm:$0xff]  ;;  %v194_v4 = vld [vmem:[%s7102_s2 + $0x100] sm:$0xff] }
  0x17   :  { %342 = vperm.xlu0 %4604, %v172_v24   ;;  %v195_v2 = vld [vmem:[%s7102_s2 + $0x108] sm:$0xff]  ;;  %v63_v5 = vld [vmem:[%s7104_s1 + $0xf8] sm:$0xff]  ;;  %v64_v7 = vld [vmem:[%s7104_s1 + $0x100] sm:$0xff] }
  0x18   :  { %v197_v6 = vld [vmem:[%s7102_s2 + $0x118] sm:$0xff]  ;;  %v196_v8 = vld [vmem:[%s7102_s2 + $0x110] sm:$0xff]  ;;  %v65_v9 = vld [vmem:[%s7104_s1 + $0x108] sm:$0xff] }
  0x19   :  { %4404 = vmatmul.mubr.msk.f32.gmra.mrb[8].mxu0 %vm930_vm0, %v41_v25  ;;  %v199_v10 = vld [vmem:[%s7102_s2 + $0x128] sm:$0xff]  ;;  %v66_v11 = vld [vmem:[%s7104_s1 + $0x110] sm:$0xff]  ;;  %v198_v12 = vld [vmem:[%s7102_s2 + $0x120] sm:$0xff] }
  0x1a   :  { %357 = vperm.xlu1 %4605, %v175_v26   ;;  %4406 = vmatprep.mubr.msk.f32.mxu0 %vm930_vm0, %v42_v27  ;;  %v67_v13 = vld [vmem:[%s7104_s1 + $0x118] sm:$0xff]  ;;  %v68_v15 = vld [vmem:[%s7104_s1 + $0x120] sm:$0xff]  ;;  %v200_v16 = vld [vmem:[%s7102_s2 + $0x130] sm:$0xff] }
  0x1b   :  { %352 = vperm.xlu0 %4604, %v174_v28   ;;  %v201_v14 = vld [vmem:[%s7102_s2 + $0x138] sm:$0xff]  ;;  %v69_v17 = vld [vmem:[%s7104_s1 + $0x128] sm:$0xff]  ;;  %v70_v19 = vld [vmem:[%s7104_s1 + $0x130] sm:$0xff] }
  0x1c   :  { %v203_v18 = vld [vmem:[%s7102_s2 + $0x148] sm:$0xff]  ;;  %v202_v20 = vld [vmem:[%s7102_s2 + $0x140] sm:$0xff]  ;;  %v71_v21 = vld [vmem:[%s7104_s1 + $0x138] sm:$0xff] }
  0x1d   :  { %4407 = vmatmul.mubr.msk.f32.gmra.mrb[10].mxu0 %vm930_vm0, %v43_v29  ;;  %v205_v22 = vld [vmem:[%s7102_s2 + $0x158] sm:$0xff]  ;;  %v72_v23 = vld [vmem:[%s7104_s1 + $0x140] sm:$0xff]  ;;  %v204_v24 = vld [vmem:[%s7102_s2 + $0x150] sm:$0xff] }
  0x1e   :  { %367 = vperm.xlu1 %4605, %v177_v30   ;;  %4409 = vmatprep.mubr.msk.f32.mxu0 %vm930_vm0, %v44_v31  ;;  %v73_v25 = vld [vmem:[%s7104_s1 + $0x148] sm:$0xff]  ;;  %v74_v27 = vld [vmem:[%s7104_s1 + $0x150] sm:$0xff]  ;;  %v206_v28 = vld [vmem:[%s7102_s2 + $0x160] sm:$0xff] }
  0x1f   :  { %362 = vperm.xlu0 %4604, %v176_v32   ;;  %v207_v26 = vld [vmem:[%s7102_s2 + $0x168] sm:$0xff]  ;;  %v75_v29 = vld [vmem:[%s7104_s1 + $0x158] sm:$0xff]  ;;  %v76_v31 = vld [vmem:[%s7104_s1 + $0x160] sm:$0xff] }
  0x20   :  { %v209_v30 = vld [vmem:[%s7102_s2 + $0x178] sm:$0xff]  ;;  %v208_v32 = vld [vmem:[%s7102_s2 + $0x170] sm:$0xff] }
  0x21   :  { %4410 = vmatmul.mubr.msk.f32.gmra.mrb[12].mxu0 %vm930_vm0, %v45_v33  ;;  %v77_v33 = vld [vmem:[%s7104_s1 + $0x168] sm:$0xff] }
  0x22   :  { %377 = vperm.xlu1 %4605, %v179_v34   ;;  %4412 = vmatprep.mubr.msk.f32.mxu0 %vm930_vm0, %v46_v35  ;;  %v211_v34 = vld [vmem:[%s7102_s2 + $0x188] sm:$0xff]  ;;  %v78_v35 = vld [vmem:[%s7104_s1 + $0x170] sm:$0xff] }
  0x23   :  { %372 = vperm.xlu0 %4604, %v178_v36   ;;  %v210_v36 = vld [vmem:[%s7102_s2 + $0x180] sm:$0xff] }
  0x25   :  { %4413 = vmatmul.mubr.msk.f32.gmra.mrb[14].mxu0 %vm930_vm0, %v47_v37  ;;  %v79_v37 = vld [vmem:[%s7104_s1 + $0x178] sm:$0xff] }
  0x26   :  { %387 = vperm.xlu1 %4605, %v181_v38   ;;  %4415 = vmatprep.mubr.msk.f32.mxu0 %vm930_vm0, %v48_v39  ;;  %v213_v38 = vld [vmem:[%s7102_s2 + $0x198] sm:$0xff]  ;;  %v80_v39 = vld [vmem:[%s7104_s1 + $0x180] sm:$0xff] }
  0x27   :  { %382 = vperm.xlu0 %4604, %v180_v40   ;;  %v212_v40 = vld [vmem:[%s7102_s2 + $0x190] sm:$0xff] }
  0x29   :  { %4416 = vmatmul.mubr.msk.f32.gmra.mrb[16].mxu0 %vm930_vm0, %v49_v41  ;;  %v81_v41 = vld [vmem:[%s7104_s1 + $0x188] sm:$0xff] }
  0x2a   :  { %397 = vperm.xlu1 %4605, %v183_v42   ;;  %4418 = vmatprep.mubr.msk.f32.mxu0 %vm930_vm0, %v50_v43  ;;  %v215_v42 = vld [vmem:[%s7102_s2 + $0x1a8] sm:$0xff]  ;;  %v82_v43 = vld [vmem:[%s7104_s1 + $0x190] sm:$0xff] }
  0x2b   :  { %392 = vperm.xlu0 %4604, %v182_v44   ;;  %v214_v44 = vld [vmem:[%s7102_s2 + $0x1a0] sm:$0xff] }
  0x2d   :  { %4419 = vmatmul.mubr.msk.f32.gmra.mrb[18].mxu0 %vm930_vm0, %v51_v45  ;;  %v83_v45 = vld [vmem:[%s7104_s1 + $0x198] sm:$0xff] }
  0x2e   :  { %407 = vperm.xlu1 %4605, %v185_v46   ;;  %4421 = vmatprep.mubr.msk.f32.mxu0 %vm930_vm0, %v52_v47  ;;  %v217_v46 = vld [vmem:[%s7102_s2 + $0x1b8] sm:$0xff]  ;;  %v84_v47 = vld [vmem:[%s7104_s1 + $0x1a0] sm:$0xff] }
  0x2f   :  { %402 = vperm.xlu0 %4604, %v184_v48   ;;  %v216_v48 = vld [vmem:[%s7102_s2 + $0x1b0] sm:$0xff] }
  0x31   :  { %4422 = vmatmul.mubr.msk.f32.gmra.mrb[20].mxu0 %vm930_vm0, %v53_v49  ;;  %v85_v49 = vld [vmem:[%s7104_s1 + $0x1a8] sm:$0xff] }
  0x32   :  { %417 = vperm.xlu1 %4605, %v187_v50   ;;  %4424 = vmatprep.mubr.msk.f32.mxu0 %vm930_vm0, %v54_v51  ;;  %v219_v50 = vld [vmem:[%s7102_s2 + $0x1c8] sm:$0xff]  ;;  %v86_v51 = vld [vmem:[%s7104_s1 + $0x1b0] sm:$0xff] }
  0x33   :  { %412 = vperm.xlu0 %4604, %v186_v52   ;;  %v218_v52 = vld [vmem:[%s7102_s2 + $0x1c0] sm:$0xff] }
  0x35   :  { %4425 = vmatmul.mubr.msk.f32.gmra.mrb[22].mxu0 %vm930_vm0, %v55_v53  ;;  %v87_v53 = vld [vmem:[%s7104_s1 + $0x1b8] sm:$0xff] }
  0x36   :  { %427 = vperm.xlu1 %4605, %v189_v54   ;;  %4427 = vmatprep.mubr.msk.f32.mxu0 %vm930_vm0, %v56_v55  ;;  %v221_v54 = vld [vmem:[%s7102_s2 + $0x1d8] sm:$0xff]  ;;  %v88_v55 = vld [vmem:[%s7104_s1 + $0x1c0] sm:$0xff] }
  0x37   :  { %422 = vperm.xlu0 %4604, %v188_v56   ;;  %v220_v56 = vld [vmem:[%s7102_s2 + $0x1d0] sm:$0xff] }
  0x39   :  { %4428 = vmatmul.mubr.msk.f32.gmra.mrb[24].mxu0 %vm930_vm0, %v57_v57  ;;  %v89_v57 = vld [vmem:[%s7104_s1 + $0x1c8] sm:$0xff] }
  0x3a   :  { %437 = vperm.xlu1 %4605, %v191_v58   ;;  %4430 = vmatprep.mubr.msk.f32.mxu0 %vm930_vm0, %v58_v59  ;;  %v223_v58 = vld [vmem:[%s7102_s2 + $0x1e8] sm:$0xff]  ;;  %v90_v59 = vld [vmem:[%s7104_s1 + $0x1d0] sm:$0xff] }
  0x3b   :  { %432 = vperm.xlu0 %4604, %v190_v60   ;;  %v222_v60 = vld [vmem:[%s7102_s2 + $0x1e0] sm:$0xff] }
  0x3d   :  { %4431 = vmatmul.mubr.msk.f32.gmra.mrb[26].mxu0 %vm930_vm0, %v59_v61  ;;  %v91_v61 = vld [vmem:[%s7104_s1 + $0x1d8] sm:$0xff] }
  0x3e   :  { %447 = vperm.xlu1 %4605, %v193_v62   ;;  %4433 = vmatprep.mubr.msk.f32.mxu0 %vm930_vm0, %v60_v63  ;;  %v225_v62 = vld [vmem:[%s7102_s2 + $0x1f8] sm:$0xff]  ;;  %v92_v63 = vld [vmem:[%s7104_s1 + $0x1e0] sm:$0xff] }
  0x3f   :  { %442 = vperm.xlu0 %4604, %v192_v0   ;;  %v224_v0 = vld [vmem:[%s7102_s2 + $0x1f0] sm:$0xff] }
  0x41   :  { %4434 = vmatmul.mubr.msk.f32.gmra.mrb[28].mxu0 %vm930_vm0, %v61_v1  ;;  %v93_v1 = vld [vmem:[%s7104_s1 + $0x1e8] sm:$0xff] }
  0x42   :  { %457 = vperm.xlu1 %4605, %v195_v2   ;;  %4436 = vmatprep.mubr.msk.f32.mxu0 %vm930_vm0, %v62_v3  ;;  %v227_v2 = vld [vmem:[%s7102_s2 + $0x208] sm:$0xff]  ;;  %v94_v3 = vld [vmem:[%s7104_s1 + $0x1f0] sm:$0xff] }
  0x43   :  { %452 = vperm.xlu0 %4604, %v194_v4   ;;  %v226_v4 = vld [vmem:[%s7102_s2 + $0x200] sm:$0xff] }
  0x45   :  { %4437 = vmatmul.mubr.msk.f32.gmra.mrb[30].mxu0 %vm930_vm0, %v63_v5 }
  0x46   :  { %467 = vperm.xlu1 %4605, %v197_v6   ;;  %4439 = vmatprep.mubr.msk.f32.mxu0 %vm930_vm0, %v64_v7  ;;  %v95_v7 = vld [vmem:[%s7104_s1 + $0x1f8] sm:$0xff] }
  0x47   :  { %462 = vperm.xlu0 %4604, %v196_v8   ;;  %v229_v8 = vld [vmem:[%s7102_s2 + $0x218] sm:$0xff] }
  0x49   :  { %4440 = vmatmul.mubr.msk.f32.gmra.mrb[32].mxu0 %vm930_vm0, %v65_v9  ;;  %v96_v9 = vld [vmem:[%s7104_s1 + $0x200] sm:$0xff] }
  0x4a   :  { %477 = vperm.xlu1 %4605, %v199_v10   ;;  %4442 = vmatprep.mubr.msk.f32.mxu0 %vm930_vm0, %v66_v11  ;;  %v228_v10 = vld [vmem:[%s7102_s2 + $0x210] sm:$0xff] }
  0x4b   :  { %472 = vperm.xlu0 %4604, %v198_v12  }
  0x4d   :  { %4443 = vmatmul.mubr.msk.f32.gmra.mrb[34].mxu0 %vm930_vm0, %v67_v13  ;;  %v97_v13 = vld [vmem:[%s7104_s1 + $0x208] sm:$0xff] }
  0x4e   :  { %487 = vperm.xlu1 %4605, %v201_v14   ;;  %4445 = vmatprep.mubr.msk.f32.mxu0 %vm930_vm0, %v68_v15  ;;  %v231_v14 = vld [vmem:[%s7102_s2 + $0x228] sm:$0xff]  ;;  %v98_v15 = vld [vmem:[%s7104_s1 + $0x210] sm:$0xff] }
  0x4f   :  { %482 = vperm.xlu0 %4604, %v200_v16   ;;  %v230_v16 = vld [vmem:[%s7102_s2 + $0x220] sm:$0xff] }
  0x51   :  { %4446 = vmatmul.mubr.msk.f32.gmra.mrb[36].mxu0 %vm930_vm0, %v69_v17 }
  0x52   :  { %497 = vperm.xlu1 %4605, %v203_v18   ;;  %4448 = vmatprep.mubr.msk.f32.mxu0 %vm930_vm0, %v70_v19  ;;  %v99_v19 = vld [vmem:[%s7104_s1 + $0x218] sm:$0xff] }
  0x53   :  { %492 = vperm.xlu0 %4604, %v202_v20   ;;  %v233_v20 = vld [vmem:[%s7102_s2 + $0x238] sm:$0xff] }
  0x55   :  { %4449 = vmatmul.mubr.msk.f32.gmra.mrb[38].mxu0 %vm930_vm0, %v71_v21  ;;  %v100_v21 = vld [vmem:[%s7104_s1 + $0x220] sm:$0xff] }
  0x56   :  { %507 = vperm.xlu1 %4605, %v205_v22   ;;  %4451 = vmatprep.mubr.msk.f32.mxu0 %vm930_vm0, %v72_v23  ;;  %v232_v22 = vld [vmem:[%s7102_s2 + $0x230] sm:$0xff] }
  0x57   :  { %502 = vperm.xlu0 %4604, %v204_v24  }
  0x59   :  { %4452 = vmatmul.mubr.msk.f32.gmra.mrb[40].mxu0 %vm930_vm0, %v73_v25  ;;  %v101_v25 = vld [vmem:[%s7104_s1 + $0x228] sm:$0xff] }
  0x5a   :  { %517 = vperm.xlu1 %4605, %v207_v26   ;;  %4454 = vmatprep.mubr.msk.f32.mxu0 %vm930_vm0, %v74_v27  ;;  %v235_v26 = vld [vmem:[%s7102_s2 + $0x248] sm:$0xff]  ;;  %v102_v27 = vld [vmem:[%s7104_s1 + $0x230] sm:$0xff] }
  0x5b   :  { %512 = vperm.xlu0 %4604, %v206_v28   ;;  %v234_v28 = vld [vmem:[%s7102_s2 + $0x240] sm:$0xff] }
  0x5d   :  { %4455 = vmatmul.mubr.msk.f32.gmra.mrb[42].mxu0 %vm930_vm0, %v75_v29 }
  0x5e   :  { %527 = vperm.xlu1 %4605, %v209_v30   ;;  %4457 = vmatprep.mubr.msk.f32.mxu0 %vm930_vm0, %v76_v31  ;;  %v103_v31 = vld [vmem:[%s7104_s1 + $0x238] sm:$0xff] }
  0x5f   :  { %522 = vperm.xlu0 %4604, %v208_v32   ;;  %v237_v32 = vld [vmem:[%s7102_s2 + $0x258] sm:$0xff] }
  0x61   :  { %4458 = vmatmul.mubr.msk.f32.gmra.mrb[44].mxu0 %vm930_vm0, %v77_v33  ;;  %v104_v33 = vld [vmem:[%s7104_s1 + $0x240] sm:$0xff] }
  0x62   :  { %537 = vperm.xlu1 %4605, %v211_v34   ;;  %4460 = vmatprep.mubr.msk.f32.mxu0 %vm930_vm0, %v78_v35  ;;  %v236_v34 = vld [vmem:[%s7102_s2 + $0x250] sm:$0xff] }
  0x63   :  { %532 = vperm.xlu0 %4604, %v210_v36  }
  0x65   :  { %4461 = vmatmul.mubr.msk.f32.gmra.mrb[46].mxu0 %vm930_vm0, %v79_v37  ;;  %v105_v37 = vld [vmem:[%s7104_s1 + $0x248] sm:$0xff] }
  0x66   :  { %547 = vperm.xlu1 %4605, %v213_v38   ;;  %4463 = vmatprep.mubr.msk.f32.mxu0 %vm930_vm0, %v80_v39  ;;  %v239_v38 = vld [vmem:[%s7102_s2 + $0x268] sm:$0xff]  ;;  %v106_v39 = vld [vmem:[%s7104_s1 + $0x250] sm:$0xff] }
  0x67   :  { %542 = vperm.xlu0 %4604, %v212_v40   ;;  %v238_v40 = vld [vmem:[%s7102_s2 + $0x260] sm:$0xff] }
  0x69   :  { %4464 = vmatmul.mubr.msk.f32.gmra.mrb[48].mxu0 %vm930_vm0, %v81_v41 }
  0x6a   :  { %557 = vperm.xlu1 %4605, %v215_v42   ;;  %4466 = vmatprep.mubr.msk.f32.mxu0 %vm930_vm0, %v82_v43  ;;  %v107_v43 = vld [vmem:[%s7104_s1 + $0x258] sm:$0xff] }
  0x6b   :  { %552 = vperm.xlu0 %4604, %v214_v44   ;;  %v241_v44 = vld [vmem:[%s7102_s2 + $0x278] sm:$0xff] }
  0x6d   :  { %4467 = vmatmul.mubr.msk.f32.gmra.mrb[50].mxu0 %vm930_vm0, %v83_v45  ;;  %v108_v45 = vld [vmem:[%s7104_s1 + $0x260] sm:$0xff] }
  0x6e   :  { %567 = vperm.xlu1 %4605, %v217_v46   ;;  %4469 = vmatprep.mubr.msk.f32.mxu0 %vm930_vm0, %v84_v47  ;;  %v240_v46 = vld [vmem:[%s7102_s2 + $0x270] sm:$0xff] }
  0x6f   :  { %562 = vperm.xlu0 %4604, %v216_v48  }
  0x71   :  { %4470 = vmatmul.mubr.msk.f32.gmra.mrb[52].mxu0 %vm930_vm0, %v85_v49  ;;  %v109_v49 = vld [vmem:[%s7104_s1 + $0x268] sm:$0xff] }
  0x72   :  { %577 = vperm.xlu1 %4605, %v219_v50   ;;  %4472 = vmatprep.mubr.msk.f32.mxu0 %vm930_vm0, %v86_v51  ;;  %v243_v50 = vld [vmem:[%s7102_s2 + $0x288] sm:$0xff]  ;;  %v110_v51 = vld [vmem:[%s7104_s1 + $0x270] sm:$0xff] }
  0x73   :  { %572 = vperm.xlu0 %4604, %v218_v52   ;;  %v242_v52 = vld [vmem:[%s7102_s2 + $0x280] sm:$0xff] }
  0x75   :  { %4473 = vmatmul.mubr.msk.f32.gmra.mrb[54].mxu0 %vm930_vm0, %v87_v53 }
  0x76   :  { %587 = vperm.xlu1 %4605, %v221_v54   ;;  %4475 = vmatprep.mubr.msk.f32.mxu0 %vm930_vm0, %v88_v55  ;;  %v111_v55 = vld [vmem:[%s7104_s1 + $0x278] sm:$0xff] }
  0x77   :  { %582 = vperm.xlu0 %4604, %v220_v56   ;;  %v245_v56 = vld [vmem:[%s7102_s2 + $0x298] sm:$0xff] }
  0x79   :  { %4476 = vmatmul.mubr.msk.f32.gmra.mrb[56].mxu0 %vm930_vm0, %v89_v57  ;;  %v112_v57 = vld [vmem:[%s7104_s1 + $0x280] sm:$0xff] }
  0x7a   :  { %597 = vperm.xlu1 %4605, %v223_v58   ;;  %4478 = vmatprep.mubr.msk.f32.mxu0 %vm930_vm0, %v90_v59  ;;  %v244_v58 = vld [vmem:[%s7102_s2 + $0x290] sm:$0xff] }
  0x7b   :  { %592 = vperm.xlu0 %4604, %v222_v60  }
  0x7d   :  { %4479 = vmatmul.mubr.msk.f32.gmra.mrb[58].mxu0 %vm930_vm0, %v91_v61  ;;  %v113_v61 = vld [vmem:[%s7104_s1 + $0x288] sm:$0xff] }
  0x7e   :  { %607 = vperm.xlu1 %4605, %v225_v62   ;;  %4481 = vmatprep.mubr.msk.f32.mxu0 %vm930_vm0, %v92_v63  ;;  %v247_v62 = vld [vmem:[%s7102_s2 + $0x2a8] sm:$0xff]  ;;  %v114_v63 = vld [vmem:[%s7104_s1 + $0x290] sm:$0xff] }
  0x7f   :  { %602 = vperm.xlu0 %4604, %v224_v0   ;;  %v246_v0 = vld [vmem:[%s7102_s2 + $0x2a0] sm:$0xff] }
  0x81   :  { %4482 = vmatmul.mubr.msk.f32.gmra.mrb[60].mxu0 %vm930_vm0, %v93_v1  ;;  %v5203_v5 = vpop.permute.xlu1 %302  ;;  %v5205_v6 = vpop.permute.xlu0 %292 }
  0x82   :  { %7112 = vst [vmem:[#allocation3_spill] sm:$0xff] %v5203_v5  ;;  %7113 = vst [vmem:[#allocation4_spill] sm:$0xff] %v5205_v6  ;;  %617 = vperm.xlu1 %4605, %v227_v2   ;;  %4484 = vmatprep.mubr.msk.f32.mxu0 %vm930_vm0, %v94_v3  ;;  %v115_v3 = vld [vmem:[%s7104_s1 + $0x298] sm:$0xff] }
  0x83   :  { %612 = vperm.xlu0 %4604, %v226_v4   ;;  %v249_v4 = vld [vmem:[%s7102_s2 + $0x2b8] sm:$0xff] }
  0x85   :  { %4485 = vmatmul.mubr.msk.f32.gmra.mrb[62].mxu0 %vm930_vm0, %v95_v7  ;;  %v5221_v11 = vpop.permute.xlu1 %307  ;;  %v116_v7 = vld [vmem:[%s7104_s1 + $0x2a0] sm:$0xff] }
  0x86   :  { %7114 = vst [vmem:[#allocation5_spill] sm:$0xff] %v5221_v11  ;;  %v5223_v12 = vpop.permute.xlu0 %297  ;;  %627 = vperm.xlu1 %4605, %v229_v8   ;;  %4487 = vmatprep.mubr.msk.f32.mxu0 %vm930_vm0, %v96_v9  ;;  %v248_v8 = vld [vmem:[%s7102_s2 + $0x2b0] sm:$0xff] }
  0x87   :  { %622 = vperm.xlu0 %4604, %v228_v10  }
  0x89   :  { %4488 = vmatmul.mubr.msk.f32.gmra.mrb[64].mxu0 %vm930_vm0, %v97_v13  ;;  %v5239_v17 = vpop.permute.xlu1 %317  ;;  %v117_v13 = vld [vmem:[%s7104_s1 + $0x2a8] sm:$0xff] }
  0x8a   :  { %7115 = vst [vmem:[#allocation6_spill] sm:$0xff] %v5239_v17  ;;  %v5241_v18 = vpop.permute.xlu0 %312  ;;  %637 = vperm.xlu1 %4605, %v231_v14   ;;  %4490 = vmatprep.mubr.msk.f32.mxu0 %vm930_vm0, %v98_v15  ;;  %v251_v14 = vld [vmem:[%s7102_s2 + $0x2c8] sm:$0xff]  ;;  %v118_v15 = vld [vmem:[%s7104_s1 + $0x2b0] sm:$0xff] }
  0x8b   :  { %7116 = vst [vmem:[#allocation7_spill] sm:$0xff] %v5241_v18  ;;  %632 = vperm.xlu0 %4604, %v230_v16   ;;  %v250_v16 = vld [vmem:[%s7102_s2 + $0x2c0] sm:$0xff] }
  0x8d   :  { %4491 = vmatmul.mubr.msk.f32.gmra.mrb[66].mxu0 %vm930_vm0, %v99_v19  ;;  %v5257_v23 = vpop.permute.xlu1 %327 }
  0x8e   :  { %7117 = vst [vmem:[#allocation8_spill] sm:$0xff] %v5257_v23  ;;  %v5259_v24 = vpop.permute.xlu0 %322  ;;  %647 = vperm.xlu1 %4605, %v233_v20   ;;  %4493 = vmatprep.mubr.msk.f32.mxu0 %vm930_vm0, %v100_v21  ;;  %v119_v21 = vld [vmem:[%s7104_s1 + $0x2b8] sm:$0xff] }
  0x8f   :  { %7118 = vst [vmem:[#allocation9_spill] sm:$0xff] %v5259_v24  ;;  %642 = vperm.xlu0 %4604, %v232_v22   ;;  %v253_v22 = vld [vmem:[%s7102_s2 + $0x2d8] sm:$0xff] }
  0x91   :  { %4494 = vmatmul.mubr.msk.f32.gmra.mrb[68].mxu0 %vm930_vm0, %v101_v25  ;;  %v5275_v29 = vpop.permute.xlu1 %337  ;;  %v120_v25 = vld [vmem:[%s7104_s1 + $0x2c0] sm:$0xff] }
  0x92   :  { %7119 = vst [vmem:[#allocation10_spill] sm:$0xff] %v5275_v29  ;;  %v5277_v30 = vpop.permute.xlu0 %332  ;;  %657 = vperm.xlu1 %4605, %v235_v26   ;;  %4496 = vmatprep.mubr.msk.f32.mxu0 %vm930_vm0, %v102_v27  ;;  %v252_v26 = vld [vmem:[%s7102_s2 + $0x2d0] sm:$0xff] }
  0x93   :  { %7120 = vst [vmem:[#allocation11_spill] sm:$0xff] %v5277_v30  ;;  %652 = vperm.xlu0 %4604, %v234_v28  }
  0x95   :  { %4497 = vmatmul.mubr.msk.f32.gmra.mrb[70].mxu0 %vm930_vm0, %v103_v31  ;;  %v5293_v35 = vpop.permute.xlu1 %347  ;;  %v121_v31 = vld [vmem:[%s7104_s1 + $0x2c8] sm:$0xff] }
  0x96   :  { %7121 = vst [vmem:[#allocation12_spill] sm:$0xff] %v5293_v35  ;;  %v5295_v36 = vpop.permute.xlu0 %342  ;;  %667 = vperm.xlu1 %4605, %v237_v32   ;;  %4499 = vmatprep.mubr.msk.f32.mxu0 %vm930_vm0, %v104_v33  ;;  %v255_v32 = vld [vmem:[%s7102_s2 + $0x2e8] sm:$0xff]  ;;  %v122_v33 = vld [vmem:[%s7104_s1 + $0x2d0] sm:$0xff] }
  0x97   :  { %7122 = vst [vmem:[#allocation13_spill] sm:$0xff] %v5295_v36  ;;  %662 = vperm.xlu0 %4604, %v236_v34   ;;  %v254_v34 = vld [vmem:[%s7102_s2 + $0x2e0] sm:$0xff] }
  0x99   :  { %4500 = vmatmul.mubr.msk.f32.gmra.mrb[72].mxu0 %vm930_vm0, %v105_v37  ;;  %v5311_v41 = vpop.permute.xlu1 %357 }
  0x9a   :  { %7123 = vst [vmem:[#allocation14_spill] sm:$0xff] %v5311_v41  ;;  %v5313_v42 = vpop.permute.xlu0 %352  ;;  %677 = vperm.xlu1 %4605, %v239_v38   ;;  %4502 = vmatprep.mubr.msk.f32.mxu0 %vm930_vm0, %v106_v39  ;;  %v123_v39 = vld [vmem:[%s7104_s1 + $0x2d8] sm:$0xff] }
  0x9b   :  { %7124 = vst [vmem:[#allocation15_spill] sm:$0xff] %v5313_v42  ;;  %672 = vperm.xlu0 %4604, %v238_v40   ;;  %v257_v40 = vld [vmem:[%s7102_s2 + $0x2f8] sm:$0xff] }
  0x9d   :  { %4503 = vmatmul.mubr.msk.f32.gmra.mrb[74].mxu0 %vm930_vm0, %v107_v43  ;;  %v5329_v47 = vpop.permute.xlu1 %367  ;;  %v124_v43 = vld [vmem:[%s7104_s1 + $0x2e0] sm:$0xff] }
  0x9e   :  { %7125 = vst [vmem:[#allocation16_spill] sm:$0xff] %v5329_v47  ;;  %v5331_v48 = vpop.permute.xlu0 %362  ;;  %687 = vperm.xlu1 %4605, %v241_v44   ;;  %4505 = vmatprep.mubr.msk.f32.mxu0 %vm930_vm0, %v108_v45  ;;  %v256_v44 = vld [vmem:[%s7102_s2 + $0x2f0] sm:$0xff] }
  0x9f   :  { %7126 = vst [vmem:[#allocation17_spill] sm:$0xff] %v5331_v48  ;;  %682 = vperm.xlu0 %4604, %v240_v46  }
  0xa1   :  { %4506 = vmatmul.mubr.msk.f32.gmra.mrb[76].mxu0 %vm930_vm0, %v109_v49  ;;  %v5347_v53 = vpop.permute.xlu1 %377  ;;  %v125_v49 = vld [vmem:[%s7104_s1 + $0x2e8] sm:$0xff] }
  0xa2   :  { %7127 = vst [vmem:[#allocation18_spill] sm:$0xff] %v5347_v53  ;;  %v5349_v54 = vpop.permute.xlu0 %372  ;;  %697 = vperm.xlu1 %4605, %v243_v50   ;;  %4508 = vmatprep.mubr.msk.f32.mxu0 %vm930_vm0, %v110_v51  ;;  %v259_v50 = vld [vmem:[%s7102_s2 + $0x308] sm:$0xff]  ;;  %v126_v51 = vld [vmem:[%s7104_s1 + $0x2f0] sm:$0xff] }
  0xa3   :  { %7128 = vst [vmem:[#allocation19_spill] sm:$0xff] %v5349_v54  ;;  %692 = vperm.xlu0 %4604, %v242_v52   ;;  %v258_v52 = vld [vmem:[%s7102_s2 + $0x300] sm:$0xff]  ;;  %v2202_v54 = vld [vmem:[%s7105_s4 + $0xb0] sm:$0xff] }
  0xa5   :  { %4509 = vmatmul.mubr.msk.f32.gmra.mrb[78].mxu0 %vm930_vm0, %v111_v55  ;;  %v5365_v59 = vpop.permute.xlu1 %387 }
  0xa6   :  { %7129 = vst [vmem:[#allocation20_spill] sm:$0xff] %v5365_v59  ;;  %v5367_v60 = vpop.permute.xlu0 %382  ;;  %707 = vperm.xlu1 %4605, %v245_v56   ;;  %4511 = vmatprep.mubr.msk.f32.mxu0 %vm930_vm0, %v112_v57  ;;  %v127_v57 = vld [vmem:[%s7104_s1 + $0x2f8] sm:$0xff] }
  0xa7   :  { %7130 = vst [vmem:[#allocation21_spill] sm:$0xff] %v5367_v60  ;;  %702 = vperm.xlu0 %4604, %v244_v58   ;;  %v261_v58 = vld [vmem:[%s7102_s2 + $0x318] sm:$0xff] }
  0xa9   :  { %4512 = vmatmul.mubr.msk.f32.gmra.mrb[80].mxu0 %vm930_vm0, %v113_v61  ;;  %v5383_v1 = vpop.permute.xlu1 %397  ;;  %v128_v61 = vld [vmem:[%s7104_s1 + $0x300] sm:$0xff] }
  0xaa   :  { %7131 = vst [vmem:[#allocation22_spill] sm:$0xff] %v5383_v1  ;;  %v5385_v2 = vpop.permute.xlu0 %392  ;;  %717 = vperm.xlu1 %4605, %v247_v62   ;;  %4514 = vmatprep.mubr.msk.f32.mxu0 %vm930_vm0, %v114_v63  ;;  %v260_v62 = vld [vmem:[%s7102_s2 + $0x310] sm:$0xff] }
  0xab   :  { %7132 = vst [vmem:[#allocation23_spill] sm:$0xff] %v5385_v2  ;;  %712 = vperm.xlu0 %4604, %v246_v0  }
  0xad   :  { %4515 = vmatmul.mubr.msk.f32.gmra.mrb[82].mxu0 %vm930_vm0, %v115_v3  ;;  %v5401_v9 = vpop.permute.xlu1 %407  ;;  %v129_v3 = vld [vmem:[%s7104_s1 + $0x308] sm:$0xff] }
  0xae   :  { %7133 = vst [vmem:[#allocation24_spill] sm:$0xff] %v5401_v9  ;;  %v5403_v10 = vpop.permute.xlu0 %402  ;;  %727 = vperm.xlu1 %4605, %v249_v4   ;;  %4517 = vmatprep.mubr.msk.f32.mxu0 %vm930_vm0, %v116_v7  ;;  %v263_v4 = vld [vmem:[%s7102_s2 + $0x328] sm:$0xff]  ;;  %v130_v7 = vld [vmem:[%s7104_s1 + $0x310] sm:$0xff] }
  0xaf   :  { %7134 = vst [vmem:[#allocation25_spill] sm:$0xff] %v5403_v10  ;;  %722 = vperm.xlu0 %4604, %v248_v8   ;;  %v262_v8 = vld [vmem:[%s7102_s2 + $0x320] sm:$0xff] }
  0xb1   :  { %4518 = vmatmul.mubr.msk.f32.gmra.mrb[84].mxu0 %vm930_vm0, %v117_v13  ;;  %v5419_v19 = vpop.permute.xlu1 %417 }
  0xb2   :  { %7135 = vst [vmem:[#allocation26_spill] sm:$0xff] %v5419_v19  ;;  %v5421_v20 = vpop.permute.xlu0 %412  ;;  %737 = vperm.xlu1 %4605, %v251_v14   ;;  %4520 = vmatprep.mubr.msk.f32.mxu0 %vm930_vm0, %v118_v15  ;;  %v131_v15 = vld [vmem:[%s7104_s1 + $0x318] sm:$0xff] }
  0xb3   :  { %7136 = vst [vmem:[#allocation27_spill] sm:$0xff] %v5421_v20  ;;  %732 = vperm.xlu0 %4604, %v250_v16   ;;  %v265_v16 = vld [vmem:[%s7102_s2 + $0x338] sm:$0xff]  ;;  %v2188_v20 = vld [vmem:[%s7105_s4 + $0x40] sm:$0xff] }
  0xb5   :  { %4521 = vmatmul.mubr.msk.f32.gmra.mrb[86].mxu0 %vm930_vm0, %v119_v21  ;;  %v5437_v27 = vpop.permute.xlu1 %427  ;;  %v132_v21 = vld [vmem:[%s7104_s1 + $0x320] sm:$0xff] }
  0xb6   :  { %7137 = vst [vmem:[#allocation28_spill] sm:$0xff] %v5437_v27  ;;  %v5439_v28 = vpop.permute.xlu0 %422  ;;  %747 = vperm.xlu1 %4605, %v253_v22   ;;  %4523 = vmatprep.mubr.msk.f32.mxu0 %vm930_vm0, %v120_v25  ;;  %v264_v22 = vld [vmem:[%s7102_s2 + $0x330] sm:$0xff] }
  0xb7   :  { %7138 = vst [vmem:[#allocation29_spill] sm:$0xff] %v5439_v28  ;;  %742 = vperm.xlu0 %4604, %v252_v26  }
  0xb9   :  { %4524 = vmatmul.mubr.msk.f32.gmra.mrb[88].mxu0 %vm930_vm0, %v121_v31  ;;  %v5455_v37 = vpop.permute.xlu1 %437  ;;  %v133_v31 = vld [vmem:[%s7104_s1 + $0x328] sm:$0xff] }
  0xba   :  { %7139 = vst [vmem:[#allocation30_spill] sm:$0xff] %v5455_v37  ;;  %v5457_v38 = vpop.permute.xlu0 %432  ;;  %757 = vperm.xlu1 %4605, %v255_v32   ;;  %4526 = vmatprep.mubr.msk.f32.mxu0 %vm930_vm0, %v122_v33  ;;  %v267_v32 = vld [vmem:[%s7102_s2 + $0x348] sm:$0xff]  ;;  %v134_v33 = vld [vmem:[%s7104_s1 + $0x330] sm:$0xff] }
  0xbb   :  { %7140 = vst [vmem:[#allocation31_spill] sm:$0xff] %v5457_v38  ;;  %752 = vperm.xlu0 %4604, %v254_v34   ;;  %v266_v34 = vld [vmem:[%s7102_s2 + $0x340] sm:$0xff]  ;;  %v2186_v38 = vld [vmem:[%s7105_s4 + $0x30] sm:$0xff] }
  0xbd   :  { %4527 = vmatmul.mubr.msk.f32.gmra.mrb[90].mxu0 %vm930_vm0, %v123_v39  ;;  %v5473_v45 = vpop.permute.xlu1 %447 }
  0xbe   :  { %7141 = vst [vmem:[#allocation32_spill] sm:$0xff] %v5473_v45  ;;  %v5475_v46 = vpop.permute.xlu0 %442  ;;  %767 = vperm.xlu1 %4605, %v257_v40   ;;  %4529 = vmatprep.mubr.msk.f32.mxu0 %vm930_vm0, %v124_v43  ;;  %v135_v43 = vld [vmem:[%s7104_s1 + $0x338] sm:$0xff] }
  0xbf   :  { %7142 = vst [vmem:[#allocation33_spill] sm:$0xff] %v5475_v46  ;;  %762 = vperm.xlu0 %4604, %v256_v44   ;;  %v269_v44 = vld [vmem:[%s7102_s2 + $0x358] sm:$0xff] }
  0xc1   :  { %4530 = vmatmul.mubr.msk.f32.gmra.mrb[92].mxu0 %vm930_vm0, %v125_v49  ;;  %v5491_v55 = vpop.permute.xlu1 %457  ;;  %v136_v49 = vld [vmem:[%s7104_s1 + $0x340] sm:$0xff] }
  0xc2   :  { %7143 = vst [vmem:[#allocation34_spill] sm:$0xff] %v5491_v55  ;;  %v5493_v56 = vpop.permute.xlu0 %452  ;;  %777 = vperm.xlu1 %4605, %v259_v50   ;;  %4532 = vmatprep.mubr.msk.f32.mxu0 %vm930_vm0, %v126_v51  ;;  %v268_v50 = vld [vmem:[%s7102_s2 + $0x350] sm:$0xff]  ;;  %v2184_v55 = vld [vmem:[%s7105_s4 + $0x20] sm:$0xff] }
  0xc3   :  { %7144 = vst [vmem:[#allocation35_spill] sm:$0xff] %v5493_v56  ;;  %772 = vperm.xlu0 %4604, %v258_v52  }
  0xc5   :  { %4533 = vmatmul.mubr.msk.f32.gmra.mrb[94].mxu0 %vm930_vm0, %v127_v57  ;;  %v5509_v63 = vpop.permute.xlu1 %467  ;;  %v137_v57 = vld [vmem:[%s7104_s1 + $0x348] sm:$0xff] }
  0xc6   :  { %7145 = vst [vmem:[#allocation36_spill] sm:$0xff] %v5509_v63  ;;  %v5511_v0 = vpop.permute.xlu0 %462  ;;  %787 = vperm.xlu1 %4605, %v261_v58   ;;  %4535 = vmatprep.mubr.msk.f32.mxu0 %vm930_vm0, %v128_v61  ;;  %v271_v58 = vld [vmem:[%s7102_s2 + $0x368] sm:$0xff]  ;;  %v138_v61 = vld [vmem:[%s7104_s1 + $0x350] sm:$0xff] }
  0xc7   :  { %7146 = vst [vmem:[#allocation37_spill] sm:$0xff] %v5511_v0  ;;  %782 = vperm.xlu0 %4604, %v260_v62   ;;  %v270_v62 = vld [vmem:[%s7102_s2 + $0x360] sm:$0xff] }
  0xc9   :  { %4536 = vmatmul.mubr.msk.f32.gmra.mrb[96].mxu0 %vm930_vm0, %v129_v3  ;;  %v5527_v13 = vpop.permute.xlu1 %477 }
  0xca   :  { %7147 = vst [vmem:[#allocation38_spill] sm:$0xff] %v5527_v13  ;;  %v5529_v14 = vpop.permute.xlu0 %472  ;;  %797 = vperm.xlu1 %4605, %v263_v4   ;;  %4538 = vmatprep.mubr.msk.f32.mxu0 %vm930_vm0, %v130_v7  ;;  %v139_v7 = vld [vmem:[%s7104_s1 + $0x358] sm:$0xff] }
  0xcb   :  { %7148 = vst [vmem:[#allocation39_spill] sm:$0xff] %v5529_v14  ;;  %792 = vperm.xlu0 %4604, %v262_v8   ;;  %v273_v8 = vld [vmem:[%s7102_s2 + $0x378] sm:$0xff] }
  0xcc   :  { %v2183_v13 = vld [vmem:[%s7105_s4 + $0x18] sm:$0xff] }
  0xcd   :  { %4539 = vmatmul.mubr.msk.f32.gmra.mrb[98].mxu0 %vm930_vm0, %v131_v15  ;;  %v5545_v25 = vpop.permute.xlu1 %487  ;;  %v140_v15 = vld [vmem:[%s7104_s1 + $0x360] sm:$0xff] }
  0xce   :  { %7149 = vst [vmem:[#allocation40_spill] sm:$0xff] %v5545_v25  ;;  %v5547_v26 = vpop.permute.xlu0 %482  ;;  %807 = vperm.xlu1 %4605, %v265_v16   ;;  %4541 = vmatprep.mubr.msk.f32.mxu0 %vm930_vm0, %v132_v21  ;;  %v272_v21 = vld [vmem:[%s7102_s2 + $0x370] sm:$0xff]  ;;  %v2181_v25 = vld [vmem:[%s7105_s4 + $0x8] sm:$0xff] }
  0xcf   :  { %7150 = vst [vmem:[#allocation41_spill] sm:$0xff] %v5547_v26  ;;  %802 = vperm.xlu0 %4604, %v264_v22  }
  0xd1   :  { %4542 = vmatmul.mubr.msk.f32.gmra.mrb[100].mxu0 %vm930_vm0, %v133_v31  ;;  %v5563_v39 = vpop.permute.xlu1 %497 }
  0xd2   :  { %7151 = vst [vmem:[#allocation42_spill] sm:$0xff] %v5563_v39  ;;  %v5565_v40 = vpop.permute.xlu0 %492  ;;  %817 = vperm.xlu1 %4605, %v267_v32   ;;  %4544 = vmatprep.mubr.msk.f32.mxu0 %vm930_vm0, %v134_v33  ;;  %v141_v33 = vld [vmem:[%s7104_s1 + $0x368] sm:$0xff]  ;;  %v289_v39 = vld [vmem:[%s7102_s2 + $0x3f8] sm:$0xff] }
  0xd3   :  { %7152 = vst [vmem:[#allocation43_spill] sm:$0xff] %v5565_v40  ;;  %812 = vperm.xlu0 %4604, %v266_v34   ;;  %v275_v34 = vld [vmem:[%s7102_s2 + $0x388] sm:$0xff] }
  0xd5   :  { %4545 = vmatmul.mubr.msk.f32.gmra.mrb[102].mxu0 %vm930_vm0, %v135_v43  ;;  %v5581_v51 = vpop.permute.xlu1 %507  ;;  %v142_v43 = vld [vmem:[%s7104_s1 + $0x370] sm:$0xff] }
  0xd6   :  { %7153 = vst [vmem:[#allocation44_spill] sm:$0xff] %v5581_v51  ;;  %v5583_v52 = vpop.permute.xlu0 %502  ;;  %827 = vperm.xlu1 %4605, %v269_v44   ;;  %4547 = vmatprep.mubr.msk.f32.mxu0 %vm930_vm0, %v136_v49  ;;  %v274_v49 = vld [vmem:[%s7102_s2 + $0x380] sm:$0xff]  ;;  %v287_v51 = vld [vmem:[%s7102_s2 + $0x3e8] sm:$0xff] }
  0xd7   :  { %7154 = vst [vmem:[#allocation45_spill] sm:$0xff] %v5583_v52  ;;  %822 = vperm.xlu0 %4604, %v268_v50  }
  0xd9   :  { %4548 = vmatmul.mubr.msk.f32.gmra.mrb[104].mxu0 %vm930_vm0, %v137_v57  ;;  %v5599_v3 = vpop.permute.xlu1 %517 }
  0xda   :  { %7155 = vst [vmem:[#allocation46_spill] sm:$0xff] %v5599_v3  ;;  %v5601_v4 = vpop.permute.xlu0 %512  ;;  %837 = vperm.xlu1 %4605, %v271_v58   ;;  %4550 = vmatprep.mubr.msk.f32.mxu0 %vm930_vm0, %v138_v61  ;;  %v143_v61 = vld [vmem:[%s7104_s1 + $0x378] sm:$0xff] }
  0xdb   :  { %7156 = vst [vmem:[#allocation47_spill] sm:$0xff] %v5601_v4  ;;  %832 = vperm.xlu0 %4604, %v270_v62   ;;  %v277_v62 = vld [vmem:[%s7102_s2 + $0x398] sm:$0xff] }
  0xdc   :  { %v5613_v16 = vpop.f32.mrb[0].mxu0  ;;  %v285_v3 = vld [vmem:[%s7102_s2 + $0x3d8] sm:$0xff] }
  0xdd   :  { %v5618_v22 = vpop.f32.mrb[1].mxu0  ;;  %4551 = vmatmul.mubr.msk.f32.gmra.mrb[106].mxu0 %vm930_vm0, %v139_v7  ;;  %v5621_v31 = vpop.permute.xlu1 %527  ;;  %v144_v7 = vld [vmem:[%s7104_s1 + $0x380] sm:$0xff] }
  0xde   :  { %7157 = vst [vmem:[#allocation48_spill] sm:$0xff] %v5618_v22  ;;  %7158 = vst [vmem:[#allocation49_spill] sm:$0xff] %v5621_v31  ;;  %v5623_v32 = vpop.permute.xlu0 %522  ;;  %847 = vperm.xlu1 %4605, %v273_v8   ;;  %4553 = vmatprep.mubr.msk.f32.mxu0 %vm930_vm0, %v140_v15  ;;  %v276_v15 = vld [vmem:[%s7102_s2 + $0x390] sm:$0xff]  ;;  %v283_v31 = vld [vmem:[%s7102_s2 + $0x3c8] sm:$0xff] }
  0xdf   :  { %7159 = vst [vmem:[#allocation50_spill] sm:$0xff] %v5623_v32  ;;  %842 = vperm.xlu0 %4604, %v272_v21  }
  0xe0   :  { %v5635_v44 = vpop.f32.mrb[2].mxu0 }
  0xe1   :  { %7160 = vst [vmem:[#allocation51_spill] sm:$0xff] %v5635_v44  ;;  %v5640_v50 = vpop.f32.mrb[3].mxu0  ;;  %4554 = vmatmul.mubr.msk.f32.gmra.mrb[108].mxu0 %vm930_vm0, %v141_v33  ;;  %v5643_v57 = vpop.permute.xlu1 %537 }
  0xe2   :  { %7161 = vst [vmem:[#allocation52_spill] sm:$0xff] %v5640_v50  ;;  %7162 = vst [vmem:[#allocation53_spill] sm:$0xff] %v5643_v57  ;;  %v5645_v58 = vpop.permute.xlu0 %532  ;;  %857 = vperm.xlu1 %4605, %v275_v34   ;;  %4556 = vmatprep.mubr.msk.f32.mxu0 %vm930_vm0, %v142_v43  ;;  %v145_v43 = vld [vmem:[%s7104_s1 + $0x388] sm:$0xff]  ;;  %v281_v57 = vld [vmem:[%s7102_s2 + $0x3b8] sm:$0xff] }
  0xe3   :  { %7163 = vst [vmem:[#allocation54_spill] sm:$0xff] %v5645_v58  ;;  %852 = vperm.xlu0 %4604, %v274_v49   ;;  %v279_v49 = vld [vmem:[%s7102_s2 + $0x3a8] sm:$0xff] }
  0xe4   :  { %v5657_v8 = vpop.f32.mrb[4].mxu0 }
  0xe5   :  { %7164 = vst [vmem:[#allocation55_spill] sm:$0xff] %v5657_v8  ;;  %v5662_v21 = vpop.f32.mrb[5].mxu0  ;;  %4557 = vmatmul.mubr.msk.f32.gmra.mrb[110].mxu0 %vm930_vm0, %v143_v61  ;;  %v5665_v33 = vpop.permute.xlu1 %547  ;;  %v146_v61 = vld [vmem:[%s7104_s1 + $0x390] sm:$0xff] }
  0xe6   :  { %7165 = vst [vmem:[#allocation56_spill] sm:$0xff] %v5662_v21  ;;  %7166 = vst [vmem:[#allocation57_spill] sm:$0xff] %v5665_v33  ;;  %v5667_v34 = vpop.permute.xlu0 %542  ;;  %867 = vperm.xlu1 %4605, %v277_v62   ;;  %4559 = vmatprep.mubr.msk.f32.mxu0 %vm930_vm0, %v144_v7  ;;  %v278_v62 = vld [vmem:[%s7102_s2 + $0x3a0] sm:$0xff]  ;;  %v147_v33 = vld [vmem:[%s7104_s1 + $0x398] sm:$0xff] }
  0xe7   :  { %7167 = vst [vmem:[#allocation58_spill] sm:$0xff] %v5667_v34  ;;  %862 = vperm.xlu0 %4604, %v276_v15  }
  0xe8   :  { %v5679_v58 = vpop.f32.mrb[6].mxu0 }
  0xe9   :  { %7168 = vst [vmem:[#allocation59_spill] sm:$0xff] %v5679_v58  ;;  %v5684_v7 = vpop.f32.mrb[7].mxu0  ;;  %4560 = vmatmul.mubr.msk.f32.gmra.mrb[112].mxu0 %vm930_vm0, %v145_v43  ;;  %v5687_v34 = vpop.permute.xlu1 %557  ;;  %v148_v43 = vld [vmem:[%s7104_s1 + $0x3a0] sm:$0xff] }
  0xea   :  { %7169 = vst [vmem:[#allocation60_spill] sm:$0xff] %v5684_v7  ;;  %7170 = vst [vmem:[#allocation61_spill] sm:$0xff] %v5687_v34  ;;  %v5689_v15 = vpop.permute.xlu0 %552  ;;  %877 = vperm.xlu1 %4605, %v279_v49   ;;  %4562 = vmatprep.mubr.msk.f32.mxu0 %vm930_vm0, %v146_v61  ;;  %v280_v49 = vld [vmem:[%s7102_s2 + $0x3b0] sm:$0xff]  ;;  %v149_v34 = vld [vmem:[%s7104_s1 + $0x3a8] sm:$0xff] }
  0xeb   :  { %7171 = vst [vmem:[#allocation62_spill] sm:$0xff] %v5689_v15  ;;  %872 = vperm.xlu0 %4604, %v278_v62  }
  0xec   :  { %v5701_v32 = vpop.f32.mrb[8].mxu0 }
  0xed   :  { %7172 = vst [vmem:[#allocation63_spill] sm:$0xff] %v5701_v32  ;;  %v5706_v61 = vpop.f32.mrb[9].mxu0  ;;  %4563 = vmatmul.mubr.msk.f32.gmra.mrb[114].mxu0 %vm930_vm0, %v147_v33  ;;  %v5709_v15 = vpop.permute.xlu1 %567  ;;  %v150_v33 = vld [vmem:[%s7104_s1 + $0x3b0] sm:$0xff] }
  0xee   :  { %7173 = vst [vmem:[#allocation64_spill] sm:$0xff] %v5706_v61  ;;  %7174 = vst [vmem:[#allocation65_spill] sm:$0xff] %v5709_v15  ;;  %v5711_v62 = vpop.permute.xlu0 %562  ;;  %887 = vperm.xlu1 %4605, %v281_v57   ;;  %4565 = vmatprep.mubr.msk.f32.mxu0 %vm930_vm0, %v148_v43  ;;  %v282_v57 = vld [vmem:[%s7102_s2 + $0x3c0] sm:$0xff]  ;;  %v151_v15 = vld [vmem:[%s7104_s1 + $0x3b8] sm:$0xff] }
  0xef   :  { %7175 = vst [vmem:[#allocation66_spill] sm:$0xff] %v5711_v62  ;;  %882 = vperm.xlu0 %4604, %v280_v49  }
  0xf0   :  { %v5723_v4 = vpop.f32.mrb[10].mxu0 }
  0xf1   :  { %7176 = vst [vmem:[#allocation67_spill] sm:$0xff] %v5723_v4  ;;  %v5728_v43 = vpop.f32.mrb[11].mxu0  ;;  %4566 = vmatmul.mubr.msk.f32.gmra.mrb[116].mxu0 %vm930_vm0, %v149_v34  ;;  %v5731_v62 = vpop.permute.xlu1 %577  ;;  %v152_v34 = vld [vmem:[%s7104_s1 + $0x3c0] sm:$0xff] }
  0xf2   :  { %7177 = vst [vmem:[#allocation68_spill] sm:$0xff] %v5728_v43  ;;  %7178 = vst [vmem:[#allocation69_spill] sm:$0xff] %v5731_v62  ;;  %v5733_v49 = vpop.permute.xlu0 %572  ;;  %897 = vperm.xlu1 %4605, %v283_v31   ;;  %4568 = vmatprep.mubr.msk.f32.mxu0 %vm930_vm0, %v150_v33  ;;  %v284_v31 = vld [vmem:[%s7102_s2 + $0x3d0] sm:$0xff]  ;;  %v153_v62 = vld [vmem:[%s7104_s1 + $0x3c8] sm:$0xff] }
  0xf3   :  { %7179 = vst [vmem:[#allocation70_spill] sm:$0xff] %v5733_v49  ;;  %892 = vperm.xlu0 %4604, %v282_v57  }
  0xf4   :  { %v5745_v52 = vpop.f32.mrb[12].mxu0 }
  0xf5   :  { %7180 = vst [vmem:[#allocation71_spill] sm:$0xff] %v5745_v52  ;;  %v5750_v33 = vpop.f32.mrb[13].mxu0  ;;  %4569 = vmatmul.mubr.msk.f32.gmra.mrb[118].mxu0 %vm930_vm0, %v151_v15  ;;  %v5753_v49 = vpop.permute.xlu1 %587  ;;  %v154_v15 = vld [vmem:[%s7104_s1 + $0x3d0] sm:$0xff] }
  0xf6   :  { %7181 = vst [vmem:[#allocation72_spill] sm:$0xff] %v5750_v33  ;;  %7182 = vst [vmem:[#allocation73_spill] sm:$0xff] %v5753_v49  ;;  %v5755_v57 = vpop.permute.xlu0 %582  ;;  %907 = vperm.xlu1 %4605, %v285_v3   ;;  %4571 = vmatprep.mubr.msk.f32.mxu0 %vm930_vm0, %v152_v34  ;;  %v286_v3 = vld [vmem:[%s7102_s2 + $0x3e0] sm:$0xff]  ;;  %v155_v49 = vld [vmem:[%s7104_s1 + $0x3d8] sm:$0xff] }
  0xf7   :  { %7183 = vst [vmem:[#allocation74_spill] sm:$0xff] %v5755_v57  ;;  %902 = vperm.xlu0 %4604, %v284_v31   ;;  %v2210_v33 = vld [vmem:[%s7105_s4 + $0xf0] sm:$0xff] }
  0xf8   :  { %v5767_v40 = vpop.f32.mrb[14].mxu0 }
  0xf9   :  { %7184 = vst [vmem:[#allocation75_spill] sm:$0xff] %v5767_v40  ;;  %v5772_v34 = vpop.f32.mrb[15].mxu0  ;;  %4572 = vmatmul.mubr.msk.f32.gmra.mrb[120].mxu0 %vm930_vm0, %v153_v62  ;;  %v5775_v57 = vpop.permute.xlu1 %597  ;;  %v156_v62 = vld [vmem:[%s7104_s1 + $0x3e0] sm:$0xff] }
  0xfa   :  { %7185 = vst [vmem:[#allocation76_spill] sm:$0xff] %v5772_v34  ;;  %7186 = vst [vmem:[#allocation77_spill] sm:$0xff] %v5775_v57  ;;  %v5777_v31 = vpop.permute.xlu0 %592  ;;  %917 = vperm.xlu1 %4605, %v287_v51   ;;  %4574 = vmatprep.mubr.msk.f32.mxu0 %vm930_vm0, %v154_v15  ;;  %v288_v51 = vld [vmem:[%s7102_s2 + $0x3f0] sm:$0xff]  ;;  %v2208_v40 = vld [vmem:[%s7105_s4 + $0xe0] sm:$0xff] }
  0xfb   :  { %7187 = vst [vmem:[#allocation78_spill] sm:$0xff] %v5777_v31  ;;  %912 = vperm.xlu0 %4604, %v286_v3   ;;  %v157_v31 = vld [vmem:[%s7104_s1 + $0x3e8] sm:$0xff]  ;;  %v2206_v34 = vld [vmem:[%s7105_s4 + $0xd0] sm:$0xff] }
  0xfc   :  { %v5789_v26 = vpop.f32.mrb[16].mxu0 }
  0xfd   :  { %7188 = vst [vmem:[#allocation79_spill] sm:$0xff] %v5789_v26  ;;  %v5794_v15 = vpop.f32.mrb[17].mxu0  ;;  %4575 = vmatmul.mubr.msk.f32.gmra.mrb[122].mxu0 %vm930_vm0, %v155_v49  ;;  %v5797_v57 = vpop.permute.xlu1 %607  ;;  %v158_v49 = vld [vmem:[%s7104_s1 + $0x3f0] sm:$0xff]  ;;  %v2204_v26 = vld [vmem:[%s7105_s4 + $0xc0] sm:$0xff] }
  0xfe   :  { %7189 = vst [vmem:[#allocation80_spill] sm:$0xff] %v5794_v15  ;;  %7190 = vst [vmem:[#allocation81_spill] sm:$0xff] %v5797_v57  ;;  %v5799_v3 = vpop.permute.xlu0 %602  ;;  %927 = vperm.xlu1 %4605, %v289_v39   ;;  %4577 = vmatprep.mubr.msk.f32.mxu0 %vm930_vm0, %v156_v62  ;;  %v2180_v39 = vld [vmem:[%s7105_s4] sm:$0xff] }
  0xff   :  { %7191 = vst [vmem:[#allocation82_spill] sm:$0xff] %v5799_v3  ;;  %922 = vperm.xlu0 %4604, %v288_v51   ;;  %v159_v3 = vld [vmem:[%s7104_s1 + $0x3f8] sm:$0xff] }
 0x100   :  { %v5811_v14 = vpop.f32.mrb[18].mxu0 }
 0x101   :  { %7192 = vst [vmem:[#allocation83_spill] sm:$0xff] %v5811_v14  ;;  %v5816_v62 = vpop.f32.mrb[19].mxu0  ;;  %4578 = vmatmul.mubr.msk.f32.gmra.mrb[124].mxu0 %vm930_vm0, %v157_v31  ;;  %v5819_v57 = vpop.permute.xlu1 %617  ;;  %v2182_v31 = vld [vmem:[%s7105_s4 + $0x10] sm:$0xff] }
 0x102   :  { %7193 = vst [vmem:[#allocation84_spill] sm:$0xff] %v5816_v62  ;;  %v5821_v51 = vpop.permute.xlu0 %612  ;;  %2219 = vperm.xlu1 %4605, %v2181_v25   ;;  %4580 = vmatprep.mubr.msk.f32.mxu0 %vm930_vm0, %v158_v49  ;;  %v4611_v62 = vld [vmem:[%s7106_s3 + $0x4] ss:$16 sps:$4 sm:$0xff]  }
 0x103   :  { %2214 = vperm.xlu0 %4604, %v2180_v39   ;;  %v2185_v39 = vld [vmem:[%s7105_s4 + $0x28] sm:$0xff] }
 0x104   :  { %v5830_v0 = vpop.f32.mrb[20].mxu0 }
 0x105   :  { %7194 = vst [vmem:[#allocation85_spill] sm:$0xff] %v5830_v0  ;;  %v5835_v63 = vpop.f32.mrb[21].mxu0  ;;  %4581 = vmatmul.mubr.msk.f32.gmra.mrb[126].mxu0 %vm930_vm0, %v159_v3  ;;  %v5838_v25 = vpop.permute.xlu1 %627 }
 0x106   :  { %7195 = vst [vmem:[#allocation86_spill] sm:$0xff] %v5835_v63  ;;  %v5840_v49 = vpop.permute.xlu0 %622  ;;  %2229 = vperm.xlu1 %4605, %v2183_v13   ;;  %v2187_v13 = vld [vmem:[%s7105_s4 + $0x38] sm:$0xff]  ;;  %2724 = vmatprep.mubr.bf16.mxu0 %v4611_v62 }
 0x107   :  { %2224 = vperm.xlu0 %4604, %v2182_v31  }
 0x108   :  { %v5845_v56 = vpop.f32.mrb[22].mxu0 }
 0x109   :  { %7196 = vst [vmem:[#allocation87_spill] sm:$0xff] %v5845_v56  ;;  %v5850_v46 = vpop.f32.mrb[23].mxu0  ;;  %v5852_v45 = vpop.permute.xlu1 %637 }
 0x10a   :  { %7197 = vst [vmem:[#allocation88_spill] sm:$0xff] %v5850_v46  ;;  %v5854_v3 = vpop.permute.xlu0 %632  ;;  %2239 = vperm.xlu1 %4605, %v2185_v39  }
 0x10b   :  { %2234 = vperm.xlu0 %4604, %v2184_v55   ;;  %v2189_v55 = vld [vmem:[%s7105_s4 + $0x48] sm:$0xff] }
 0x10c   :  { %v5859_v31 = vpop.f32.mrb[24].mxu0 }
 0x10d   :  { %7198 = vst [vmem:[#allocation89_spill] sm:$0xff] %v5859_v31  ;;  %v5864_v37 = vpop.f32.mrb[25].mxu0  ;;  %v5866_v28 = vpop.permute.xlu1 %647 }
 0x10e   :  { %7199 = vst [vmem:[#allocation90_spill] sm:$0xff] %v5864_v37  ;;  %v5868_v27 = vpop.permute.xlu0 %642  ;;  %2249 = vperm.xlu1 %4605, %v2187_v13  }
 0x10f   :  { %2244 = vperm.xlu0 %4604, %v2186_v38   ;;  %v2191_v38 = vld [vmem:[%s7105_s4 + $0x58] sm:$0xff] }
 0x110   :  { %v5873_v39 = vpop.f32.mrb[26].mxu0 }
 0x111   :  { %7200 = vst [vmem:[#allocation91_spill] sm:$0xff] %v5873_v39  ;;  %v5878_v31 = vpop.f32.mrb[27].mxu0  ;;  %v5880_v19 = vpop.permute.xlu1 %657  ;;  %v2190_v39 = vld [vmem:[%s7105_s4 + $0x50] sm:$0xff] }
 0x112   :  { %7201 = vst [vmem:[#allocation92_spill] sm:$0xff] %v5878_v31  ;;  %v5882_v37 = vpop.permute.xlu0 %652  ;;  %2259 = vperm.xlu1 %4605, %v2189_v55  }
 0x113   :  { %2254 = vperm.xlu0 %4604, %v2188_v20   ;;  %v2193_v20 = vld [vmem:[%s7105_s4 + $0x68] sm:$0xff] }
 0x114   :  { %v5887_v13 = vpop.f32.mrb[28].mxu0 }
 0x115   :  { %7202 = vst [vmem:[#allocation93_spill] sm:$0xff] %v5887_v13  ;;  %v5892_v46 = vpop.f32.mrb[29].mxu0  ;;  %v5894_v10 = vpop.permute.xlu1 %667  ;;  %v2192_v13 = vld [vmem:[%s7105_s4 + $0x60] sm:$0xff] }
 0x116   :  { %7203 = vst [vmem:[#allocation94_spill] sm:$0xff] %v5892_v46  ;;  %v5896_v31 = vpop.permute.xlu0 %662  ;;  %2269 = vperm.xlu1 %4605, %v2191_v38  }
 0x117   :  { %2264 = vperm.xlu0 %4604, %v2190_v39   ;;  %v2195_v39 = vld [vmem:[%s7105_s4 + $0x78] sm:$0xff] }
 0x118   :  { %v5901_v55 = vpop.f32.mrb[30].mxu0 }
 0x119   :  { %7204 = vst [vmem:[#allocation95_spill] sm:$0xff] %v5901_v55  ;;  %v5906_v56 = vpop.f32.mrb[31].mxu0  ;;  %v5908_v9 = vpop.permute.xlu1 %677  ;;  %v2194_v55 = vld [vmem:[%s7105_s4 + $0x70] sm:$0xff] }
 0x11a   :  { %7205 = vst [vmem:[#allocation96_spill] sm:$0xff] %v5906_v56  ;;  %v5910_v46 = vpop.permute.xlu0 %672  ;;  %2279 = vperm.xlu1 %4605, %v2193_v20  }
 0x11b   :  { %2274 = vperm.xlu0 %4604, %v2192_v13   ;;  %v2197_v13 = vld [vmem:[%s7105_s4 + $0x88] sm:$0xff] }
 0x11c   :  { %v5915_v38 = vpop.f32.mrb[32].mxu0 }
 0x11d   :  { %7206 = vst [vmem:[#allocation97_spill] sm:$0xff] %v5915_v38  ;;  %v5920_v63 = vpop.f32.mrb[33].mxu0  ;;  %v5922_v2 = vpop.permute.xlu1 %687  ;;  %v2196_v38 = vld [vmem:[%s7105_s4 + $0x80] sm:$0xff] }
 0x11e   :  { %7207 = vst [vmem:[#allocation98_spill] sm:$0xff] %v5920_v63  ;;  %v5924_v56 = vpop.permute.xlu0 %682  ;;  %2289 = vperm.xlu1 %4605, %v2195_v39   ;;  %v4608_v63 = vld [vmem:[%s7106_s3 + $0x24] ss:$16 sps:$4 sm:$0xff]  }
 0x11f   :  { %2284 = vperm.xlu0 %4604, %v2194_v55   ;;  %v2199_v55 = vld [vmem:[%s7105_s4 + $0x98] sm:$0xff]  ;;  %2732 = vmatprep.mubr.bf16.mxu1 %v4608_v63  ;;  %v2200_v63 = vld [vmem:[%s7105_s4 + $0xa0] sm:$0xff] }
 0x120   :  { %v5929_v20 = vpop.f32.mrb[34].mxu0 }
 0x121   :  { %7208 = vst [vmem:[#allocation99_spill] sm:$0xff] %v5929_v20  ;;  %v5934_v0 = vpop.f32.mrb[35].mxu0  ;;  %v5936_v1 = vpop.permute.xlu1 %697  ;;  %v2198_v20 = vld [vmem:[%s7105_s4 + $0x90] sm:$0xff] }
 0x122   :  { %7209 = vst [vmem:[#allocation100_spill] sm:$0xff] %v5934_v0  ;;  %v5941_v39 = vpop.permute.xlu0 %692  ;;  %2299 = vperm.xlu1 %4605, %v2197_v13  }
 0x123   :  { %2294 = vperm.xlu0 %4604, %v2196_v38   ;;  %v2201_v38 = vld [vmem:[%s7105_s4 + $0xa8] sm:$0xff] }
 0x124   :  { %v5949_v0 = vpop.f32.mrb[36].mxu0 }
 0x125   :  { %7210 = vst [vmem:[#allocation101_spill] sm:$0xff] %v5949_v0  ;;  %v5954_v60 = vpop.f32.mrb[37].mxu0  ;;  %v5956_v14 = vpop.permute.xlu1 %707 }
 0x126   :  { %7211 = vst [vmem:[#allocation102_spill] sm:$0xff] %v5954_v60  ;;  %v5958_v13 = vpop.permute.xlu0 %702  ;;  %2309 = vperm.xlu1 %4605, %v2199_v55   ;;  %v2203_v55 = vld [vmem:[%s7105_s4 + $0xb8] sm:$0xff] }
 0x127   :  { %2304 = vperm.xlu0 %4604, %v2198_v20  }
 0x128   :  { %v5966_v0 = vpop.f32.mrb[38].mxu0 }
 0x129   :  { %7212 = vst [vmem:[#allocation103_spill] sm:$0xff] %v5966_v0  ;;  %v5968_v59 = vpop.f32.mrb[39].mxu0  ;;  %v5970_v60 = vpop.permute.xlu1 %717 }
 0x12a   :  { %7213 = vst [vmem:[#allocation104_spill] sm:$0xff] %v5968_v59  ;;  %v5972_v15 = vpop.permute.xlu0 %712  ;;  %2319 = vperm.xlu1 %4605, %v2201_v38   ;;  %v2205_v38 = vld [vmem:[%s7105_s4 + $0xc8] sm:$0xff] }
 0x12b   :  { %2314 = vperm.xlu0 %4604, %v2200_v63  }
 0x12c   :  { %v5980_v62 = vpop.f32.mrb[40].mxu0 }
 0x12d   :  { %7214 = vst [vmem:[#allocation105_spill] sm:$0xff] %v5980_v62  ;;  %v5982_v20 = vpop.f32.mrb[41].mxu0  ;;  %v5984_v0 = vpop.permute.xlu1 %727 }
 0x12e   :  { %7215 = vst [vmem:[#allocation106_spill] sm:$0xff] %v5982_v20  ;;  %v5986_v59 = vpop.permute.xlu0 %722  ;;  %2329 = vperm.xlu1 %4605, %v2203_v55   ;;  %v2207_v55 = vld [vmem:[%s7105_s4 + $0xd8] sm:$0xff] }
 0x12f   :  { %2324 = vperm.xlu0 %4604, %v2202_v54  }
 0x130   :  { %v5994_v53 = vpop.f32.mrb[42].mxu0 }
 0x131   :  { %7216 = vst [vmem:[#allocation107_spill] sm:$0xff] %v5994_v53  ;;  %v5996_v63 = vpop.f32.mrb[43].mxu0  ;;  %v5998_v62 = vpop.permute.xlu1 %737 }
 0x132   :  { %7217 = vst [vmem:[#allocation108_spill] sm:$0xff] %v5996_v63  ;;  %v6000_v20 = vpop.permute.xlu0 %732  ;;  %2339 = vperm.xlu1 %4605, %v2205_v38   ;;  %v2209_v38 = vld [vmem:[%s7105_s4 + $0xe8] sm:$0xff] }
 0x133   :  { %2334 = vperm.xlu0 %4604, %v2204_v26  }
 0x134   :  { %v6008_v48 = vpop.f32.mrb[44].mxu0 }
 0x135   :  { %7218 = vst [vmem:[#allocation109_spill] sm:$0xff] %v6008_v48  ;;  %v6010_v54 = vpop.f32.mrb[45].mxu0  ;;  %v6012_v53 = vpop.permute.xlu1 %747 }
 0x136   :  { %7219 = vst [vmem:[#allocation110_spill] sm:$0xff] %v6010_v54  ;;  %v6014_v63 = vpop.permute.xlu0 %742  ;;  %2349 = vperm.xlu1 %4605, %v2207_v55   ;;  %v2211_v55 = vld [vmem:[%s7105_s4 + $0xf8] sm:$0xff] }
 0x137   :  { %2344 = vperm.xlu0 %4604, %v2206_v34  }
 0x138   :  { %v6022_v47 = vpop.f32.mrb[46].mxu0 }
 0x139   :  { %7220 = vst [vmem:[#allocation111_spill] sm:$0xff] %v6022_v47  ;;  %v6024_v26 = vpop.f32.mrb[47].mxu0  ;;  %v6026_v48 = vpop.permute.xlu1 %757 }
 0x13a   :  { %7221 = vst [vmem:[#allocation112_spill] sm:$0xff] %v6024_v26  ;;  %v6028_v54 = vpop.permute.xlu0 %752  ;;  %2359 = vperm.xlu1 %4605, %v2209_v38   ;;  %v3047_v38 = vld [vmem:[%s7107_s5 + $0x8] sm:$0xff] }
 0x13b   :  { %2354 = vperm.xlu0 %4604, %v2208_v40   ;;  %v3046_v40 = vld [vmem:[%s7107_s5] sm:$0xff] }
 0x13c   :  { %v6036_v42 = vpop.f32.mrb[48].mxu0 }
 0x13d   :  { %7222 = vst [vmem:[#allocation113_spill] sm:$0xff] %v6036_v42  ;;  %v6038_v34 = vpop.f32.mrb[49].mxu0  ;;  %v6040_v47 = vpop.permute.xlu1 %767 }
 0x13e   :  { %7223 = vst [vmem:[#allocation114_spill] sm:$0xff] %v6038_v34  ;;  %v6042_v26 = vpop.permute.xlu0 %762  ;;  %2369 = vperm.xlu1 %4605, %v2211_v55  }
 0x13f   :  { %2364 = vperm.xlu0 %4604, %v2210_v33   ;;  %v3049_v33 = vld [vmem:[%s7107_s5 + $0x18] sm:$0xff] }
 0x140   :  { %v6047_v52 = vpop.f32.mrb[50].mxu0 }
 0x141   :  { %7224 = vst [vmem:[#allocation115_spill] sm:$0xff] %v6047_v52  ;;  %v6052_v41 = vpop.f32.mrb[51].mxu0  ;;  %v6054_v42 = vpop.permute.xlu1 %777  ;;  %v3048_v52 = vld [vmem:[%s7107_s5 + $0x10] sm:$0xff] }
 0x142   :  { %7225 = vst [vmem:[#allocation116_spill] sm:$0xff] %v6052_v41  ;;  %v6056_v34 = vpop.permute.xlu0 %772  ;;  %3117 = vperm.xlu1 %4605, %v3047_v38   ;;  %v3051_v38 = vld [vmem:[%s7107_s5 + $0x28] sm:$0xff] }
 0x143   :  { %3112 = vperm.xlu0 %4604, %v3046_v40  }
 0x144   :  { %v6061_v55 = vpop.f32.mrb[52].mxu0 }
 0x145   :  { %7226 = vst [vmem:[#allocation117_spill] sm:$0xff] %v6061_v55  ;;  %v6066_v43 = vpop.f32.mrb[53].mxu0  ;;  %v6068_v36 = vpop.permute.xlu1 %787  ;;  %v3050_v55 = vld [vmem:[%s7107_s5 + $0x20] sm:$0xff] }
 0x146   :  { %7227 = vst [vmem:[#allocation118_spill] sm:$0xff] %v6066_v43  ;;  %v6070_v41 = vpop.permute.xlu0 %782  ;;  %3127 = vperm.xlu1 %4605, %v3049_v33  }
 0x147   :  { %3122 = vperm.xlu0 %4604, %v3048_v52   ;;  %v3053_v52 = vld [vmem:[%s7107_s5 + $0x38] sm:$0xff] }
 0x148   :  { %v6075_v40 = vpop.f32.mrb[54].mxu0 }
 0x149   :  { %7228 = vst [vmem:[#allocation119_spill] sm:$0xff] %v6075_v40  ;;  %v6080_v4 = vpop.f32.mrb[55].mxu0  ;;  %v6082_v35 = vpop.permute.xlu1 %797  ;;  %v3052_v40 = vld [vmem:[%s7107_s5 + $0x30] sm:$0xff] }
 0x14a   :  { %7229 = vst [vmem:[#allocation120_spill] sm:$0xff] %v6080_v4  ;;  %v6084_v43 = vpop.permute.xlu0 %792  ;;  %3137 = vperm.xlu1 %4605, %v3051_v38  }
 0x14b   :  { %3132 = vperm.xlu0 %4604, %v3050_v55   ;;  %v3055_v55 = vld [vmem:[%s7107_s5 + $0x48] sm:$0xff] }
 0x14c   :  { %v6089_v33 = vpop.f32.mrb[56].mxu0 }
 0x14d   :  { %7230 = vst [vmem:[#allocation121_spill] sm:$0xff] %v6089_v33  ;;  %v6094_v61 = vpop.f32.mrb[57].mxu0  ;;  %v6096_v30 = vpop.permute.xlu1 %807  ;;  %v3054_v33 = vld [vmem:[%s7107_s5 + $0x40] sm:$0xff] }
 0x14e   :  { %7231 = vst [vmem:[#allocation122_spill] sm:$0xff] %v6094_v61  ;;  %v6098_v4 = vpop.permute.xlu0 %802  ;;  %3147 = vperm.xlu1 %4605, %v3053_v52  }
 0x14f   :  { %3142 = vperm.xlu0 %4604, %v3052_v40   ;;  %v3057_v40 = vld [vmem:[%s7107_s5 + $0x58] sm:$0xff] }
 0x150   :  { %v6103_v38 = vpop.f32.mrb[58].mxu0 }
 0x151   :  { %7232 = vst [vmem:[#allocation123_spill] sm:$0xff] %v6103_v38  ;;  %v6108_v32 = vpop.f32.mrb[59].mxu0  ;;  %v6110_v29 = vpop.permute.xlu1 %817  ;;  %v3056_v38 = vld [vmem:[%s7107_s5 + $0x50] sm:$0xff] }
 0x152   :  { %7233 = vst [vmem:[#allocation124_spill] sm:$0xff] %v6108_v32  ;;  %v6112_v61 = vpop.permute.xlu0 %812  ;;  %3157 = vperm.xlu1 %4605, %v3055_v55  }
 0x153   :  { %3152 = vperm.xlu0 %4604, %v3054_v33   ;;  %v3059_v33 = vld [vmem:[%s7107_s5 + $0x68] sm:$0xff] }
 0x154   :  { %v6117_v52 = vpop.f32.mrb[60].mxu0 }
 0x155   :  { %7234 = vst [vmem:[#allocation125_spill] sm:$0xff] %v6117_v52  ;;  %v6122_v7 = vpop.f32.mrb[61].mxu0  ;;  %v6124_v24 = vpop.permute.xlu1 %827  ;;  %v3058_v52 = vld [vmem:[%s7107_s5 + $0x60] sm:$0xff] }
 0x156   :  { %7235 = vst [vmem:[#allocation126_spill] sm:$0xff] %v6122_v7  ;;  %v6126_v32 = vpop.permute.xlu0 %822  ;;  %3167 = vperm.xlu1 %4605, %v3057_v40  }
 0x157   :  { %3162 = vperm.xlu0 %4604, %v3056_v38   ;;  %v3061_v38 = vld [vmem:[%s7107_s5 + $0x78] sm:$0xff] }
 0x158   :  { %v6131_v55 = vpop.f32.mrb[62].mxu0 }
 0x159   :  { %7236 = vst [vmem:[#allocation127_spill] sm:$0xff] %v6131_v55  ;;  %v6136_v58 = vpop.f32.mrb[63].mxu0  ;;  %v6138_v23 = vpop.permute.xlu1 %837  ;;  %v3060_v55 = vld [vmem:[%s7107_s5 + $0x70] sm:$0xff] }
 0x15a   :  { %7237 = vst [vmem:[#allocation128_spill] sm:$0xff] %v6136_v58  ;;  %v6140_v7 = vpop.permute.xlu0 %832  ;;  %3177 = vperm.xlu1 %4605, %v3059_v33   ;;  %v3063_v33 = vld [vmem:[%s7107_s5 + $0x88] sm:$0xff] }
 0x15b   :  { %3172 = vperm.xlu0 %4604, %v3058_v52  }
 0x15c   :  { %v4489_v40 = vpop.f32.mrb[64].mxu0 }
 0x15d   :  { %v1707_v21 = vadd.f32 %v4489_v40, %v5819_v57  ;;  %v1701_v18 = vpop.f32.mrb[65].mxu0  ;;  %v6149_v8 = vpop.permute.xlu1 %847  ;;  %v3062_v57 = vld [vmem:[%s7107_s5 + $0x80] sm:$0xff] }
 0x15e   :  { %v1702_v58 = vadd.f32 %v1701_v18, %v5821_v51  ;;  %v6152_v17 = vpop.permute.xlu0 %842  ;;  %3187 = vperm.xlu1 %4605, %v3061_v38  }
 0x15f   :  { %v2021_v52 = vmax.f32 %v1707_v21, 0.0  ;;  %3182 = vperm.xlu0 %4604, %v3060_v55  }
 0x160   :  { %v2020_v50 = vmax.f32 %v1702_v58, 0.0  ;;  %v4492_v5 = vpop.f32.mrb[66].mxu0  ;;  %v3065_v58 = vld [vmem:[%s7107_s5 + $0x98] sm:$0xff] }
 0x161   :  { %v1717_v40 = vadd.f32 %v4492_v5, %v5838_v25  ;;  %v1711_v44 = vpop.f32.mrb[67].mxu0  ;;  %v6161_v11 = vpop.permute.xlu1 %857  ;;  %v3064_v5 = vld [vmem:[%s7107_s5 + $0x90] sm:$0xff] }
 0x162   :  { %v6163_v18 = vpack.c.bf16 %v2021_v52, %v2020_v50  ;;  %v1712_v21 = vadd.f32 %v1711_v44, %v5840_v49  ;;  %v6166_v51 = vpop.permute.xlu0 %852  ;;  %3197 = vperm.xlu1 %4605, %v3063_v33  }
 0x163   :  { %v2023_v55 = vmax.f32 %v1717_v40, 0.0  ;;  %3192 = vperm.xlu0 %4604, %v3062_v57   ;;  %v3067_v40 = vld [vmem:[%s7107_s5 + $0xa8] sm:$0xff] }
 0x164   :  { %v2022_v38 = vmax.f32 %v1712_v21, 0.0  ;;  %v4495_v22 = vpop.f32.mrb[68].mxu0 }
 0x165   :  { %v1727_v50 = vadd.f32 %v4495_v22, %v5852_v45  ;;  %v1721_v25 = vpop.f32.mrb[69].mxu0  ;;  %v6175_v52 = vpop.permute.xlu1 %867  ;;  %v3066_v45 = vld [vmem:[%s7107_s5 + $0xa0] sm:$0xff] }
 0x166   :  { %v6177_v44 = vpack.c.bf16 %v2023_v55, %v2022_v38  ;;  %v1722_v49 = vadd.f32 %v1721_v25, %v5854_v3  ;;  %v6180_v33 = vpop.permute.xlu0 %862  ;;  %3207 = vperm.xlu1 %4605, %v3065_v58   ;;  %v3069_v25 = vld [vmem:[%s7107_s5 + $0xb8] sm:$0xff] }
 0x167   :  { %7238 = vst [vmem:[#allocation129_spill] sm:$0xff] %v6180_v33  ;;  %v2025_v57 = vmax.f32 %v1727_v50, 0.0  ;;  %3202 = vperm.xlu0 %4604, %v3064_v5  }
 0x168   :  { %v2024_v21 = vmax.f32 %v1722_v49, 0.0  ;;  %v4498_v6 = vpop.f32.mrb[70].mxu0 }
 0x169   :  { %v1737_v22 = vadd.f32 %v4498_v6, %v5866_v28  ;;  %v1731_v55 = vpop.f32.mrb[71].mxu0  ;;  %v6189_v38 = vpop.permute.xlu1 %877  ;;  %v3068_v6 = vld [vmem:[%s7107_s5 + $0xb0] sm:$0xff] }
 0x16a   :  { %v6191_v3 = vpack.c.bf16 %v2025_v57, %v2024_v21  ;;  %v1732_v58 = vadd.f32 %v1731_v55, %v5868_v27  ;;  %v6194_v5 = vpop.permute.xlu0 %872  ;;  %3217 = vperm.xlu1 %4605, %v3067_v40   ;;  %v3071_v55 = vld [vmem:[%s7107_s5 + $0xc8] sm:$0xff] }
 0x16b   :  { %7239 = vst [vmem:[#allocation130_spill] sm:$0xff] %v6194_v5  ;;  %v2027_v50 = vmax.f32 %v1737_v22, 0.0  ;;  %3212 = vperm.xlu0 %4604, %v3066_v45  }
 0x16c   :  { %v2026_v49 = vmax.f32 %v1732_v58, 0.0  ;;  %v4501_v33 = vpop.f32.mrb[72].mxu0 }
 0x16d   :  { %v1747_v28 = vadd.f32 %v4501_v33, %v5880_v19  ;;  %v1741_v57 = vpop.f32.mrb[73].mxu0  ;;  %v6203_v21 = vpop.permute.xlu1 %887  ;;  %v3070_v19 = vld [vmem:[%s7107_s5 + $0xc0] sm:$0xff] }
 0x16e   :  { %v6205_v27 = vpack.c.bf16 %v2027_v50, %v2026_v49  ;;  %v1742_v40 = vadd.f32 %v1741_v57, %v5882_v37  ;;  %v6208_v45 = vpop.permute.xlu0 %882  ;;  %3227 = vperm.xlu1 %4605, %v3069_v25   ;;  %v3073_v57 = vld [vmem:[%s7107_s5 + $0xd8] sm:$0xff] }
 0x16f   :  { %7240 = vst [vmem:[#allocation131_spill] sm:$0xff] %v6208_v45  ;;  %v2029_v22 = vmax.f32 %v1747_v28, 0.0  ;;  %3222 = vperm.xlu0 %4604, %v3068_v6  }
 0x170   :  { %v2028_v58 = vmax.f32 %v1742_v40, 0.0  ;;  %v4504_v5 = vpop.f32.mrb[74].mxu0 }
 0x171   :  { %v1757_v33 = vadd.f32 %v4504_v5, %v5894_v10  ;;  %v1751_v50 = vpop.f32.mrb[75].mxu0  ;;  %v6217_v49 = vpop.permute.xlu1 %897  ;;  %v3072_v10 = vld [vmem:[%s7107_s5 + $0xd0] sm:$0xff] }
 0x172   :  { %v6219_v37 = vpack.c.bf16 %v2029_v22, %v2028_v58  ;;  %v1752_v25 = vadd.f32 %v1751_v50, %v5896_v31  ;;  %v6222_v6 = vpop.permute.xlu0 %892  ;;  %3237 = vperm.xlu1 %4605, %v3071_v55   ;;  %v3075_v50 = vld [vmem:[%s7107_s5 + $0xe8] sm:$0xff] }
 0x173   :  { %7241 = vst [vmem:[#allocation132_spill] sm:$0xff] %v6222_v6  ;;  %v2031_v28 = vmax.f32 %v1757_v33, 0.0  ;;  %3232 = vperm.xlu0 %4604, %v3070_v19  }
 0x174   :  { %v2030_v40 = vmax.f32 %v1752_v25, 0.0  ;;  %v4507_v45 = vpop.f32.mrb[76].mxu0 }
 0x175   :  { %v1767_v5 = vadd.f32 %v4507_v45, %v5908_v9  ;;  %v1761_v22 = vpop.f32.mrb[77].mxu0  ;;  %v6231_v58 = vpop.permute.xlu1 %907  ;;  %v3074_v9 = vld [vmem:[%s7107_s5 + $0xe0] sm:$0xff] }
 0x176   :  { %v6233_v31 = vpack.c.bf16 %v2031_v28, %v2030_v40  ;;  %v1762_v55 = vadd.f32 %v1761_v22, %v5910_v46  ;;  %v6236_v19 = vpop.permute.xlu0 %902  ;;  %3247 = vperm.xlu1 %4605, %v3073_v57  }
 0x177   :  { %v2033_v33 = vmax.f32 %v1767_v5, 0.0  ;;  %3242 = vperm.xlu0 %4604, %v3072_v10   ;;  %v13_v5 = vstv %s7108_s7 }
 0x178   :  { %v2032_v25 = vmax.f32 %v1762_v55, 0.0  ;;  %v4510_v6 = vpop.f32.mrb[78].mxu0  ;;  %14 = vst [vmem:[#allocation2] sm:$0x1] %v13_v5 }
 0x179   :  { %v1777_v45 = vadd.f32 %v4510_v6, %v5922_v2  ;;  %v1771_v28 = vpop.f32.mrb[79].mxu0  ;;  %v6245_v40 = vpop.permute.xlu1 %917  ;;  %v3077_v2 = vld [vmem:[%s7107_s5 + $0xf8] sm:$0xff] }
 0x17a   :  { %7242 = vst [vmem:[#allocation133_spill] sm:$0xff] %v6245_v40  ;;  %v6247_v46 = vpack.c.bf16 %v2033_v33, %v2032_v25  ;;  %v1772_v57 = vadd.f32 %v1771_v28, %v5924_v56  ;;  %v6250_v10 = vpop.permute.xlu0 %912  ;;  %3257 = vperm.xlu1 %4605, %v3075_v50   ;;  %v3076_v56 = vld [vmem:[%s7107_s5 + $0xf0] sm:$0xff] }
 0x17b   :  { %7243 = vst [vmem:[#allocation134_spill] sm:$0xff] %v6250_v10  ;;  %v2035_v22 = vmax.f32 %v1777_v45, 0.0  ;;  %3252 = vperm.xlu0 %4604, %v3074_v9  }
 0x17c   :  { %v2034_v6 = vmax.f32 %v1772_v57, 0.0  ;;  %v4513_v55 = vpop.f32.mrb[80].mxu0  ;;  %v3079_v57 = vld [vmem:[%s7107_s5 + $0x108] sm:$0xff] }
 0x17d   :  { %v1787_v33 = vadd.f32 %v4513_v55, %v5936_v1  ;;  %v1781_v50 = vpop.f32.mrb[81].mxu0  ;;  %v6262_v25 = vpop.permute.xlu1 %927  ;;  %v3078_v1 = vld [vmem:[%s7107_s5 + $0x100] sm:$0xff] }
 0x17e   :  { %v6264_v28 = vpack.c.bf16 %v2035_v22, %v2034_v6  ;;  %v1782_v9 = vadd.f32 %v1781_v50, %v5941_v39  ;;  %v6267_v45 = vpop.permute.xlu0 %922  ;;  %3267 = vperm.xlu1 %4605, %v3077_v2   ;;  %v3081_v50 = vld [vmem:[%s7107_s5 + $0x118] sm:$0xff] }
 0x17f   :  { %7244 = vst [vmem:[#allocation135_spill] sm:$0xff] %v6267_v45  ;;  %v2037_v10 = vmax.f32 %v1787_v33, 0.0  ;;  %3262 = vperm.xlu0 %4604, %v3076_v56  }
 0x180   :  { %v2036_v5 = vmax.f32 %v1782_v9, 0.0  ;;  %v4516_v40 = vpop.f32.mrb[82].mxu0 }
 0x181   :  { %v1797_v22 = vadd.f32 %v4516_v40, %v5956_v14  ;;  %v1791_v6 = vpop.f32.mrb[83].mxu0  ;;  %v6276_v55 = vpop.permute.xlu1 %2219  ;;  %v3080_v14 = vld [vmem:[%s7107_s5 + $0x110] sm:$0xff] }
 0x182   :  { %v2156_v39 = vpack.c.bf16 %v2037_v10, %v2036_v5  ;;  %v1792_v2 = vadd.f32 %v1791_v6, %v5958_v13  ;;  %v6279_v33 = vpop.permute.xlu0 %2214  ;;  %3277 = vperm.xlu1 %4605, %v3079_v57   ;;  %v3083_v6 = vld [vmem:[%s7107_s5 + $0x128] sm:$0xff] }
 0x183   :  { %v2039_v56 = vmax.f32 %v1797_v22, 0.0  ;;  %3272 = vperm.xlu0 %4604, %v3078_v1  }
 0x184   :  { %v2038_v9 = vmax.f32 %v1792_v2, 0.0  ;;  %v4519_v45 = vpop.f32.mrb[84].mxu0  ;;  %4163 = vmatprep.subr.bf16.mxu0 %v2156_v39  ;;  %4587 = vmatprep.subr.bf16.mxu1 %v2156_v39 }
 0x185   :  { %v1807_v40 = vadd.f32 %v4519_v45, %v5970_v60  ;;  %v1801_v13 = vpop.f32.mrb[85].mxu0  ;;  %4164 = vmatpush3.bf16.msra.mxu0 %v6163_v18  ;;  %4595 = vmatpush3.bf16.msra.mxu1 %v6163_v18  ;;  %v6290_v10 = vpop.permute.xlu1 %2229  ;;  %v3082_v18 = vld [vmem:[%s7107_s5 + $0x120] sm:$0xff] }
 0x186   :  { %v2157_v57 = vpack.c.bf16 %v2039_v56, %v2038_v9  ;;  %v1802_v5 = vadd.f32 %v1801_v13, %v5972_v15  ;;  %v6293_v1 = vpop.permute.xlu0 %2224  ;;  %3287 = vperm.xlu1 %4605, %v3081_v50  }
 0x187   :  { %v2041_v22 = vmax.f32 %v1807_v40, 0.0  ;;  %3282 = vperm.xlu0 %4604, %v3080_v14   ;;  %v3085_v40 = vld [vmem:[%s7107_s5 + $0x138] sm:$0xff] }
 0x188   :  { %v2040_v60 = vmax.f32 %v1802_v5, 0.0  ;;  %v4522_v45 = vpop.f32.mrb[86].mxu0  ;;  %4165 = vmatprep.subr.bf16.mxu0 %v2157_v57  ;;  %4588 = vmatprep.subr.bf16.mxu1 %v2157_v57 }
 0x189   :  { %v1817_v39 = vadd.f32 %v4522_v45, %v5984_v0  ;;  %v1811_v15 = vpop.f32.mrb[87].mxu0  ;;  %4166 = vmatpush3.bf16.msra.mxu0 %v6177_v44  ;;  %4596 = vmatpush3.bf16.msra.mxu1 %v6177_v44  ;;  %v6304_v2 = vpop.permute.xlu1 %2239  ;;  %v3084_v44 = vld [vmem:[%s7107_s5 + $0x130] sm:$0xff] }
 0x18a   :  { %v2158_v56 = vpack.c.bf16 %v2041_v22, %v2040_v60  ;;  %v1812_v50 = vadd.f32 %v1811_v15, %v5986_v59  ;;  %v6307_v9 = vpop.permute.xlu0 %2234  ;;  %3297 = vperm.xlu1 %4605, %v3083_v6  }
 0x18b   :  { %v2043_v14 = vmax.f32 %v1817_v39, 0.0  ;;  %3292 = vperm.xlu0 %4604, %v3082_v18   ;;  %v3087_v18 = vld [vmem:[%s7107_s5 + $0x148] sm:$0xff] }
 0x18c   :  { %v2042_v0 = vmax.f32 %v1812_v50, 0.0  ;;  %v4525_v13 = vpop.f32.mrb[88].mxu0  ;;  %4167 = vmatprep.subr.bf16.mxu0 %v2158_v56  ;;  %4589 = vmatprep.subr.bf16.mxu1 %v2158_v56 }
 0x18d   :  { %v1827_v57 = vadd.f32 %v4525_v13, %v5998_v62  ;;  %v1821_v59 = vpop.f32.mrb[89].mxu0  ;;  %4168 = vmatpush3.bf16.msra.mxu0 %v6191_v3  ;;  %4597 = vmatpush3.bf16.msra.mxu1 %v6191_v3  ;;  %v6318_v5 = vpop.permute.xlu1 %2249  ;;  %v3086_v3 = vld [vmem:[%s7107_s5 + $0x140] sm:$0xff]  ;;  %v3089_v13 = vld [vmem:[%s7107_s5 + $0x158] sm:$0xff] }
 0x18e   :  { %v2159_v22 = vpack.c.bf16 %v2043_v14, %v2042_v0  ;;  %v1822_v6 = vadd.f32 %v1821_v59, %v6000_v20  ;;  %v6321_v60 = vpop.permute.xlu0 %2244  ;;  %3307 = vperm.xlu1 %4605, %v3085_v40  }
 0x18f   :  { %v2045_v45 = vmax.f32 %v1827_v57, 0.0  ;;  %3302 = vperm.xlu0 %4604, %v3084_v44  }
 0x190   :  { %v2044_v62 = vmax.f32 %v1822_v6, 0.0  ;;  %v4528_v39 = vpop.f32.mrb[90].mxu0  ;;  %4169 = vmatprep.subr.bf16.mxu0 %v2159_v22  ;;  %4590 = vmatprep.subr.bf16.mxu1 %v2159_v22 }
 0x191   :  { %v1837_v15 = vadd.f32 %v4528_v39, %v6012_v53  ;;  %v1831_v20 = vpop.f32.mrb[91].mxu0  ;;  %4170 = vmatpush3.bf16.msra.mxu0 %v6205_v27  ;;  %4598 = vmatpush3.bf16.msra.mxu1 %v6205_v27  ;;  %v6332_v56 = vpop.permute.xlu1 %2259  ;;  %v3088_v27 = vld [vmem:[%s7107_s5 + $0x150] sm:$0xff] }
 0x192   :  { %v2160_v50 = vpack.c.bf16 %v2045_v45, %v2044_v62  ;;  %v1832_v14 = vadd.f32 %v1831_v20, %v6014_v63  ;;  %v6335_v40 = vpop.permute.xlu0 %2254  ;;  %3317 = vperm.xlu1 %4605, %v3087_v18   ;;  %v3091_v62 = vld [vmem:[%s7107_s5 + $0x168] sm:$0xff] }
 0x193   :  { %v2047_v0 = vmax.f32 %v1837_v15, 0.0  ;;  %3312 = vperm.xlu0 %4604, %v3086_v3  }
 0x194   :  { %v2046_v53 = vmax.f32 %v1832_v14, 0.0  ;;  %v4531_v44 = vpop.f32.mrb[92].mxu0  ;;  %4171 = vmatprep.subr.bf16.mxu0 %v2160_v50  ;;  %4591 = vmatprep.subr.bf16.mxu1 %v2160_v50 }
 0x195   :  { %v1847_v57 = vadd.f32 %v4531_v44, %v6026_v48  ;;  %v1841_v63 = vpop.f32.mrb[93].mxu0  ;;  %4172 = vmatpush3.bf16.msra.mxu0 %v6219_v37  ;;  %4599 = vmatpush3.bf16.msra.mxu1 %v6219_v37  ;;  %v6346_v59 = vpop.permute.xlu1 %2269  ;;  %v3090_v37 = vld [vmem:[%s7107_s5 + $0x160] sm:$0xff] }
 0x196   :  { %v2161_v22 = vpack.c.bf16 %v2047_v0, %v2046_v53  ;;  %v1842_v6 = vadd.f32 %v1841_v63, %v6028_v54  ;;  %v6349_v45 = vpop.permute.xlu0 %2264  ;;  %3327 = vperm.xlu1 %4605, %v3089_v13   ;;  %v3093_v13 = vld [vmem:[%s7107_s5 + $0x178] sm:$0xff] }
 0x197   :  { %v2049_v18 = vmax.f32 %v1847_v57, 0.0  ;;  %3322 = vperm.xlu0 %4604, %v3088_v27  }
 0x198   :  { %v2048_v48 = vmax.f32 %v1842_v6, 0.0  ;;  %v4534_v39 = vpop.f32.mrb[94].mxu0  ;;  %4173 = vmatprep.subr.bf16.mxu0 %v2161_v22  ;;  %4592 = vmatprep.subr.bf16.mxu1 %v2161_v22 }
 0x199   :  { %v1857_v3 = vadd.f32 %v4534_v39, %v6040_v47  ;;  %v1851_v54 = vpop.f32.mrb[95].mxu0  ;;  %4174 = vmatpush3.bf16.msra.mxu0 %v6233_v31  ;;  %4600 = vmatpush3.bf16.msra.mxu1 %v6233_v31  ;;  %v6360_v15 = vpop.permute.xlu1 %2279  ;;  %v3092_v31 = vld [vmem:[%s7107_s5 + $0x170] sm:$0xff] }
 0x19a   :  { %v2162_v20 = vpack.c.bf16 %v2049_v18, %v2048_v48  ;;  %v1852_v50 = vadd.f32 %v1851_v54, %v6042_v26  ;;  %v6363_v14 = vpop.permute.xlu0 %2274  ;;  %3337 = vperm.xlu1 %4605, %v3091_v62   ;;  %v4606_v18 = vld [vmem:[%s7106_s3 + $0x20] ss:$16 sps:$4 sm:$0xff]   ;;  %v4612_v54 = vld [vmem:[%s7106_s3 + $0x44] ss:$16 sps:$4 sm:$0xff]  }
 0x19b   :  { %v2051_v0 = vmax.f32 %v1857_v3, 0.0  ;;  %3332 = vperm.xlu0 %4604, %v3090_v37   ;;  %v4609_v48 = vld [vmem:[%s7106_s3] ss:$16 sps:$4 sm:$0xff]  }
 0x19c   :  { %v2050_v47 = vmax.f32 %v1852_v50, 0.0  ;;  %v4537_v53 = vpop.f32.mrb[96].mxu0  ;;  %4175 = vmatprep.subr.bf16.mxu0 %v2162_v20  ;;  %4593 = vmatprep.subr.bf16.mxu1 %v2162_v20 }
 0x19d   :  { %v1867_v44 = vadd.f32 %v4537_v53, %v6054_v42  ;;  %v1861_v26 = vpop.f32.mrb[97].mxu0  ;;  %4176 = vmatpush3.bf16.msra.mxu0 %v6247_v46  ;;  %4601 = vmatpush3.bf16.msra.mxu1 %v6247_v46  ;;  %v6374_v27 = vpop.permute.xlu1 %2289  ;;  %v3095_v42 = vld [vmem:[%s7107_s5 + $0x188] sm:$0xff]  ;;  %v3096_v53 = vld [vmem:[%s7107_s5 + $0x190] sm:$0xff] }
 0x19e   :  { %v2163_v57 = vpack.c.bf16 %v2051_v0, %v2050_v47  ;;  %v1862_v63 = vadd.f32 %v1861_v26, %v6056_v34  ;;  %v6377_v22 = vpop.permute.xlu0 %2284  ;;  %3347 = vperm.xlu1 %4605, %v3093_v13   ;;  %v3094_v34 = vld [vmem:[%s7107_s5 + $0x180] sm:$0xff] }
 0x19f   :  { %v2053_v6 = vmax.f32 %v1867_v44, 0.0  ;;  %3342 = vperm.xlu0 %4604, %v3092_v31  }
 0x1a0   :  { %v2052_v62 = vmax.f32 %v1862_v63, 0.0  ;;  %v4540_v46 = vpop.f32.mrb[98].mxu0  ;;  %4177 = vmatprep.subr.bf16.mxu0 %v2163_v57  ;;  %4594 = vmatprep.subr.bf16.mxu1 %v2163_v57 }
 0x1a1   :  { %v1877_v39 = vadd.f32 %v4540_v46, %v6068_v36  ;;  %v1871_v37 = vpop.f32.mrb[99].mxu0  ;;  %4178 = vmatpush3.bf16.msra.mxu0 %v6264_v28  ;;  %4602 = vmatpush3.bf16.msra.mxu1 %v6264_v28  ;;  %v6394_v3 = vpop.permute.xlu1 %2299  ;;  %v3097_v36 = vld [vmem:[%s7107_s5 + $0x198] sm:$0xff]  ;;  %v4614_v46 = vld [vmem:[%s7106_s3 + $0x40] ss:$16 sps:$4 sm:$0xff]  }
 0x1a2   :  { %v6399_v20 = vpack.c.bf16 %v2053_v6, %v2052_v62  ;;  %v1872_v50 = vadd.f32 %v1871_v37, %v6070_v41  ;;  %v6402_v0 = vpop.permute.xlu0 %2294  ;;  %3357 = vperm.xlu1 %4605, %v3095_v42  }
 0x1a3   :  { %v2055_v13 = vmax.f32 %v1877_v39, 0.0  ;;  %3352 = vperm.xlu0 %4604, %v3094_v34   ;;  %v4615_v39 = vld [vmem:[%s7106_s3 + $0x64] ss:$16 sps:$4 sm:$0xff]  }
 0x1a4   :  { %v2054_v28 = vmax.f32 %v1872_v50, 0.0  ;;  %v4543_v47 = vpop.f32.mrb[100].mxu0  ;;  %2725 = vmatmul.mubr.bf16.vlgmr.msra.gmra.mrb[128].mxu0 %v4609_v48  ;;  %2733 = vmatmul.mubr.bf16.vlgmr.msra.gmra.mrb[0].mxu1 %v4606_v18  ;;  %v3099_v18 = vld [vmem:[%s7107_s5 + $0x1a8] sm:$0xff] }
 0x1a5   :  { %v1887_v31 = vadd.f32 %v4543_v47, %v6082_v35  ;;  %v1881_v41 = vpop.f32.mrb[101].mxu0  ;;  %v6411_v44 = vpop.permute.xlu1 %2309  ;;  %2740 = vmatprep.mubr.bf16.mxu1 %v4612_v54  ;;  %v3098_v35 = vld [vmem:[%s7107_s5 + $0x1a0] sm:$0xff]  ;;  %v3100_v47 = vld [vmem:[%s7107_s5 + $0x1b0] sm:$0xff] }
 0x1a6   :  { %7245 = vst [vmem:[#allocation136_spill] sm:$0xff] %v6411_v44  ;;  %v6413_v26 = vpack.c.bf16 %v2055_v13, %v2054_v28  ;;  %v1882_v57 = vadd.f32 %v1881_v41, %v6084_v43  ;;  %v6416_v63 = vpop.permute.xlu0 %2304  ;;  %3367 = vperm.xlu1 %4605, %v3097_v36  }
 0x1a7   :  { %v2057_v6 = vmax.f32 %v1887_v31, 0.0  ;;  %3362 = vperm.xlu0 %4604, %v3096_v53  }
 0x1a8   :  { %v2056_v42 = vmax.f32 %v1882_v57, 0.0  ;;  %v4546_v62 = vpop.f32.mrb[102].mxu0 }
 0x1a9   :  { %v1897_v43 = vadd.f32 %v4546_v62, %v6096_v30  ;;  %v1891_v34 = vpop.f32.mrb[103].mxu0  ;;  %v6428_v48 = vpop.permute.xlu1 %2319  ;;  %v3101_v30 = vld [vmem:[%s7107_s5 + $0x1b8] sm:$0xff] }
 0x1aa   :  { %7246 = vst [vmem:[#allocation137_spill] sm:$0xff] %v6428_v48  ;;  %v6433_v37 = vpack.c.bf16 %v2057_v6, %v2056_v42  ;;  %v1892_v54 = vadd.f32 %v1891_v34, %v6098_v4  ;;  %v6436_v50 = vpop.permute.xlu0 %2314  ;;  %3377 = vperm.xlu1 %4605, %v3099_v18   ;;  %v3103_v42 = vld [vmem:[%s7107_s5 + $0x1c8] sm:$0xff] }
 0x1ab   :  { %7247 = vst [vmem:[#allocation138_spill] sm:$0xff] %v6436_v50  ;;  %v2059_v13 = vmax.f32 %v1897_v43, 0.0  ;;  %3372 = vperm.xlu0 %4604, %v3098_v35  }
 0x1ac   :  { %v2058_v36 = vmax.f32 %v1892_v54, 0.0  ;;  %v4549_v28 = vpop.f32.mrb[104].mxu0  ;;  %2741 = vmatmul.mubr.bf16.gmra.mrb[4].mxu1 %v4614_v46  ;;  %v4617_v46 = vld [vmem:[%s7106_s3 + $0x60] ss:$16 sps:$4 sm:$0xff]  }
 0x1ad   :  { %v1907_v53 = vadd.f32 %v4549_v28, %v6110_v29  ;;  %v1901_v31 = vpop.f32.mrb[105].mxu0  ;;  %v6445_v4 = vpop.permute.xlu1 %2329  ;;  %2748 = vmatprep.mubr.bf16.mxu1 %v4615_v39  ;;  %v3102_v29 = vld [vmem:[%s7107_s5 + $0x1c0] sm:$0xff] }
 0x1ae   :  { %7248 = vst [vmem:[#allocation139_spill] sm:$0xff] %v6445_v4  ;;  %v6447_v41 = vpack.c.bf16 %v2059_v13, %v2058_v36  ;;  %v1902_v57 = vadd.f32 %v1901_v31, %v6112_v61  ;;  %v6450_v6 = vpop.permute.xlu0 %2324  ;;  %3387 = vperm.xlu1 %4605, %v3101_v30   ;;  %v4618_v39 = vld [vmem:[%s7106_s3 + $0x84] ss:$16 sps:$4 sm:$0xff]  }
 0x1af   :  { %7249 = vst [vmem:[#allocation140_spill] sm:$0xff] %v6450_v6  ;;  %v2061_v18 = vmax.f32 %v1907_v53, 0.0  ;;  %3382 = vperm.xlu0 %4604, %v3100_v47   ;;  %v3104_v53 = vld [vmem:[%s7107_s5 + $0x1d0] sm:$0xff] }
 0x1b0   :  { %v2060_v62 = vmax.f32 %v1902_v57, 0.0  ;;  %v4552_v35 = vpop.f32.mrb[106].mxu0 }
 0x1b1   :  { %v1917_v61 = vadd.f32 %v4552_v35, %v6124_v24  ;;  %v1911_v43 = vpop.f32.mrb[107].mxu0  ;;  %v6462_v34 = vpop.permute.xlu1 %2339  ;;  %v3105_v24 = vld [vmem:[%s7107_s5 + $0x1d8] sm:$0xff] }
 0x1b2   :  { %7250 = vst [vmem:[#allocation141_spill] sm:$0xff] %v6462_v34  ;;  %v6467_v54 = vpack.c.bf16 %v2061_v18, %v2060_v62  ;;  %v1912_v13 = vadd.f32 %v1911_v43, %v6126_v32  ;;  %v6470_v30 = vpop.permute.xlu0 %2334  ;;  %3397 = vperm.xlu1 %4605, %v3103_v42   ;;  %v4620_v43 = vld [vmem:[%s7106_s3 + $0x80] ss:$16 sps:$4 sm:$0xff]  }
 0x1b3   :  { %7251 = vst [vmem:[#allocation142_spill] sm:$0xff] %v6470_v30  ;;  %v2063_v36 = vmax.f32 %v1917_v61, 0.0  ;;  %3392 = vperm.xlu0 %4604, %v3102_v29   ;;  %v3563_v29 = vld [vmem:[%s7109_s6] sm:$0xff] }
 0x1b4   :  { %v2062_v28 = vmax.f32 %v1912_v13, 0.0  ;;  %v4555_v47 = vpop.f32.mrb[108].mxu0  ;;  %2749 = vmatmul.mubr.bf16.gmra.mrb[8].mxu1 %v4617_v46 }
 0x1b5   :  { %v1927_v31 = vadd.f32 %v4555_v47, %v6138_v23  ;;  %v1921_v57 = vpop.f32.mrb[109].mxu0  ;;  %v6479_v32 = vpop.permute.xlu1 %2349  ;;  %2756 = vmatprep.mubr.bf16.mxu1 %v4618_v39  ;;  %v3106_v23 = vld [vmem:[%s7107_s5 + $0x1e0] sm:$0xff] }
 0x1b6   :  { %7252 = vst [vmem:[#allocation143_spill] sm:$0xff] %v6479_v32  ;;  %v6481_v18 = vpack.c.bf16 %v2063_v36, %v2062_v28  ;;  %v1922_v42 = vadd.f32 %v1921_v57, %v6140_v7  ;;  %v6484_v62 = vpop.permute.xlu0 %2344  ;;  %3407 = vperm.xlu1 %4605, %v3105_v24   ;;  %v4621_v36 = vld [vmem:[%s7106_s3 + $0xa4] ss:$16 sps:$4 sm:$0xff]  }
 0x1b7   :  { %7253 = vst [vmem:[#allocation144_spill] sm:$0xff] %v6484_v62  ;;  %v2065_v35 = vmax.f32 %v1927_v31, 0.0  ;;  %3402 = vperm.xlu0 %4604, %v3104_v53  }
 0x1b8   :  { %v2064_v46 = vmax.f32 %v1922_v42, 0.0  ;;  %v4558_v61 = vpop.f32.mrb[110].mxu0  ;;  %v3564_v42 = vld [vmem:[%s7109_s6 + $0x8] sm:$0xff] }
 0x1b9   :  { %v1937_v7 = vadd.f32 %v4558_v61, %v6149_v8  ;;  %v1931_v39 = vpop.f32.mrb[111].mxu0  ;;  %v6496_v13 = vpop.permute.xlu1 %2359  ;;  %v3565_v8 = vld [vmem:[%s7109_s6 + $0x10] sm:$0xff] }
 0x1ba   :  { %7254 = vst [vmem:[#allocation145_spill] sm:$0xff] %v6496_v13  ;;  %v6501_v24 = vpack.c.bf16 %v2065_v35, %v2064_v46  ;;  %v1932_v28 = vadd.f32 %v1931_v39, %v6152_v17  ;;  %v6504_v47 = vpop.permute.xlu0 %2354  ;;  %3597 = vperm.xlu1 %4605, %v3563_v29  }
 0x1bb   :  { %7255 = vst [vmem:[#allocation146_spill] sm:$0xff] %v6504_v47  ;;  %v2067_v53 = vmax.f32 %v1937_v7, 0.0  ;;  %3412 = vperm.xlu0 %4604, %v3106_v23  }
 0x1bc   :  { %v2066_v31 = vmax.f32 %v1932_v28, 0.0  ;;  %v4561_v57 = vpop.f32.mrb[112].mxu0  ;;  %2757 = vmatmul.mubr.bf16.gmra.mrb[12].mxu1 %v4620_v43  ;;  %v3567_v43 = vld [vmem:[%s7109_s6 + $0x20] sm:$0xff] }
 0x1bd   :  { %v1947_v35 = vadd.f32 %v4561_v57, %v6161_v11  ;;  %v1941_v46 = vpop.f32.mrb[113].mxu0  ;;  %v6513_v17 = vpop.permute.xlu1 %2369  ;;  %2764 = vmatprep.mubr.bf16.mxu1 %v4621_v36  ;;  %v1387_v11 = vadd.f32 %v5613_v16, %v5223_v12  ;;  %v3566_v36 = vld [vmem:[%s7109_s6 + $0x18] sm:$0xff]  ;;  %v4624_v12 = vld [vmem:[%s7106_s3 + $0xc4] ss:$16 sps:$4 sm:$0xff]  }
 0x1be   :  { %7256 = vst [vmem:[#allocation147_spill] sm:$0xff] %v6513_v17  ;;  %v6515_v29 = vpack.c.bf16 %v2067_v53, %v2066_v31  ;;  %v1942_v61 = vadd.f32 %v1941_v46, %v6166_v51  ;;  %v6518_v23 = vpop.permute.xlu0 %2364  ;;  %3607 = vperm.xlu1 %4605, %v3565_v8   ;;  %v4623_v51 = vld [vmem:[%s7106_s3 + $0xa0] ss:$16 sps:$4 sm:$0xff]  }
 0x1bf   :  { %7257 = vst [vmem:[#allocation148_spill] sm:$0xff] %v6518_v23  ;;  %v2069_v7 = vmax.f32 %v1947_v35, 0.0  ;;  %3602 = vperm.xlu0 %4604, %v3564_v42   ;;  %v7258_v53 = vld [vmem:[#allocation4_spill] sm:$0xff]  ;;  %v7260_v46 = vld [vmem:[#allocation129_spill] sm:$0xff] }
 0x1c0   :  { %v2068_v39 = vmax.f32 %v1942_v61, 0.0  ;;  %v4564_v28 = vpop.f32.mrb[114].mxu0  ;;  %v7259_v8 = vld [vmem:[#allocation48_spill] sm:$0xff] }
 0x1c1   :  { %v1382_v31 = vadd.f32 %v7259_v8, %v7258_v53  ;;  %v1957_v57 = vadd.f32 %v4564_v28, %v6175_v52  ;;  %v1951_v42 = vpop.f32.mrb[115].mxu0  ;;  %v3118_v35 = vpop.permute.xlu1 %3117  ;;  %v3569_v53 = vld [vmem:[%s7109_s6 + $0x30] sm:$0xff]  ;;  %v7262_v28 = vld [vmem:[#allocation51_spill] sm:$0xff] }
 0x1c2   :  { %v2172_v16 = vpack.c.bf16 %v2069_v7, %v2068_v39  ;;  %v1952_v61 = vadd.f32 %v1951_v42, %v7260_v46  ;;  %v3431_v17 = vmul.f32 %v3118_v35, %v1387_v11  ;;  %v3113_v23 = vpop.permute.xlu0 %3112  ;;  %3617 = vperm.xlu1 %4605, %v3567_v43   ;;  %v7261_v52 = vld [vmem:[#allocation5_spill] sm:$0xff]  ;;  %v3568_v7 = vld [vmem:[%s7109_s6 + $0x28] sm:$0xff]  ;;  %v7265_v35 = vld [vmem:[#allocation130_spill] sm:$0xff] }
 0x1c3   :  { %v2071_v13 = vmax.f32 %v1957_v57, 0.0  ;;  %v3430_v47 = vmul.f32 %v3113_v23, %v1382_v31  ;;  %3612 = vperm.xlu0 %4604, %v3566_v36   ;;  %v1397_v8 = vadd.f32 %v7262_v28, %v7261_v52  ;;  %v7263_v11 = vld [vmem:[#allocation3_spill] sm:$0xff]  ;;  %v7264_v43 = vld [vmem:[#allocation52_spill] sm:$0xff] }
 0x1c4   :  { %v2070_v32 = vmax.f32 %v1952_v61, 0.0  ;;  %v4567_v62 = vpop.f32.mrb[116].mxu0  ;;  %2765 = vmatmul.mubr.bf16.gmra.mrb[16].mxu1 %v4623_v51  ;;  %4275 = vmatprep.subr.bf16.mxu1 %v2172_v16  ;;  %v1392_v39 = vadd.f32 %v7264_v43, %v7263_v11 }
 0x1c5   :  { %v3494_v23 = vadd.f32 %v3431_v17, %v3430_v47  ;;  %v1967_v36 = vadd.f32 %v4567_v62, %v6189_v38  ;;  %v1961_v31 = vpop.f32.mrb[117].mxu0  ;;  %4276 = vmatpush3.bf16.msra.mxu1 %v6399_v20  ;;  %v3128_v57 = vpop.permute.xlu1 %3127  ;;  %2772 = vmatprep.mubr.bf16.mxu1 %v4624_v12  ;;  %v3571_v47 = vld [vmem:[%s7109_s6 + $0x40] sm:$0xff] }
 0x1c6   :  { %v2173_v42 = vpack.c.bf16 %v2071_v13, %v2070_v32  ;;  %v1962_v46 = vadd.f32 %v1961_v31, %v7265_v35  ;;  %v3433_v51 = vmul.f32 %v3128_v57, %v1397_v8  ;;  %v3123_v16 = vpop.permute.xlu0 %3122  ;;  %3627 = vperm.xlu1 %4605, %v3569_v53   ;;  %v7266_v17 = vld [vmem:[#allocation6_spill] sm:$0xff]  ;;  %v7267_v38 = vld [vmem:[#allocation55_spill] sm:$0xff]  ;;  %v7269_v53 = vld [vmem:[#allocation56_spill] sm:$0xff] }
 0x1c7   :  { %v2073_v61 = vmax.f32 %v1967_v36, 0.0  ;;  %v3432_v52 = vmul.f32 %v3123_v16, %v1392_v39  ;;  %3622 = vperm.xlu0 %4604, %v3568_v7   ;;  %v1407_v62 = vadd.f32 %v7267_v38, %v7266_v17  ;;  %v3570_v32 = vld [vmem:[%s7109_s6 + $0x38] sm:$0xff]  ;;  %v4626_v13 = vld [vmem:[%s7106_s3 + $0xc0] ss:$16 sps:$4 sm:$0xff]   ;;  %v4627_v36 = vld [vmem:[%s7106_s3 + $0xe4] ss:$16 sps:$4 sm:$0xff]  }
 0x1c8   :  { %v2072_v28 = vmax.f32 %v1962_v46, 0.0  ;;  %v4570_v20 = vpop.f32.mrb[118].mxu0  ;;  %4277 = vmatprep.subr.bf16.mxu1 %v2173_v42  ;;  %v7268_v12 = vld [vmem:[#allocation7_spill] sm:$0xff] }
 0x1c9   :  { %v1402_v8 = vadd.f32 %v7269_v53, %v7268_v12  ;;  %v3495_v7 = vadd.f32 %v3494_v23, %v3432_v52  ;;  %v1977_v11 = vadd.f32 %v4570_v20, %v6203_v21  ;;  %v1971_v43 = vpop.f32.mrb[119].mxu0  ;;  %4278 = vmatpush3.bf16.msra.mxu1 %v6413_v26  ;;  %v3138_v39 = vpop.permute.xlu1 %3137  ;;  %v7270_v57 = vld [vmem:[#allocation131_spill] sm:$0xff]  ;;  %v3573_v21 = vld [vmem:[%s7109_s6 + $0x50] sm:$0xff] }
 0x1ca   :  { %v2174_v31 = vpack.c.bf16 %v2073_v61, %v2072_v28  ;;  %v1972_v42 = vadd.f32 %v1971_v43, %v7270_v57  ;;  %v3435_v35 = vmul.f32 %v3138_v39, %v1407_v62  ;;  %v3133_v46 = vpop.permute.xlu0 %3132  ;;  %3637 = vperm.xlu1 %4605, %v3571_v47   ;;  %v7271_v26 = vld [vmem:[#allocation8_spill] sm:$0xff]  ;;  %v7272_v23 = vld [vmem:[#allocation59_spill] sm:$0xff]  ;;  %v7273_v47 = vld [vmem:[#allocation9_spill] sm:$0xff] }
 0x1cb   :  { %v3496_v16 = vadd.f32 %v3495_v7, %v3433_v51  ;;  %v2075_v17 = vmax.f32 %v1977_v11, 0.0  ;;  %v3434_v38 = vmul.f32 %v3133_v46, %v1402_v8  ;;  %3632 = vperm.xlu0 %4604, %v3570_v32   ;;  %v1417_v52 = vadd.f32 %v7272_v23, %v7271_v26  ;;  %v3572_v61 = vld [vmem:[%s7109_s6 + $0x48] sm:$0xff]  ;;  %v3575_v46 = vld [vmem:[%s7109_s6 + $0x60] sm:$0xff] }
 0x1cc   :  { %v2074_v20 = vmax.f32 %v1972_v42, 0.0  ;;  %v4573_v12 = vpop.f32.mrb[120].mxu0  ;;  %2773 = vmatmul.mubr.bf16.gmra.mrb[20].mxu1 %v4626_v13  ;;  %4279 = vmatprep.subr.bf16.mxu1 %v2174_v31  ;;  %v7274_v51 = vld [vmem:[#allocation60_spill] sm:$0xff] }
 0x1cd   :  { %v1412_v62 = vadd.f32 %v7274_v51, %v7273_v47  ;;  %v3497_v28 = vadd.f32 %v3496_v16, %v3434_v38  ;;  %v1987_v32 = vadd.f32 %v4573_v12, %v6217_v49  ;;  %v1981_v53 = vpop.f32.mrb[121].mxu0  ;;  %4280 = vmatpush3.bf16.msra.mxu1 %v6433_v37  ;;  %v3148_v8 = vpop.permute.xlu1 %3147  ;;  %2780 = vmatprep.mubr.bf16.mxu1 %v4627_v36  ;;  %v7275_v11 = vld [vmem:[#allocation132_spill] sm:$0xff]  ;;  %v7276_v49 = vld [vmem:[#allocation10_spill] sm:$0xff]  ;;  %v7277_v16 = vld [vmem:[#allocation63_spill] sm:$0xff] }
 0x1ce   :  { %v2175_v7 = vpack.c.bf16 %v2075_v17, %v2074_v20  ;;  %v1982_v43 = vadd.f32 %v1981_v53, %v7275_v11  ;;  %v3437_v13 = vmul.f32 %v3148_v8, %v1417_v52  ;;  %v3143_v39 = vpop.permute.xlu0 %3142  ;;  %3647 = vperm.xlu1 %4605, %v3573_v21   ;;  %v1427_v38 = vadd.f32 %v7277_v16, %v7276_v49  ;;  %v3574_v36 = vld [vmem:[%s7109_s6 + $0x58] sm:$0xff]  ;;  %v7278_v17 = vld [vmem:[#allocation11_spill] sm:$0xff]  ;;  %v7279_v21 = vld [vmem:[#allocation64_spill] sm:$0xff] }
 0x1cf   :  { %v3498_v31 = vadd.f32 %v3497_v28, %v3435_v35  ;;  %v2077_v57 = vmax.f32 %v1987_v32, 0.0  ;;  %v3436_v42 = vmul.f32 %v3143_v39, %v1412_v62  ;;  %3642 = vperm.xlu0 %4604, %v3572_v61   ;;  %v4629_v35 = vld [vmem:[%s7106_s3 + $0xe0] ss:$16 sps:$4 sm:$0xff]   ;;  %v1422_v23 = vadd.f32 %v7279_v21, %v7278_v17  ;;  %v4630_v47 = vld [vmem:[%s7106_s3 + $0x104] ss:$16 sps:$4 sm:$0xff]  }
 0x1d0   :  { %v2076_v37 = vmax.f32 %v1982_v43, 0.0  ;;  %v4576_v26 = vpop.f32.mrb[122].mxu0  ;;  %4281 = vmatprep.subr.bf16.mxu1 %v2175_v7  ;;  %v7281_v11 = vld [vmem:[#allocation67_spill] sm:$0xff]  ;;  %v7284_v49 = vld [vmem:[#allocation133_spill] sm:$0xff] }
 0x1d1   :  { %v3499_v52 = vadd.f32 %v3498_v31, %v3436_v42  ;;  %v1997_v20 = vadd.f32 %v4576_v26, %v6231_v58  ;;  %v1991_v12 = vpop.f32.mrb[123].mxu0  ;;  %4282 = vmatpush3.bf16.msra.mxu1 %v6447_v41  ;;  %v3158_v61 = vpop.permute.xlu1 %3157  ;;  %v3577_v58 = vld [vmem:[%s7109_s6 + $0x70] sm:$0xff] }
 0x1d2   :  { %v2176_v51 = vpack.c.bf16 %v2077_v57, %v2076_v37  ;;  %v1992_v62 = vadd.f32 %v1991_v12, %v6236_v19  ;;  %v3439_v28 = vmul.f32 %v3158_v61, %v1427_v38  ;;  %v3153_v32 = vpop.permute.xlu0 %3152  ;;  %3657 = vperm.xlu1 %4605, %v3575_v46   ;;  %v7280_v41 = vld [vmem:[#allocation12_spill] sm:$0xff]  ;;  %v7282_v57 = vld [vmem:[#allocation13_spill] sm:$0xff]  ;;  %v3579_v12 = vld [vmem:[%s7109_s6 + $0x80] sm:$0xff] }
 0x1d3   :  { %v2079_v53 = vmax.f32 %v1997_v20, 0.0  ;;  %v3438_v8 = vmul.f32 %v3153_v32, %v1422_v23  ;;  %v3500_v7 = vadd.f32 %v3499_v52, %v3437_v13  ;;  %3652 = vperm.xlu0 %4604, %v3574_v36   ;;  %v1437_v43 = vadd.f32 %v7281_v11, %v7280_v41  ;;  %v3576_v19 = vld [vmem:[%s7109_s6 + $0x68] sm:$0xff]  ;;  %v7285_v36 = vld [vmem:[#allocation134_spill] sm:$0xff] }
 0x1d4   :  { %v2078_v39 = vmax.f32 %v1992_v62, 0.0  ;;  %v4579_v31 = vpop.f32.mrb[124].mxu0  ;;  %2781 = vmatmul.mubr.bf16.gmra.mrb[24].mxu1 %v4629_v35  ;;  %4283 = vmatprep.subr.bf16.mxu1 %v2176_v51  ;;  %v7283_v42 = vld [vmem:[#allocation68_spill] sm:$0xff]  ;;  %v7286_v61 = vld [vmem:[#allocation14_spill] sm:$0xff]  ;;  %v7287_v51 = vld [vmem:[#allocation71_spill] sm:$0xff] }
 0x1d5   :  { %v1432_v46 = vadd.f32 %v7283_v42, %v7282_v57  ;;  %v3501_v13 = vadd.f32 %v3500_v7, %v3438_v8  ;;  %v2007_v16 = vadd.f32 %v4579_v31, %v7284_v49  ;;  %v2001_v38 = vpop.f32.mrb[125].mxu0  ;;  %4284 = vmatpush3.bf16.msra.mxu1 %v6467_v54  ;;  %v3168_v37 = vpop.permute.xlu1 %3167  ;;  %2788 = vmatprep.mubr.bf16.mxu1 %v4630_v47  ;;  %v3578_v47 = vld [vmem:[%s7109_s6 + $0x78] sm:$0xff]  ;;  %v7289_v8 = vld [vmem:[#allocation72_spill] sm:$0xff] }
 0x1d6   :  { %v2177_v26 = vpack.c.bf16 %v2079_v53, %v2078_v39  ;;  %v2002_v17 = vadd.f32 %v2001_v38, %v7285_v36  ;;  %v3441_v35 = vmul.f32 %v3168_v37, %v1437_v43  ;;  %v3163_v21 = vpop.permute.xlu0 %3162  ;;  %3667 = vperm.xlu1 %4605, %v3577_v58   ;;  %v1447_v62 = vadd.f32 %v7287_v51, %v7286_v61  ;;  %v4632_v53 = vld [vmem:[%s7106_s3 + $0x100] ss:$16 sps:$4 sm:$0xff]   ;;  %v4633_v39 = vld [vmem:[%s7106_s3 + $0x124] ss:$16 sps:$4 sm:$0xff]   ;;  %v3580_v36 = vld [vmem:[%s7109_s6 + $0x88] sm:$0xff] }
 0x1d7   :  { %v2081_v23 = vmax.f32 %v2007_v16, 0.0  ;;  %v3440_v52 = vmul.f32 %v3163_v21, %v1432_v46  ;;  %v3502_v20 = vadd.f32 %v3501_v13, %v3439_v28  ;;  %3662 = vperm.xlu0 %4604, %v3576_v19   ;;  %v7288_v28 = vld [vmem:[#allocation15_spill] sm:$0xff]  ;;  %v7294_v21 = vld [vmem:[#allocation76_spill] sm:$0xff] }
 0x1d8   :  { %v2080_v54 = vmax.f32 %v2002_v17, 0.0  ;;  %v4582_v32 = vpop.f32.mrb[126].mxu0  ;;  %4285 = vmatprep.subr.bf16.mxu1 %v2177_v26  ;;  %v1442_v7 = vadd.f32 %v7289_v8, %v7288_v28  ;;  %v7290_v19 = vld [vmem:[#allocation135_spill] sm:$0xff]  ;;  %v7293_v17 = vld [vmem:[#allocation17_spill] sm:$0xff] }
 0x1d9   :  { %v3503_v58 = vadd.f32 %v3502_v20, %v3440_v52  ;;  %v2017_v41 = vadd.f32 %v4582_v32, %v6262_v25  ;;  %v2011_v11 = vpop.f32.mrb[127].mxu0  ;;  %4286 = vmatpush3.bf16.msra.mxu1 %v6481_v18  ;;  %v3178_v43 = vpop.permute.xlu1 %3177  ;;  %v3581_v25 = vld [vmem:[%s7109_s6 + $0x90] sm:$0xff]  ;;  %v7292_v38 = vld [vmem:[#allocation75_spill] sm:$0xff]  ;;  %v7295_v32 = vld [vmem:[#allocation18_spill] sm:$0xff] }
 0x1da   :  { %v2178_v31 = vpack.c.bf16 %v2081_v23, %v2080_v54  ;;  %v2012_v57 = vadd.f32 %v2011_v11, %v7290_v19  ;;  %v3443_v42 = vmul.f32 %v3178_v43, %v1447_v62  ;;  %v3173_v46 = vpop.permute.xlu0 %3172  ;;  %3677 = vperm.xlu1 %4605, %v3579_v12   ;;  %v7291_v18 = vld [vmem:[#allocation16_spill] sm:$0xff]  ;;  %v1452_v23 = vadd.f32 %v7294_v21, %v7293_v17  ;;  %v3583_v54 = vld [vmem:[%s7109_s6 + $0xa0] sm:$0xff] }
 0x1db   :  { %v2083_v13 = vmax.f32 %v2017_v41, 0.0  ;;  %v3442_v49 = vmul.f32 %v3173_v46, %v1442_v7  ;;  %v3504_v16 = vadd.f32 %v3503_v58, %v3441_v35  ;;  %3672 = vperm.xlu0 %4604, %v3578_v47   ;;  %v1457_v37 = vadd.f32 %v7292_v38, %v7291_v18  ;;  %v7296_v47 = vld [vmem:[#allocation79_spill] sm:$0xff]  ;;  %v7298_v7 = vld [vmem:[#allocation80_spill] sm:$0xff] }
 0x1dc   :  { %v2082_v26 = vmax.f32 %v2012_v57, 0.0  ;;  %2789 = vmatmul.mubr.bf16.gmra.mrb[28].mxu1 %v4632_v53  ;;  %4287 = vmatprep.subr.bf16.mxu1 %v2178_v31  ;;  %v1467_v53 = vadd.f32 %v7296_v47, %v7295_v32  ;;  %v4635_v28 = vld [vmem:[%s7106_s3 + $0x120] ss:$16 sps:$4 sm:$0xff]   ;;  %v4636_v43 = vld [vmem:[%s7106_s3 + $0x144] ss:$16 sps:$4 sm:$0xff]  }
 0x1dd   :  { %v3505_v52 = vadd.f32 %v3504_v16, %v3442_v49  ;;  %4288 = vmatpush3.bf16.msra.mxu1 %v6501_v24  ;;  %v3188_v35 = vpop.permute.xlu1 %3187  ;;  %2796 = vmatprep.mubr.bf16.mxu1 %v4633_v39  ;;  %v3582_v24 = vld [vmem:[%s7109_s6 + $0x98] sm:$0xff]  ;;  %v7297_v8 = vld [vmem:[#allocation19_spill] sm:$0xff]  ;;  %v7299_v46 = vld [vmem:[#allocation20_spill] sm:$0xff] }
 0x1de   :  { %v2179_v20 = vpack.c.bf16 %v2083_v13, %v2082_v26  ;;  %v3445_v12 = vmul.f32 %v3188_v35, %v1457_v37  ;;  %v3183_v61 = vpop.permute.xlu0 %3182  ;;  %3687 = vperm.xlu1 %4605, %v3581_v25   ;;  %v1462_v58 = vadd.f32 %v7298_v7, %v7297_v8  ;;  %v7300_v13 = vld [vmem:[#allocation83_spill] sm:$0xff]  ;;  %v7301_v16 = vld [vmem:[#allocation21_spill] sm:$0xff]  ;;  %v7302_v25 = vld [vmem:[#allocation84_spill] sm:$0xff] }
 0x1df   :  { %v3444_v51 = vmul.f32 %v3183_v61, %v1452_v23  ;;  %v3506_v62 = vadd.f32 %v3505_v52, %v3443_v42  ;;  %3682 = vperm.xlu0 %4604, %v3580_v36   ;;  %v3585_v42 = vld [vmem:[%s7109_s6 + $0xb0] sm:$0xff]  ;;  %v1477_v49 = vadd.f32 %v7300_v13, %v7299_v46  ;;  %v1472_v18 = vadd.f32 %v7302_v25, %v7301_v16  ;;  %v3587_v23 = vld [vmem:[%s7109_s6 + $0xc0] sm:$0xff] }
 0x1e0   :  { %4289 = vmatprep.subr.bf16.mxu1 %v2179_v20  ;;  %v7303_v52 = vld [vmem:[#allocation22_spill] sm:$0xff]  ;;  %v7304_v35 = vld [vmem:[#allocation85_spill] sm:$0xff] }
 0x1e1   :  { %v3507_v41 = vadd.f32 %v3506_v62, %v3444_v51  ;;  %4290 = vmatpush3.bf16.msra.mxu1 %v6515_v29  ;;  %v3198_v11 = vpop.permute.xlu1 %3197  ;;  %v3584_v29 = vld [vmem:[%s7109_s6 + $0xa8] sm:$0xff]  ;;  %v1487_v20 = vadd.f32 %v7304_v35, %v7303_v52  ;;  %v4638_v61 = vld [vmem:[%s7106_s3 + $0x140] ss:$16 sps:$4 sm:$0xff]  }
 0x1e2   :  { %v3447_v39 = vmul.f32 %v3198_v11, %v1467_v53  ;;  %v3193_v31 = vpop.permute.xlu0 %3192  ;;  %3697 = vperm.xlu1 %4605, %v3583_v54   ;;  %v7305_v51 = vld [vmem:[#allocation23_spill] sm:$0xff]  ;;  %v7306_v62 = vld [vmem:[#allocation86_spill] sm:$0xff] }
 0x1e3   :  { %v3446_v19 = vmul.f32 %v3193_v31, %v1462_v58  ;;  %v3508_v57 = vadd.f32 %v3507_v41, %v3445_v12  ;;  %3692 = vperm.xlu0 %4604, %v3582_v24   ;;  %v3586_v12 = vld [vmem:[%s7109_s6 + $0xb8] sm:$0xff]  ;;  %v1482_v54 = vadd.f32 %v7306_v62, %v7305_v51  ;;  %v4639_v53 = vld [vmem:[%s7106_s3 + $0x164] ss:$16 sps:$4 sm:$0xff]   ;;  %v7307_v41 = vld [vmem:[#allocation24_spill] sm:$0xff] }
 0x1e4   :  { %2797 = vmatmul.mubr.bf16.gmra.mrb[32].mxu1 %v4635_v28  ;;  %v3589_v58 = vld [vmem:[%s7109_s6 + $0xd0] sm:$0xff]  ;;  %v7308_v11 = vld [vmem:[#allocation87_spill] sm:$0xff] }
 0x1e5   :  { %v3509_v38 = vadd.f32 %v3508_v57, %v3446_v19  ;;  %v3208_v37 = vpop.permute.xlu1 %3207  ;;  %2804 = vmatprep.mubr.bf16.mxu1 %v4636_v43  ;;  %v1497_v43 = vadd.f32 %v7308_v11, %v7307_v41  ;;  %v7309_v31 = vld [vmem:[#allocation25_spill] sm:$0xff]  ;;  %v7310_v19 = vld [vmem:[#allocation88_spill] sm:$0xff]  ;;  %v3591_v25 = vld [vmem:[%s7109_s6 + $0xe0] sm:$0xff] }
 0x1e6   :  { %v3449_v26 = vmul.f32 %v3208_v37, %v1477_v49  ;;  %v3203_v36 = vpop.permute.xlu0 %3202  ;;  %3707 = vperm.xlu1 %4605, %v3585_v42   ;;  %v1492_v57 = vadd.f32 %v7310_v19, %v7309_v31  ;;  %v3593_v19 = vld [vmem:[%s7109_s6 + $0xf0] sm:$0xff] }
 0x1e7   :  { %v3448_v17 = vmul.f32 %v3203_v36, %v1472_v18  ;;  %v3510_v21 = vadd.f32 %v3509_v38, %v3447_v39  ;;  %3702 = vperm.xlu0 %4604, %v3584_v29   ;;  %v3588_v39 = vld [vmem:[%s7109_s6 + $0xc8] sm:$0xff]  ;;  %v7311_v18 = vld [vmem:[#allocation26_spill] sm:$0xff]  ;;  %v7312_v38 = vld [vmem:[#allocation89_spill] sm:$0xff] }
 0x1e8   :  { %v1507_v37 = vadd.f32 %v7312_v38, %v7311_v18  ;;  %v4641_v36 = vld [vmem:[%s7106_s3 + $0x160] ss:$16 sps:$4 sm:$0xff]  }
 0x1e9   :  { %v3511_v32 = vadd.f32 %v3510_v21, %v3448_v17  ;;  %v3218_v47 = vpop.permute.xlu1 %3217  ;;  %v7313_v17 = vld [vmem:[#allocation27_spill] sm:$0xff]  ;;  %v7314_v21 = vld [vmem:[#allocation90_spill] sm:$0xff] }
 0x1ea   :  { %v3451_v24 = vmul.f32 %v3218_v47, %v1487_v20  ;;  %v3213_v28 = vpop.permute.xlu0 %3212  ;;  %3717 = vperm.xlu1 %4605, %v3587_v23   ;;  %v1502_v23 = vadd.f32 %v7314_v21, %v7313_v17  ;;  %v4642_v20 = vld [vmem:[%s7106_s3 + $0x184] ss:$16 sps:$4 sm:$0xff]  }
 0x1eb   :  { %v3450_v8 = vmul.f32 %v3213_v28, %v1482_v54  ;;  %v3512_v7 = vadd.f32 %v3511_v32, %v3449_v26  ;;  %3712 = vperm.xlu0 %4604, %v3586_v12   ;;  %v3590_v26 = vld [vmem:[%s7109_s6 + $0xd8] sm:$0xff]  ;;  %v3592_v54 = vld [vmem:[%s7109_s6 + $0xe8] sm:$0xff] }
 0x1ec   :  { %2805 = vmatmul.mubr.bf16.gmra.mrb[36].mxu1 %v4638_v61  ;;  %v7315_v32 = vld [vmem:[#allocation28_spill] sm:$0xff]  ;;  %v7316_v47 = vld [vmem:[#allocation91_spill] sm:$0xff]  ;;  %v7317_v28 = vld [vmem:[#allocation29_spill] sm:$0xff] }
 0x1ed   :  { %v3513_v42 = vadd.f32 %v3512_v7, %v3450_v8  ;;  %v3228_v46 = vpop.permute.xlu1 %3227  ;;  %2812 = vmatprep.mubr.bf16.mxu1 %v4639_v53  ;;  %v1517_v53 = vadd.f32 %v7316_v47, %v7315_v32  ;;  %v7318_v8 = vld [vmem:[#allocation92_spill] sm:$0xff] }
 0x1ee   :  { %v3453_v13 = vmul.f32 %v3228_v46, %v1497_v43  ;;  %v3223_v49 = vpop.permute.xlu0 %3222  ;;  %3727 = vperm.xlu1 %4605, %v3589_v58   ;;  %v1512_v7 = vadd.f32 %v7318_v8, %v7317_v28  ;;  %v7327_v8 = vld [vmem:[#allocation34_spill] sm:$0xff] }
 0x1ef   :  { %v3452_v29 = vmul.f32 %v3223_v49, %v1492_v57  ;;  %v3514_v16 = vadd.f32 %v3513_v42, %v3451_v24  ;;  %3722 = vperm.xlu0 %4604, %v3588_v39   ;;  %v3107_v24 = vld [vmem:[%s7107_s5 + $0x1e8] sm:$0xff]  ;;  %v7319_v57 = vld [vmem:[#allocation30_spill] sm:$0xff]  ;;  %v7320_v42 = vld [vmem:[#allocation93_spill] sm:$0xff] }
 0x1f0   :  { %v1527_v46 = vadd.f32 %v7320_v42, %v7319_v57  ;;  %v4644_v49 = vld [vmem:[%s7106_s3 + $0x180] ss:$16 sps:$4 sm:$0xff]   ;;  %v4648_v42 = vld [vmem:[%s7106_s3 + $0x1c4] ss:$16 sps:$4 sm:$0xff]  }
 0x1f1   :  { %v3515_v52 = vadd.f32 %v3514_v16, %v3452_v29  ;;  %v3238_v35 = vpop.permute.xlu1 %3237  ;;  %v7321_v29 = vld [vmem:[#allocation31_spill] sm:$0xff]  ;;  %v7322_v16 = vld [vmem:[#allocation94_spill] sm:$0xff] }
 0x1f2   :  { %v3455_v12 = vmul.f32 %v3238_v35, %v1507_v37  ;;  %v3233_v61 = vpop.permute.xlu0 %3232  ;;  %3737 = vperm.xlu1 %4605, %v3591_v25   ;;  %v1522_v25 = vadd.f32 %v7322_v16, %v7321_v29  ;;  %v4645_v37 = vld [vmem:[%s7106_s3 + $0x1a4] ss:$16 sps:$4 sm:$0xff]   ;;  %v7331_v16 = vld [vmem:[#allocation36_spill] sm:$0xff] }
 0x1f3   :  { %v3454_v51 = vmul.f32 %v3233_v61, %v1502_v23  ;;  %v3516_v62 = vadd.f32 %v3515_v52, %v3453_v13  ;;  %3732 = vperm.xlu0 %4604, %v3590_v26   ;;  %v3108_v13 = vld [vmem:[%s7107_s5 + $0x1f0] sm:$0xff]  ;;  %v3594_v23 = vld [vmem:[%s7109_s6 + $0xf8] sm:$0xff]  ;;  %v7324_v35 = vld [vmem:[#allocation95_spill] sm:$0xff] }
 0x1f4   :  { %2813 = vmatmul.mubr.bf16.gmra.mrb[40].mxu1 %v4641_v36  ;;  %v7323_v52 = vld [vmem:[#allocation32_spill] sm:$0xff]  ;;  %v7325_v61 = vld [vmem:[#allocation33_spill] sm:$0xff] }
 0x1f5   :  { %v3517_v58 = vadd.f32 %v3516_v62, %v3454_v51  ;;  %v3248_v41 = vpop.permute.xlu1 %3247  ;;  %2820 = vmatprep.mubr.bf16.mxu1 %v4642_v20  ;;  %v1537_v20 = vadd.f32 %v7324_v35, %v7323_v52  ;;  %v7326_v51 = vld [vmem:[#allocation96_spill] sm:$0xff] }
 0x1f6   :  { %v3457_v11 = vmul.f32 %v3248_v41, %v1517_v53  ;;  %v3243_v43 = vpop.permute.xlu0 %3242  ;;  %3742 = vperm.xlu1 %4605, %v3592_v54   ;;  %v1532_v62 = vadd.f32 %v7326_v51, %v7325_v61  ;;  %v3825_v41 = vld [vmem:[#allocation2] sm:$0x1] }
 0x1f7   :  { %v3456_v39 = vmul.f32 %v3243_v43, %v1512_v7  ;;  %v3518_v31 = vadd.f32 %v3517_v58, %v3455_v12  ;;  %3417 = vperm.xlu0 %4604, %v3107_v24   ;;  %v3109_v12 = vld [vmem:[%s7107_s5 + $0x1f8] sm:$0xff]  ;;  %v7329_v43 = vld [vmem:[#allocation35_spill] sm:$0xff] }
 0x1f8   :  { %v7328_v7 = vld [vmem:[#allocation97_spill] sm:$0xff] }
 0x1f9   :  { %v3519_v18 = vadd.f32 %v3518_v31, %v3456_v39  ;;  %v3258_v38 = vpop.permute.xlu1 %3257  ;;  %v1547_v58 = vadd.f32 %v7328_v7, %v7327_v8  ;;  %v7330_v39 = vld [vmem:[#allocation98_spill] sm:$0xff] }
 0x1fa   :  { %v3459_v26 = vmul.f32 %v3258_v38, %v1527_v46  ;;  %v3253_v36 = vpop.permute.xlu0 %3252  ;;  %3747 = vperm.xlu1 %4605, %v3593_v19   ;;  %v1542_v31 = vadd.f32 %v7330_v39, %v7329_v43  ;;  %v7333_v38 = vld [vmem:[#allocation37_spill] sm:$0xff] }
 0x1fb   :  { %v3458_v17 = vmul.f32 %v3253_v36, %v1522_v25  ;;  %v3520_v21 = vadd.f32 %v3519_v18, %v3457_v11  ;;  %3422 = vperm.xlu0 %4604, %v3108_v13   ;;  %v4647_v11 = vld [vmem:[%s7106_s3 + $0x1a0] ss:$16 sps:$4 sm:$0xff]  }
 0x1fc   :  { %2821 = vmatmul.mubr.bf16.gmra.mrb[44].mxu1 %v4644_v49  ;;  %v7332_v25 = vld [vmem:[#allocation99_spill] sm:$0xff]  ;;  %v7341_v39 = vld [vmem:[#allocation41_spill] sm:$0xff] }
 0x1fd   :  { %v3521_v54 = vadd.f32 %v3520_v21, %v3458_v17  ;;  %v3268_v32 = vpop.permute.xlu1 %3267  ;;  %2828 = vmatprep.mubr.bf16.mxu1 %v4645_v37  ;;  %v1557_v18 = vadd.f32 %v7332_v25, %v7331_v16  ;;  %v7334_v37 = vld [vmem:[#allocation100_spill] sm:$0xff]  ;;  %v7343_v16 = vld [vmem:[#allocation42_spill] sm:$0xff]  ;;  %v7344_v25 = vld [vmem:[#allocation105_spill] sm:$0xff] }
 0x1fe   :  { %v3461_v47 = vmul.f32 %v3268_v32, %v1537_v20  ;;  %v3263_v53 = vpop.permute.xlu0 %3262  ;;  %3752 = vperm.xlu1 %4605, %v3594_v23   ;;  %v7335_v20 = vld [vmem:[#allocation38_spill] sm:$0xff] }
 0x1ff   :  { %v3460_v24 = vmul.f32 %v3263_v53, %v1532_v62  ;;  %v3522_v28 = vadd.f32 %v3521_v54, %v3459_v26  ;;  %3427 = vperm.xlu0 %4604, %v3109_v12   ;;  %v1552_v26 = vadd.f32 %v7334_v37, %v7333_v38  ;;  %v7336_v12 = vld [vmem:[#allocation101_spill] sm:$0xff]  ;;  %v7337_v62 = vld [vmem:[#allocation39_spill] sm:$0xff]  ;;  %v7338_v54 = vld [vmem:[#allocation102_spill] sm:$0xff] }
 0x200   :  { %v1567_v61 = vadd.f32 %v7336_v12, %v7335_v20  ;;  %v4650_v51 = vld [vmem:[%s7106_s3 + $0x1c0] ss:$16 sps:$4 sm:$0xff]   ;;  %v1562_v32 = vadd.f32 %v7338_v54, %v7337_v62 }
 0x201   :  { %v3523_v19 = vadd.f32 %v3522_v28, %v3460_v24  ;;  %v3278_v57 = vpop.permute.xlu1 %3277  ;;  %v4651_v24 = vld [vmem:[%s7106_s3 + $0x1e4] ss:$16 sps:$4 sm:$0xff]   ;;  %v4653_v38 = vld [vmem:[%s7106_s3 + $0x1e0] ss:$16 sps:$4 sm:$0xff]  }
 0x202   :  { %v3463_v46 = vmul.f32 %v3278_v57, %v1547_v58  ;;  %v3273_v13 = vpop.permute.xlu0 %3272  ;;  %v7345_v37 = vld [vmem:[#allocation43_spill] sm:$0xff]  ;;  %v7349_v54 = vld [vmem:[#allocation45_spill] sm:$0xff] }
 0x203   :  { %v3462_v49 = vmul.f32 %v3273_v13, %v1542_v31  ;;  %v3524_v29 = vadd.f32 %v3523_v19, %v3461_v47  ;;  %3828 = vperm.xlu0 %4604, %v3825_v41   ;;  %v7339_v41 = vld [vmem:[#allocation40_spill] sm:$0xff] }
 0x204   :  { %2829 = vmatmul.mubr.bf16.gmra.mrb[48].mxu1 %v4647_v11  ;;  %v7340_v11 = vld [vmem:[#allocation103_spill] sm:$0xff]  ;;  %v7342_v31 = vld [vmem:[#allocation104_spill] sm:$0xff] }
 0x205   :  { %v3525_v36 = vadd.f32 %v3524_v29, %v3462_v49  ;;  %v3288_v17 = vpop.permute.xlu1 %3287  ;;  %2836 = vmatprep.mubr.bf16.mxu1 %v4648_v42  ;;  %v1577_v43 = vadd.f32 %v7340_v11, %v7339_v41  ;;  %v1572_v19 = vadd.f32 %v7342_v31, %v7341_v39  ;;  %v7351_v41 = vld [vmem:[#allocation46_spill] sm:$0xff]  ;;  %v7352_v11 = vld [vmem:[#allocation109_spill] sm:$0xff]  ;;  %v7353_v31 = vld [vmem:[#allocation47_spill] sm:$0xff] }
 0x206   :  { %v3465_v21 = vmul.f32 %v3288_v17, %v1557_v18  ;;  %v3283_v23 = vpop.permute.xlu0 %3282  ;;  %v1587_v18 = vadd.f32 %v7344_v25, %v7343_v16  ;;  %v4654_v39 = vld [vmem:[%s7106_s3 + $0x8] ss:$16 sps:$4 sm:$0xff]  }
 0x207   :  { %v3464_v52 = vmul.f32 %v3283_v23, %v1552_v26  ;;  %v3526_v35 = vadd.f32 %v3525_v36, %v3463_v46  ;;  %v7346_v26 = vld [vmem:[#allocation106_spill] sm:$0xff] }
 0x208   :  { %v1582_v36 = vadd.f32 %v7346_v26, %v7345_v37  ;;  %v4656_v23 = vld [vmem:[%s7106_s3 + $0xc] ss:$16 sps:$4 sm:$0xff]  }
 0x209   :  { %v3527_v47 = vadd.f32 %v3526_v35, %v3464_v52  ;;  %v3298_v53 = vpop.permute.xlu1 %3297  ;;  %v7357_v26 = vld [vmem:[#allocation50_spill] sm:$0xff] }
 0x20a   :  { %v3467_v28 = vmul.f32 %v3298_v53, %v1567_v61  ;;  %v3293_v8 = vpop.permute.xlu0 %3292  ;;  %v7347_v61 = vld [vmem:[#allocation44_spill] sm:$0xff] }
 0x20b   :  { %v3466_v7 = vmul.f32 %v3293_v8, %v1562_v32  ;;  %v3528_v58 = vadd.f32 %v3527_v47, %v3465_v21  ;;  %v7350_v32 = vld [vmem:[#allocation108_spill] sm:$0xff] }
 0x20c   :  { %2837 = vmatmul.mubr.bf16.gmra.mrb[52].mxu1 %v4650_v51  ;;  %v7348_v51 = vld [vmem:[#allocation107_spill] sm:$0xff]  ;;  %v1592_v47 = vadd.f32 %v7350_v32, %v7349_v54  ;;  %v7361_v32 = vld [vmem:[#allocation54_spill] sm:$0xff] }
 0x20d   :  { %v3529_v57 = vadd.f32 %v3528_v58, %v3466_v7  ;;  %v3308_v42 = vpop.permute.xlu1 %3307  ;;  %2844 = vmatprep.mubr.bf16.mxu1 %v4651_v24  ;;  %v1597_v62 = vadd.f32 %v7348_v51, %v7347_v61  ;;  %v7359_v61 = vld [vmem:[#allocation53_spill] sm:$0xff] }
 0x20e   :  { %v3469_v46 = vmul.f32 %v3308_v42, %v1577_v43  ;;  %v3303_v13 = vpop.permute.xlu0 %3302  ;;  %v1607_v43 = vadd.f32 %v7352_v11, %v7351_v41  ;;  %v7360_v51 = vld [vmem:[#allocation113_spill] sm:$0xff] }
 0x20f   :  { %v3468_v49 = vmul.f32 %v3303_v13, %v1572_v19  ;;  %v3530_v29 = vadd.f32 %v3529_v57, %v3467_v28  ;;  %v7354_v19 = vld [vmem:[#allocation110_spill] sm:$0xff] }
 0x210   :  { %v1602_v57 = vadd.f32 %v7354_v19, %v7353_v31  ;;  %v4657_v13 = vld [vmem:[%s7106_s3 + $0x2c] ss:$16 sps:$4 sm:$0xff]   ;;  %v4659_v54 = vld [vmem:[%s7106_s3 + $0x28] ss:$16 sps:$4 sm:$0xff]  }
 0x211   :  { %v3531_v17 = vadd.f32 %v3530_v29, %v3468_v49  ;;  %v3318_v21 = vpop.permute.xlu1 %3317  ;;  %v7365_v19 = vld [vmem:[#allocation58_spill] sm:$0xff] }
 0x212   :  { %v3471_v52 = vmul.f32 %v3318_v21, %v1587_v18  ;;  %v3313_v35 = vpop.permute.xlu0 %3312  ;;  %v7355_v18 = vld [vmem:[#allocation49_spill] sm:$0xff] }
 0x213   :  { %v3470_v20 = vmul.f32 %v3313_v35, %v1582_v36  ;;  %v3532_v12 = vadd.f32 %v3531_v17, %v3469_v46  ;;  %v7358_v36 = vld [vmem:[#allocation112_spill] sm:$0xff] }
 0x214   :  { %2845 = vmatmul.mubr.bf16.gmra.mrb[56].mxu1 %v4653_v38  ;;  %v7356_v38 = vld [vmem:[#allocation111_spill] sm:$0xff]  ;;  %v1612_v17 = vadd.f32 %v7358_v36, %v7357_v26  ;;  %v7369_v36 = vld [vmem:[#allocation62_spill] sm:$0xff] }
 0x215   :  { %v3533_v53 = vadd.f32 %v3532_v12, %v3470_v20  ;;  %v3328_v24 = vpop.permute.xlu1 %3327  ;;  %2885 = vmatprep.mubr.bf16.mxu1 %v4656_v23  ;;  %v1617_v37 = vadd.f32 %v7356_v38, %v7355_v18  ;;  %v7367_v18 = vld [vmem:[#allocation61_spill] sm:$0xff] }
 0x216   :  { %v3473_v28 = vmul.f32 %v3328_v24, %v1597_v62  ;;  %v3323_v8 = vpop.permute.xlu0 %3322  ;;  %v1627_v62 = vadd.f32 %v7360_v51, %v7359_v61  ;;  %v7368_v38 = vld [vmem:[#allocation117_spill] sm:$0xff] }
 0x217   :  { %v3472_v7 = vmul.f32 %v3323_v8, %v1592_v47  ;;  %v3534_v58 = vadd.f32 %v3533_v53, %v3471_v52  ;;  %v7362_v47 = vld [vmem:[#allocation114_spill] sm:$0xff] }
 0x218   :  { %v1622_v53 = vadd.f32 %v7362_v47, %v7361_v32  ;;  %v4660_v8 = vld [vmem:[%s7106_s3 + $0x4c] ss:$16 sps:$4 sm:$0xff]   ;;  %v4662_v26 = vld [vmem:[%s7106_s3 + $0x48] ss:$16 sps:$4 sm:$0xff]  }
 0x219   :  { %v3535_v42 = vadd.f32 %v3534_v58, %v3472_v7  ;;  %v3338_v46 = vpop.permute.xlu1 %3337  ;;  %v7373_v47 = vld [vmem:[#allocation66_spill] sm:$0xff] }
 0x21a   :  { %v3475_v49 = vmul.f32 %v3338_v46, %v1607_v43  ;;  %v3333_v29 = vpop.permute.xlu0 %3332  ;;  %v7363_v43 = vld [vmem:[#allocation57_spill] sm:$0xff] }
 0x21b   :  { %v3474_v16 = vmul.f32 %v3333_v29, %v1602_v57  ;;  %v3536_v25 = vadd.f32 %v3535_v42, %v3473_v28  ;;  %v7366_v57 = vld [vmem:[#allocation116_spill] sm:$0xff] }
 0x21c   :  { %2886 = vmatmul.mubr.bf16.vlgmr.msra.gmra.mrb[60].mxu1 %v4654_v39  ;;  %v7364_v39 = vld [vmem:[#allocation115_spill] sm:$0xff]  ;;  %v1632_v42 = vadd.f32 %v7366_v57, %v7365_v19  ;;  %v7377_v57 = vld [vmem:[#allocation70_spill] sm:$0xff] }
 0x21d   :  { %v3537_v21 = vadd.f32 %v3536_v25, %v3474_v16  ;;  %v3348_v23 = vpop.permute.xlu1 %3347  ;;  %2893 = vmatprep.mubr.bf16.mxu1 %v4657_v13  ;;  %v1637_v31 = vadd.f32 %v7364_v39, %v7363_v43  ;;  %v7375_v43 = vld [vmem:[#allocation69_spill] sm:$0xff] }
 0x21e   :  { %v3477_v52 = vmul.f32 %v3348_v23, %v1617_v37  ;;  %v3343_v35 = vpop.permute.xlu0 %3342  ;;  %v1647_v37 = vadd.f32 %v7368_v38, %v7367_v18  ;;  %v7376_v39 = vld [vmem:[#allocation121_spill] sm:$0xff] }
 0x21f   :  { %v3476_v20 = vmul.f32 %v3343_v35, %v1612_v17  ;;  %v3538_v12 = vadd.f32 %v3537_v21, %v3475_v49  ;;  %v7370_v17 = vld [vmem:[#allocation118_spill] sm:$0xff] }
 0x220   :  { %v1642_v21 = vadd.f32 %v7370_v17, %v7369_v36  ;;  %v4663_v35 = vld [vmem:[%s7106_s3 + $0x6c] ss:$16 sps:$4 sm:$0xff]   ;;  %v4665_v19 = vld [vmem:[%s7106_s3 + $0x68] ss:$16 sps:$4 sm:$0xff]  }
 0x221   :  { %v3539_v24 = vadd.f32 %v3538_v12, %v3476_v20  ;;  %v3358_v28 = vpop.permute.xlu1 %3357  ;;  %v7381_v17 = vld [vmem:[#allocation74_spill] sm:$0xff] }
 0x222   :  { %v3479_v7 = vmul.f32 %v3358_v28, %v1627_v62  ;;  %v3353_v58 = vpop.permute.xlu0 %3352  ;;  %v7371_v62 = vld [vmem:[#allocation65_spill] sm:$0xff] }
 0x223   :  { %v3478_v41 = vmul.f32 %v3353_v58, %v1622_v53  ;;  %v3540_v11 = vadd.f32 %v3539_v24, %v3477_v52  ;;  %v7374_v53 = vld [vmem:[#allocation120_spill] sm:$0xff] }
 0x224   :  { %2894 = vmatmul.mubr.bf16.gmra.mrb[64].mxu1 %v4659_v54  ;;  %v7372_v54 = vld [vmem:[#allocation119_spill] sm:$0xff]  ;;  %v1652_v24 = vadd.f32 %v7374_v53, %v7373_v47 }
 0x225   :  { %v3541_v46 = vadd.f32 %v3540_v11, %v3478_v41  ;;  %v3368_v13 = vpop.permute.xlu1 %3367  ;;  %2901 = vmatprep.mubr.bf16.mxu1 %v4660_v8  ;;  %v1657_v32 = vadd.f32 %v7372_v54, %v7371_v62  ;;  %v4668_v62 = vld [vmem:[%s7106_s3 + $0x88] ss:$16 sps:$4 sm:$0xff]  }
 0x226   :  { %v3481_v49 = vmul.f32 %v3368_v13, %v1637_v31  ;;  %v3363_v29 = vpop.permute.xlu0 %3362  ;;  %v1667_v31 = vadd.f32 %v7376_v39, %v7375_v43  ;;  %v7383_v54 = vld [vmem:[#allocation78_spill] sm:$0xff] }
 0x227   :  { %v3480_v16 = vmul.f32 %v3363_v29, %v1632_v42  ;;  %v3542_v25 = vadd.f32 %v3541_v46, %v3479_v7  ;;  %v7378_v42 = vld [vmem:[#allocation122_spill] sm:$0xff] }
 0x228   :  { %v1662_v46 = vadd.f32 %v7378_v42, %v7377_v57  ;;  %v4666_v29 = vld [vmem:[%s7106_s3 + $0x8c] ss:$16 sps:$4 sm:$0xff]  }
 0x229   :  { %v3543_v23 = vadd.f32 %v3542_v25, %v3480_v16  ;;  %v3378_v52 = vpop.permute.xlu1 %3377  ;;  %v4672_v43 = vld [vmem:[%s7106_s3 + $0xcc] ss:$16 sps:$4 sm:$0xff]  }
 0x22a   :  { %v3483_v20 = vmul.f32 %v3378_v52, %v1647_v37  ;;  %v3373_v12 = vpop.permute.xlu0 %3372  ;;  %v7379_v37 = vld [vmem:[#allocation73_spill] sm:$0xff]  ;;  %v4675_v57 = vld [vmem:[%s7106_s3 + $0xec] ss:$16 sps:$4 sm:$0xff]  }
 0x22b   :  { %v3482_v61 = vmul.f32 %v3373_v12, %v1642_v21  ;;  %v3544_v51 = vadd.f32 %v3543_v23, %v3481_v49  ;;  %v7382_v21 = vld [vmem:[#allocation124_spill] sm:$0xff] }
 0x22c   :  { %2902 = vmatmul.mubr.bf16.gmra.mrb[68].mxu1 %v4662_v26  ;;  %v7380_v26 = vld [vmem:[#allocation123_spill] sm:$0xff]  ;;  %v1672_v23 = vadd.f32 %v7382_v21, %v7381_v17 }
 0x22d   :  { %v3545_v28 = vadd.f32 %v3544_v51, %v3482_v61  ;;  %v3388_v8 = vpop.permute.xlu1 %3387  ;;  %2909 = vmatprep.mubr.bf16.mxu1 %v4663_v35  ;;  %v1677_v36 = vadd.f32 %v7380_v26, %v7379_v37  ;;  %v4683_v26 = vld [vmem:[%s7106_s3 + $0x128] ss:$16 sps:$4 sm:$0xff]  }
 0x22e   :  { %v3485_v7 = vmul.f32 %v3388_v8, %v1657_v32  ;;  %v3383_v58 = vpop.permute.xlu0 %3382  ;;  %v7384_v32 = vld [vmem:[#allocation126_spill] sm:$0xff] }
 0x22f   :  { %v3484_v41 = vmul.f32 %v3383_v58, %v1652_v24  ;;  %v3546_v11 = vadd.f32 %v3545_v28, %v3483_v20  ;;  %v1682_v47 = vadd.f32 %v7384_v32, %v7383_v54  ;;  %v4669_v24 = vld [vmem:[%s7106_s3 + $0xac] ss:$16 sps:$4 sm:$0xff]   ;;  %v7392_v54 = vld [vmem:[#allocation125_spill] sm:$0xff] }
 0x231   :  { %v3547_v13 = vadd.f32 %v3546_v11, %v3484_v41  ;;  %v3398_v49 = vpop.permute.xlu1 %3397  ;;  %v4671_v11 = vld [vmem:[%s7106_s3 + $0xa8] ss:$16 sps:$4 sm:$0xff]  }
 0x232   :  { %v3487_v16 = vmul.f32 %v3398_v49, %v1667_v31  ;;  %v3393_v25 = vpop.permute.xlu0 %3392  ;;  %v4678_v49 = vld [vmem:[%s7106_s3 + $0x10c] ss:$16 sps:$4 sm:$0xff]  }
 0x233   :  { %v3486_v18 = vmul.f32 %v3393_v25, %v1662_v46  ;;  %v3548_v38 = vadd.f32 %v3547_v13, %v3485_v7  ;;  %v4677_v13 = vld [vmem:[%s7106_s3 + $0xe8] ss:$16 sps:$4 sm:$0xff]  }
 0x234   :  { %2910 = vmatmul.mubr.bf16.gmra.mrb[72].mxu1 %v4665_v19  ;;  %v4674_v19 = vld [vmem:[%s7106_s3 + $0xc8] ss:$16 sps:$4 sm:$0xff]  }
 0x235   :  { %v3549_v52 = vadd.f32 %v3548_v38, %v3486_v18  ;;  %v3408_v35 = vpop.permute.xlu1 %3407  ;;  %2917 = vmatprep.mubr.bf16.mxu1 %v4666_v29  ;;  %v4680_v25 = vld [vmem:[%s7106_s3 + $0x108] ss:$16 sps:$4 sm:$0xff]   ;;  %v4681_v18 = vld [vmem:[%s7106_s3 + $0x12c] ss:$16 sps:$4 sm:$0xff]  }
 0x236   :  { %v3489_v20 = vmul.f32 %v3408_v35, %v1677_v36  ;;  %v3403_v12 = vpop.permute.xlu0 %3402  ;;  %v4684_v36 = vld [vmem:[%s7106_s3 + $0x14c] ss:$16 sps:$4 sm:$0xff]  }
 0x237   :  { %v3488_v61 = vmul.f32 %v3403_v12, %v1672_v23  ;;  %v3550_v51 = vadd.f32 %v3549_v52, %v3487_v16  ;;  %v4686_v23 = vld [vmem:[%s7106_s3 + $0x148] ss:$16 sps:$4 sm:$0xff]   ;;  %v4687_v52 = vld [vmem:[%s7106_s3 + $0x16c] ss:$16 sps:$4 sm:$0xff]  }
 0x238   :  { %v4689_v12 = vld [vmem:[%s7106_s3 + $0x168] ss:$16 sps:$4 sm:$0xff]  }
 0x239   :  { %v3551_v53 = vadd.f32 %v3550_v51, %v3488_v61  ;;  %v4690_v61 = vld [vmem:[%s7106_s3 + $0x18c] ss:$16 sps:$4 sm:$0xff]  }
 0x23a   :  { %v3413_v28 = vpop.permute.xlu0 %3412 }
 0x23b   :  { %v3490_v8 = vmul.f32 %v3413_v28, %v1682_v47  ;;  %v3552_v7 = vadd.f32 %v3551_v53, %v3489_v20 }
 0x23c   :  { %2918 = vmatmul.mubr.bf16.gmra.mrb[76].mxu1 %v4668_v62  ;;  %v7391_v62 = vld [vmem:[#allocation77_spill] sm:$0xff] }
 0x23d   :  { %v3553_v58 = vadd.f32 %v3552_v7, %v3490_v8  ;;  %2925 = vmatprep.mubr.bf16.mxu1 %v4669_v24  ;;  %v1687_v32 = vadd.f32 %v7392_v54, %v7391_v62 }
 0x23e   :  { %v6856_v41 = vpop.permute.xlu0 %3602 }
 0x242   :  { %v6864_v39 = vpop.permute.xlu0 %3612 }
 0x244   :  { %2926 = vmatmul.mubr.bf16.gmra.mrb[80].mxu1 %v4671_v11  ;;  %v4692_v11 = vld [vmem:[%s7106_s3 + $0x188] ss:$16 sps:$4 sm:$0xff]  }
 0x245   :  { %2933 = vmatprep.mubr.bf16.mxu1 %v4672_v43  ;;  %v7393_v43 = vld [vmem:[#allocation82_spill] sm:$0xff] }
 0x246   :  { %v6866_v31 = vpop.permute.xlu0 %3622 }
 0x24a   :  { %v6874_v42 = vpop.permute.xlu0 %3632 }
 0x24c   :  { %2934 = vmatmul.mubr.bf16.gmra.mrb[84].mxu1 %v4674_v19  ;;  %v7394_v19 = vld [vmem:[#allocation128_spill] sm:$0xff] }
 0x24d   :  { %2941 = vmatprep.mubr.bf16.mxu1 %v4675_v57  ;;  %v1692_v57 = vadd.f32 %v7394_v19, %v7393_v43  ;;  %v4695_v43 = vld [vmem:[%s7106_s3 + $0x1a8] ss:$16 sps:$4 sm:$0xff]  }
 0x24e   :  { %v6876_v46 = vpop.permute.xlu0 %3642 }
 0x252   :  { %v6884_v29 = vpop.permute.xlu0 %3652 }
 0x254   :  { %2942 = vmatmul.mubr.bf16.gmra.mrb[88].mxu1 %v4677_v13 }
 0x255   :  { %2949 = vmatprep.mubr.bf16.mxu1 %v4678_v49 }
 0x256   :  { %v6886_v16 = vpop.permute.xlu0 %3662 }
 0x25a   :  { %v6894_v38 = vpop.permute.xlu0 %3672 }
 0x25c   :  { %2950 = vmatmul.mubr.bf16.gmra.mrb[92].mxu1 %v4680_v25 }
 0x25d   :  { %2957 = vmatprep.mubr.bf16.mxu1 %v4681_v18 }
 0x25e   :  { %v6896_v37 = vpop.permute.xlu0 %3682 }
 0x25f   :  { %7385 = vst [vmem:[#allocation4_spill] sm:$0xff] %v6896_v37 }
 0x262   :  { %v6904_v17 = vpop.permute.xlu0 %3692 }
 0x263   :  { %7386 = vst [vmem:[#allocation48_spill] sm:$0xff] %v6904_v17 }
 0x264   :  { %2958 = vmatmul.mubr.bf16.gmra.mrb[96].mxu1 %v4683_v26 }
 0x265   :  { %2965 = vmatprep.mubr.bf16.mxu1 %v4684_v36  ;;  %v4693_v36 = vld [vmem:[%s7106_s3 + $0x1ac] ss:$16 sps:$4 sm:$0xff]  }
 0x266   :  { %v6906_v21 = vpop.permute.xlu0 %3702 }
 0x267   :  { %7387 = vst [vmem:[#allocation129_spill] sm:$0xff] %v6906_v21 }
 0x26a   :  { %v6914_v35 = vpop.permute.xlu0 %3712 }
 0x26b   :  { %7388 = vst [vmem:[#allocation5_spill] sm:$0xff] %v6914_v35 }
 0x26c   :  { %2966 = vmatmul.mubr.bf16.gmra.mrb[100].mxu1 %v4686_v23 }
 0x26d   :  { %2973 = vmatprep.mubr.bf16.mxu1 %v4687_v52 }
 0x26e   :  { %v6916_v20 = vpop.permute.xlu0 %3722 }
 0x26f   :  { %7389 = vst [vmem:[#allocation51_spill] sm:$0xff] %v6916_v20 }
 0x272   :  { %v6924_v51 = vpop.permute.xlu0 %3732 }
 0x273   :  { %7390 = vst [vmem:[#allocation3_spill] sm:$0xff] %v6924_v51 }
 0x274   :  { %2974 = vmatmul.mubr.bf16.gmra.mrb[104].mxu1 %v4689_v12 }
 0x275   :  { %2981 = vmatprep.mubr.bf16.mxu1 %v4690_v61 }
 0x276   :  { %v3418_v47 = vpop.permute.xlu0 %3417 }
 0x277   :  { %v3491_v53 = vmul.f32 %v3418_v47, %v1687_v32  ;;  %v4179_v24 = vpop.f32.mrb[128].mxu0  ;;  %v4185_v28 = vpop.f32.mrb[0].mxu1  ;;  %v7396_v32 = vld [vmem:[#allocation127_spill] sm:$0xff] }
 0x278   :  { %v4180_v8 = vpop.f32.mrb[129].mxu0  ;;  %v4186_v7 = vpop.f32.mrb[1].mxu1 }
 0x279   :  { %v3554_v13 = vadd.f32 %v3553_v58, %v3491_v53  ;;  %v6933_v49 = vadd.f32 %v4180_v8, %v4179_v24  ;;  %v6935_v25 = vadd.f32 %v4186_v7, %v4185_v28  ;;  %v4182_v18 = vpop.f32.mrb[130].mxu0  ;;  %v4188_v26 = vpop.f32.mrb[2].mxu1  ;;  %v7395_v58 = vld [vmem:[#allocation81_spill] sm:$0xff] }
 0x27a   :  { %v3423_v23 = vpop.permute.xlu0 %3422  ;;  %v4183_v12 = vpop.f32.mrb[131].mxu0  ;;  %v1697_v47 = vadd.f32 %v7396_v32, %v7395_v58  ;;  %v4699_v58 = vld [vmem:[%s7106_s3 + $0x1ec] ss:$16 sps:$4 sm:$0xff]  }
 0x27b   :  { %v3492_v52 = vmul.f32 %v3423_v23, %v1692_v57  ;;  %v4189_v61 = vpop.f32.mrb[3].mxu1  ;;  %v6940_v62 = vadd.f32 %v4183_v12, %v4182_v18 }
 0x27c   :  { %v6942_v54 = vadd.f32 %v4189_v61, %v4188_v26  ;;  %2982 = vmatmul.mubr.bf16.gmra.mrb[108].mxu1 %v4692_v11  ;;  %v4696_v11 = vld [vmem:[%s7106_s3 + $0x1cc] ss:$16 sps:$4 sm:$0xff]  }
 0x27d   :  { %v3555_v53 = vadd.f32 %v3554_v13, %v3492_v52  ;;  %2989 = vmatprep.mubr.bf16.mxu1 %v4693_v36  ;;  %v4698_v52 = vld [vmem:[%s7106_s3 + $0x1c8] ss:$16 sps:$4 sm:$0xff]  }
 0x27e   :  { %v3428_v24 = vpop.permute.xlu0 %3427 }
 0x27f   :  { %v3493_v28 = vmul.f32 %v3428_v24, %v1697_v47  ;;  %v4191_v8 = vpop.f32.mrb[4].mxu1 }
 0x280   :  { %v4192_v7 = vpop.f32.mrb[5].mxu1 }
 0x281   :  { %v6949_v19 = vadd.f32 %v3555_v53, %v3493_v28  ;;  %v6951_v57 = vadd.f32 %v4192_v7, %v4191_v8  ;;  %v4194_v18 = vpop.f32.mrb[6].mxu1  ;;  %v4701_v28 = vld [vmem:[%s7106_s3 + $0x1e8] ss:$16 sps:$4 sm:$0xff]  }
 0x282   :  { %v4195_v26 = vpop.f32.mrb[7].mxu1 }
 0x283   :  { %7397 = vst [vmem:[#allocation52_spill] sm:$0xff] %v6949_v19  ;;  %v6956_v13 = vadd.f32 %v4195_v26, %v4194_v18 }
 0x284   :  { %2990 = vmatmul.mubr.bf16.gmra.mrb[112].mxu1 %v4695_v43 }
 0x285   :  { %2997 = vmatprep.mubr.bf16.mxu1 %v4696_v11 }
 0x287   :  { %v4197_v36 = vpop.f32.mrb[8].mxu1 }
 0x288   :  { %v4198_v23 = vpop.f32.mrb[9].mxu1 }
 0x289   :  { %v6961_v12 = vadd.f32 %v4198_v23, %v4197_v36  ;;  %v4200_v61 = vpop.f32.mrb[10].mxu1 }
 0x28a   :  { %v4201_v32 = vpop.f32.mrb[11].mxu1 }
 0x28b   :  { %v6966_v47 = vadd.f32 %v4201_v32, %v4200_v61 }
 0x28c   :  { %2998 = vmatmul.mubr.bf16.gmra.mrb[116].mxu1 %v4698_v52 }
 0x28d   :  { %3005 = vmatprep.mubr.bf16.mxu1 %v4699_v58 }
 0x28f   :  { %v4203_v53 = vpop.f32.mrb[12].mxu1 }
 0x290   :  { %v4204_v24 = vpop.f32.mrb[13].mxu1 }
 0x291   :  { %v6971_v8 = vadd.f32 %v4204_v24, %v4203_v53  ;;  %v4206_v7 = vpop.f32.mrb[14].mxu1 }
 0x292   :  { %v4207_v43 = vpop.f32.mrb[15].mxu1 }
 0x293   :  { %v6973_v18 = vadd.f32 %v4207_v43, %v4206_v7 }
 0x294   :  { %3006 = vmatmul.mubr.bf16.gmra.mrb[120].mxu1 %v4701_v28 }
 0x297   :  { %v4209_v11 = vpop.f32.mrb[16].mxu1 }
 0x298   :  { %v4210_v26 = vpop.f32.mrb[17].mxu1 }
 0x299   :  { %v6975_v36 = vadd.f32 %v4210_v26, %v4209_v11  ;;  %v4212_v23 = vpop.f32.mrb[18].mxu1 }
 0x29a   :  { %v4213_v52 = vpop.f32.mrb[19].mxu1 }
 0x29b   :  { %v6977_v61 = vadd.f32 %v4213_v52, %v4212_v23 }
 0x29f   :  { %v4215_v58 = vpop.f32.mrb[20].mxu1 }
 0x2a0   :  { %v4216_v32 = vpop.f32.mrb[21].mxu1 }
 0x2a1   :  { %v6979_v19 = vadd.f32 %v4216_v32, %v4215_v58  ;;  %v4218_v51 = vpop.f32.mrb[22].mxu1 }
 0x2a2   :  { %v4219_v53 = vpop.f32.mrb[23].mxu1 }
 0x2a3   :  { %v6981_v24 = vadd.f32 %v4219_v53, %v4218_v51 }
 0x2a7   :  { %v4221_v20 = vpop.f32.mrb[24].mxu1 }
 0x2a8   :  { %v4222_v7 = vpop.f32.mrb[25].mxu1 }
 0x2a9   :  { %v6983_v43 = vadd.f32 %v4222_v7, %v4221_v20  ;;  %v4224_v28 = vpop.f32.mrb[26].mxu1 }
 0x2aa   :  { %v4225_v34 = vpop.f32.mrb[27].mxu1 }
 0x2ab   :  { %v6985_v11 = vadd.f32 %v4225_v34, %v4224_v28 }
 0x2af   :  { %v4227_v26 = vpop.f32.mrb[28].mxu1 }
 0x2b0   :  { %v4228_v35 = vpop.f32.mrb[29].mxu1 }
 0x2b1   :  { %v6987_v23 = vadd.f32 %v4228_v35, %v4227_v26  ;;  %v4230_v52 = vpop.f32.mrb[30].mxu1 }
 0x2b2   :  { %v4231_v30 = vpop.f32.mrb[31].mxu1 }
 0x2b3   :  { %v6989_v58 = vadd.f32 %v4231_v30, %v4230_v52 }
 0x2b7   :  { %v4233_v32 = vpop.f32.mrb[32].mxu1 }
 0x2b8   :  { %v4234_v4 = vpop.f32.mrb[33].mxu1 }
 0x2b9   :  { %v6991_v51 = vadd.f32 %v4234_v4, %v4233_v32  ;;  %v4236_v53 = vpop.f32.mrb[34].mxu1 }
 0x2ba   :  { %v4237_v21 = vpop.f32.mrb[35].mxu1 }
 0x2bb   :  { %v6993_v20 = vadd.f32 %v4237_v21, %v4236_v53 }
 0x2bd   :  { %7398 = vst [vmem:[#allocation130_spill] sm:$0xff] %v6993_v20 }
 0x2bf   :  { %v4239_v7 = vpop.f32.mrb[36].mxu1 }
 0x2c0   :  { %v4240_v6 = vpop.f32.mrb[37].mxu1 }
 0x2c1   :  { %v6995_v34 = vadd.f32 %v4240_v6, %v4239_v7  ;;  %v4242_v28 = vpop.f32.mrb[38].mxu1 }
 0x2c2   :  { %v4243_v48 = vpop.f32.mrb[39].mxu1 }
 0x2c3   :  { %7399 = vst [vmem:[#allocation6_spill] sm:$0xff] %v6995_v34  ;;  %v6997_v35 = vadd.f32 %v4243_v48, %v4242_v28 }
 0x2c5   :  { %7400 = vst [vmem:[#allocation55_spill] sm:$0xff] %v6997_v35 }
 0x2c7   :  { %v4245_v26 = vpop.f32.mrb[40].mxu1 }
 0x2c8   :  { %v4246_v17 = vpop.f32.mrb[41].mxu1 }
 0x2c9   :  { %v6999_v30 = vadd.f32 %v4246_v17, %v4245_v26  ;;  %v4248_v52 = vpop.f32.mrb[42].mxu1 }
 0x2ca   :  { %v4249_v50 = vpop.f32.mrb[43].mxu1 }
 0x2cb   :  { %7401 = vst [vmem:[#allocation7_spill] sm:$0xff] %v6999_v30  ;;  %v7001_v4 = vadd.f32 %v4249_v50, %v4248_v52 }
 0x2cd   :  { %7402 = vst [vmem:[#allocation56_spill] sm:$0xff] %v7001_v4 }
 0x2cf   :  { %v4251_v32 = vpop.f32.mrb[44].mxu1 }
 0x2d0   :  { %v4252_v44 = vpop.f32.mrb[45].mxu1 }
 0x2d1   :  { %v7003_v21 = vadd.f32 %v4252_v44, %v4251_v32  ;;  %v4254_v53 = vpop.f32.mrb[46].mxu1 }
 0x2d2   :  { %v4255_v20 = vpop.f32.mrb[47].mxu1 }
 0x2d3   :  { %7403 = vst [vmem:[#allocation131_spill] sm:$0xff] %v7003_v21  ;;  %v7005_v6 = vadd.f32 %v4255_v20, %v4254_v53 }
 0x2d5   :  { %7404 = vst [vmem:[#allocation8_spill] sm:$0xff] %v7005_v6 }
 0x2d7   :  { %v4257_v7 = vpop.f32.mrb[48].mxu1 }
 0x2d8   :  { %v4258_v34 = vpop.f32.mrb[49].mxu1 }
 0x2d9   :  { %v7007_v48 = vadd.f32 %v4258_v34, %v4257_v7  ;;  %v4260_v28 = vpop.f32.mrb[50].mxu1 }
 0x2da   :  { %v4261_v35 = vpop.f32.mrb[51].mxu1 }
 0x2db   :  { %7405 = vst [vmem:[#allocation59_spill] sm:$0xff] %v7007_v48  ;;  %v7009_v17 = vadd.f32 %v4261_v35, %v4260_v28  ;;  %v2727_v35 = vadd.f32 %v6933_v49, %v6279_v33 }
 0x2dd   :  { %7406 = vst [vmem:[#allocation9_spill] sm:$0xff] %v7009_v17  ;;  %v3598_v17 = vpop.permute.xlu1 %3597 }
 0x2df   :  { %v4263_v26 = vpop.f32.mrb[52].mxu1 }
 0x2e0   :  { %v4264_v30 = vpop.f32.mrb[53].mxu1 }
 0x2e1   :  { %v7011_v50 = vadd.f32 %v4264_v30, %v4263_v26  ;;  %v4266_v52 = vpop.f32.mrb[54].mxu1 }
 0x2e2   :  { %v4267_v4 = vpop.f32.mrb[55].mxu1 }
 0x2e3   :  { %7407 = vst [vmem:[#allocation60_spill] sm:$0xff] %v7011_v50  ;;  %v7013_v44 = vadd.f32 %v4267_v4, %v4266_v52  ;;  %v2730_v4 = vadd.f32 %v6940_v62, %v6276_v55  ;;  %v2738_v55 = vadd.f32 %v6942_v54, %v6290_v10  ;;  %v2746_v10 = vadd.f32 %v6956_v13, %v6304_v2 }
 0x2e4   :  { %v2754_v2 = vadd.f32 %v6966_v47, %v6318_v5  ;;  %v2762_v5 = vadd.f32 %v6973_v18, %v6332_v56  ;;  %v2770_v56 = vadd.f32 %v6977_v61, %v6346_v59  ;;  %v2778_v59 = vadd.f32 %v6981_v24, %v6360_v15 }
 0x2e5   :  { %7408 = vst [vmem:[#allocation132_spill] sm:$0xff] %v7013_v44  ;;  %v2786_v15 = vadd.f32 %v6985_v11, %v6374_v27  ;;  %v2794_v27 = vadd.f32 %v6989_v58, %v6394_v3  ;;  %v7412_v3 = vld [vmem:[#allocation136_spill] sm:$0xff]  ;;  %v7413_v58 = vld [vmem:[#allocation130_spill] sm:$0xff] }
 0x2e7   :  { %v4269_v32 = vpop.f32.mrb[56].mxu1 }
 0x2e8   :  { %v4270_v21 = vpop.f32.mrb[57].mxu1 }
 0x2e9   :  { %v7015_v20 = vadd.f32 %v4270_v21, %v4269_v32  ;;  %v4272_v53 = vpop.f32.mrb[58].mxu1 }
 0x2ea   :  { %v4273_v6 = vpop.f32.mrb[59].mxu1 }
 0x2eb   :  { %7409 = vst [vmem:[#allocation10_spill] sm:$0xff] %v7015_v20  ;;  %v7017_v34 = vadd.f32 %v4273_v6, %v4272_v53  ;;  %v2735_v53 = vadd.f32 %v6935_v25, %v6293_v1  ;;  %v2743_v1 = vadd.f32 %v6951_v57, %v6307_v9  ;;  %v2751_v9 = vadd.f32 %v6961_v12, %v6321_v60 }
 0x2ec   :  { %v2759_v60 = vadd.f32 %v6971_v8, %v6335_v40  ;;  %v2767_v40 = vadd.f32 %v6975_v36, %v6349_v45  ;;  %v2775_v45 = vadd.f32 %v6979_v19, %v6363_v14  ;;  %v2783_v14 = vadd.f32 %v6983_v43, %v6377_v22 }
 0x2ed   :  { %7410 = vst [vmem:[#allocation63_spill] sm:$0xff] %v7017_v34  ;;  %v2791_v22 = vadd.f32 %v6987_v23, %v6402_v0  ;;  %v2799_v0 = vadd.f32 %v6991_v51, %v6416_v63  ;;  %v7411_v23 = vld [vmem:[#allocation4_spill] sm:$0xff]  ;;  %v7414_v63 = vld [vmem:[#allocation138_spill] sm:$0xff] }
 0x2ee   :  { %v7415_v51 = vld [vmem:[#allocation6_spill] sm:$0xff] }
 0x2ef   :  { %v4291_v7 = vpop.f32.mrb[60].mxu1 }
 0x2f0   :  { %v4292_v48 = vpop.f32.mrb[61].mxu1 }
 0x2f1   :  { %v4293_v28 = vadd.f32 %v4292_v48, %v4291_v7  ;;  %v4294_v30 = vpop.f32.mrb[62].mxu1 }
 0x2f2   :  { %v4295_v26 = vpop.f32.mrb[63].mxu1 }
 0x2f3   :  { %v2888_v52 = vadd.f32 %v4293_v28, %v2727_v35  ;;  %v4296_v44 = vadd.f32 %v4295_v26, %v4294_v30  ;;  %v3608_v26 = vpop.permute.xlu1 %3607 }
 0x2f5   :  { %v3014_v50 = vmax.f32 %v2888_v52, 0.0  ;;  %v2891_v21 = vadd.f32 %v4296_v44, %v2730_v4 }
 0x2f7   :  { %v3015_v32 = vmax.f32 %v2891_v21, 0.0  ;;  %v4297_v20 = vpop.f32.mrb[64].mxu1  ;;  %v3755_v34 = vmul.f32 %v3598_v17, %v3014_v50 }
 0x2f8   :  { %v4298_v6 = vpop.f32.mrb[65].mxu1 }
 0x2f9   :  { %v3756_v33 = vmul.f32 %v6856_v41, %v3015_v32  ;;  %v4299_v49 = vadd.f32 %v4298_v6, %v4297_v20  ;;  %v4300_v48 = vpop.f32.mrb[66].mxu1 }
 0x2fa   :  { %v4301_v7 = vpop.f32.mrb[67].mxu1 }
 0x2fb   :  { %v3787_v62 = vadd.f32 %v3756_v33, %v3755_v34  ;;  %v2896_v35 = vadd.f32 %v4299_v49, %v2735_v53  ;;  %v4302_v28 = vadd.f32 %v4301_v7, %v4300_v48  ;;  %v3618_v33 = vpop.permute.xlu1 %3617 }
 0x2fd   :  { %v3016_v44 = vmax.f32 %v2896_v35, 0.0  ;;  %v2899_v30 = vadd.f32 %v4302_v28, %v2738_v55 }
 0x2ff   :  { %v3757_v4 = vmul.f32 %v3608_v26, %v3016_v44  ;;  %v3017_v52 = vmax.f32 %v2899_v30, 0.0  ;;  %v4303_v21 = vpop.f32.mrb[68].mxu1 }
 0x300   :  { %v4304_v37 = vpop.f32.mrb[69].mxu1 }
 0x301   :  { %v3788_v41 = vadd.f32 %v3787_v62, %v3757_v4  ;;  %v3758_v25 = vmul.f32 %v6864_v39, %v3017_v52  ;;  %v4305_v17 = vadd.f32 %v4304_v37, %v4303_v21  ;;  %v4306_v50 = vpop.f32.mrb[70].mxu1  ;;  %v3628_v4 = vpop.permute.xlu1 %3627 }
 0x302   :  { %v4307_v20 = vpop.f32.mrb[71].mxu1 }
 0x303   :  { %v3789_v54 = vadd.f32 %v3788_v41, %v3758_v25  ;;  %v2904_v34 = vadd.f32 %v4305_v17, %v2743_v1  ;;  %v4308_v32 = vadd.f32 %v4307_v20, %v4306_v50 }
 0x305   :  { %v3018_v6 = vmax.f32 %v2904_v34, 0.0  ;;  %v2907_v53 = vadd.f32 %v4308_v32, %v2746_v10  ;;  %v3638_v32 = vpop.permute.xlu1 %3637 }
 0x307   :  { %v3759_v49 = vmul.f32 %v3618_v33, %v3018_v6  ;;  %v3019_v48 = vmax.f32 %v2907_v53, 0.0  ;;  %v4309_v7 = vpop.f32.mrb[72].mxu1 }
 0x308   :  { %v4310_v55 = vpop.f32.mrb[73].mxu1 }
 0x309   :  { %v3790_v39 = vadd.f32 %v3789_v54, %v3759_v49  ;;  %v3760_v37 = vmul.f32 %v6866_v31, %v3019_v48  ;;  %v4311_v57 = vadd.f32 %v4310_v55, %v4309_v7  ;;  %v4312_v62 = vpop.f32.mrb[74].mxu1 }
 0x30a   :  { %v4313_v35 = vpop.f32.mrb[75].mxu1 }
 0x30b   :  { %v3791_v13 = vadd.f32 %v3790_v39, %v3760_v37  ;;  %v2912_v28 = vadd.f32 %v4311_v57, %v2751_v9  ;;  %v4314_v44 = vadd.f32 %v4313_v35, %v4312_v62  ;;  %v3648_v62 = vpop.permute.xlu1 %3647 }
 0x30d   :  { %v3020_v30 = vmax.f32 %v2912_v28, 0.0  ;;  %v2915_v26 = vadd.f32 %v4314_v44, %v2754_v2 }
 0x30f   :  { %v3761_v52 = vmul.f32 %v3628_v4, %v3020_v30  ;;  %v3021_v21 = vmax.f32 %v2915_v26, 0.0  ;;  %v4315_v1 = vpop.f32.mrb[76].mxu1 }
 0x310   :  { %v4316_v41 = vpop.f32.mrb[77].mxu1 }
 0x311   :  { %v3792_v31 = vadd.f32 %v3791_v13, %v3761_v52  ;;  %v3762_v12 = vmul.f32 %v6874_v42, %v3021_v21  ;;  %v4317_v25 = vadd.f32 %v4316_v41, %v4315_v1  ;;  %v4318_v17 = vpop.f32.mrb[78].mxu1  ;;  %v3658_v41 = vpop.permute.xlu1 %3657 }
 0x312   :  { %v4319_v50 = vpop.f32.mrb[79].mxu1 }
 0x313   :  { %v3793_v47 = vadd.f32 %v3792_v31, %v3762_v12  ;;  %v2920_v20 = vadd.f32 %v4317_v25, %v2759_v60  ;;  %v4320_v10 = vadd.f32 %v4319_v50, %v4318_v17 }
 0x315   :  { %v3022_v54 = vmax.f32 %v2920_v20, 0.0  ;;  %v2923_v34 = vadd.f32 %v4320_v10, %v2762_v5 }
 0x317   :  { %v3763_v6 = vmul.f32 %v3638_v32, %v3022_v54  ;;  %v3023_v53 = vmax.f32 %v2923_v34, 0.0  ;;  %v4321_v33 = vpop.f32.mrb[80].mxu1  ;;  %v3668_v34 = vpop.permute.xlu1 %3667 }
 0x318   :  { %v4322_v49 = vpop.f32.mrb[81].mxu1 }
 0x319   :  { %v3794_v42 = vadd.f32 %v3793_v47, %v3763_v6  ;;  %v3764_v8 = vmul.f32 %v6876_v46, %v3023_v53  ;;  %v4323_v48 = vadd.f32 %v4322_v49, %v4321_v33  ;;  %v4324_v7 = vpop.f32.mrb[82].mxu1 }
 0x31a   :  { %v4325_v55 = vpop.f32.mrb[83].mxu1 }
 0x31b   :  { %v3795_v18 = vadd.f32 %v3794_v42, %v3764_v8  ;;  %v2928_v9 = vadd.f32 %v4323_v48, %v2767_v40  ;;  %v4326_v39 = vadd.f32 %v4325_v55, %v4324_v7 }
 0x31d   :  { %v3024_v37 = vmax.f32 %v2928_v9, 0.0  ;;  %v2931_v57 = vadd.f32 %v4326_v39, %v2770_v56  ;;  %v3678_v56 = vpop.permute.xlu1 %3677 }
 0x31f   :  { %v3765_v35 = vmul.f32 %v3648_v62, %v3024_v37  ;;  %v3025_v2 = vmax.f32 %v2931_v57, 0.0  ;;  %v4327_v13 = vpop.f32.mrb[84].mxu1 }
 0x320   :  { %v4328_v28 = vpop.f32.mrb[85].mxu1 }
 0x321   :  { %v3796_v46 = vadd.f32 %v3795_v18, %v3765_v35  ;;  %v3766_v36 = vmul.f32 %v6884_v29, %v3025_v2  ;;  %v4329_v44 = vadd.f32 %v4328_v28, %v4327_v13  ;;  %v4330_v30 = vpop.f32.mrb[86].mxu1  ;;  %v2802_v13 = vadd.f32 %v7413_v58, %v7412_v3 }
 0x322   :  { %v4331_v26 = vpop.f32.mrb[87].mxu1 }
 0x323   :  { %v3797_v61 = vadd.f32 %v3796_v46, %v3766_v36  ;;  %v2936_v4 = vadd.f32 %v4329_v44, %v2775_v45  ;;  %v4332_v52 = vadd.f32 %v4331_v26, %v4330_v30  ;;  %v3688_v30 = vpop.permute.xlu1 %3687 }
 0x325   :  { %v3026_v21 = vmax.f32 %v2936_v4, 0.0  ;;  %v2939_v1 = vadd.f32 %v4332_v52, %v2778_v59  ;;  %v2807_v52 = vadd.f32 %v7415_v51, %v7414_v63 }
 0x327   :  { %v3767_v60 = vmul.f32 %v3658_v41, %v3026_v21  ;;  %v3027_v31 = vmax.f32 %v2939_v1, 0.0  ;;  %v4333_v12 = vpop.f32.mrb[88].mxu1  ;;  %v7416_v1 = vld [vmem:[#allocation48_spill] sm:$0xff] }
 0x328   :  { %v4334_v25 = vpop.f32.mrb[89].mxu1 }
 0x329   :  { %v3798_v29 = vadd.f32 %v3797_v61, %v3767_v60  ;;  %v3768_v19 = vmul.f32 %v6886_v16, %v3027_v31  ;;  %v4335_v17 = vadd.f32 %v4334_v25, %v4333_v12  ;;  %v4336_v50 = vpop.f32.mrb[90].mxu1  ;;  %v7417_v25 = vld [vmem:[#allocation137_spill] sm:$0xff] }
 0x32a   :  { %v4337_v5 = vpop.f32.mrb[91].mxu1 }
 0x32b   :  { %v3799_v24 = vadd.f32 %v3798_v29, %v3768_v19  ;;  %v2944_v47 = vadd.f32 %v4335_v17, %v2783_v14  ;;  %v4338_v20 = vadd.f32 %v4337_v5, %v4336_v50  ;;  %v7418_v14 = vld [vmem:[#allocation55_spill] sm:$0xff] }
 0x32c   :  { %v2810_v29 = vadd.f32 %v7418_v14, %v7417_v25 }
 0x32d   :  { %v3028_v10 = vmax.f32 %v2944_v47, 0.0  ;;  %v2947_v54 = vadd.f32 %v4338_v20, %v2786_v15 }
 0x32f   :  { %v3769_v32 = vmul.f32 %v3668_v34, %v3028_v10  ;;  %v3029_v6 = vmax.f32 %v2947_v54, 0.0  ;;  %v4339_v53 = vpop.f32.mrb[92].mxu1  ;;  %v7419_v34 = vld [vmem:[#allocation140_spill] sm:$0xff] }
 0x330   :  { %v4340_v33 = vpop.f32.mrb[93].mxu1 }
 0x331   :  { %v3800_v16 = vadd.f32 %v3799_v24, %v3769_v32  ;;  %v3770_v43 = vmul.f32 %v6894_v38, %v3029_v6  ;;  %v4341_v49 = vadd.f32 %v4340_v33, %v4339_v53  ;;  %v4342_v40 = vpop.f32.mrb[94].mxu1  ;;  %v3698_v24 = vpop.permute.xlu1 %3697  ;;  %v7420_v32 = vld [vmem:[#allocation7_spill] sm:$0xff]  ;;  %v7421_v33 = vld [vmem:[#allocation129_spill] sm:$0xff] }
 0x332   :  { %v4343_v42 = vpop.f32.mrb[95].mxu1  ;;  %v2815_v6 = vadd.f32 %v7420_v32, %v7419_v34 }
 0x333   :  { %v3801_v11 = vadd.f32 %v3800_v16, %v3770_v43  ;;  %v2952_v8 = vadd.f32 %v4341_v49, %v2791_v22  ;;  %v4344_v48 = vadd.f32 %v4343_v42, %v4342_v40  ;;  %v7422_v40 = vld [vmem:[#allocation139_spill] sm:$0xff]  ;;  %v7423_v42 = vld [vmem:[#allocation56_spill] sm:$0xff] }
 0x335   :  { %v3030_v7 = vmax.f32 %v2952_v8, 0.0  ;;  %v2955_v55 = vadd.f32 %v4344_v48, %v2794_v27  ;;  %v2818_v27 = vadd.f32 %v7423_v42, %v7422_v40 }
 0x337   :  { %v3771_v18 = vmul.f32 %v3678_v56, %v3030_v7  ;;  %v3031_v9 = vmax.f32 %v2955_v55, 0.0  ;;  %v4345_v39 = vpop.f32.mrb[96].mxu1  ;;  %v3708_v7 = vpop.permute.xlu1 %3707 }
 0x338   :  { %v4346_v37 = vpop.f32.mrb[97].mxu1 }
 0x339   :  { %v3802_v38 = vadd.f32 %v3801_v11, %v3771_v18  ;;  %v3772_v57 = vmul.f32 %v7411_v23, %v3031_v9  ;;  %v4347_v62 = vadd.f32 %v4346_v37, %v4345_v39  ;;  %v4348_v35 = vpop.f32.mrb[98].mxu1 }
 0x33a   :  { %v4349_v2 = vpop.f32.mrb[99].mxu1 }
 0x33b   :  { %v3803_v28 = vadd.f32 %v3802_v38, %v3772_v57  ;;  %v2960_v45 = vadd.f32 %v4347_v62, %v2799_v0  ;;  %v4350_v46 = vadd.f32 %v4349_v2, %v4348_v35  ;;  %v7424_v0 = vld [vmem:[#allocation142_spill] sm:$0xff]  ;;  %v7425_v38 = vld [vmem:[#allocation131_spill] sm:$0xff]  ;;  %v7426_v62 = vld [vmem:[#allocation5_spill] sm:$0xff]  ;;  %v3718_v58 = vpop.permute.xlu1 %3717 }
 0x33c   :  { %v2823_v23 = vadd.f32 %v7425_v38, %v7424_v0 }
 0x33d   :  { %v3032_v36 = vmax.f32 %v2960_v45, 0.0  ;;  %v2963_v44 = vadd.f32 %v4350_v46, %v2802_v13  ;;  %v7428_v45 = vld [vmem:[#allocation8_spill] sm:$0xff] }
 0x33f   :  { %v3773_v26 = vmul.f32 %v3688_v30, %v3032_v36  ;;  %v3033_v59 = vmax.f32 %v2963_v44, 0.0  ;;  %v4351_v61 = vpop.f32.mrb[100].mxu1  ;;  %v3728_v51 = vpop.permute.xlu1 %3727 }
 0x340   :  { %v4352_v4 = vpop.f32.mrb[101].mxu1 }
 0x341   :  { %v3804_v21 = vadd.f32 %v3803_v28, %v3773_v26  ;;  %v3774_v41 = vmul.f32 %v7416_v1, %v3033_v59  ;;  %v4353_v60 = vadd.f32 %v4352_v4, %v4351_v61  ;;  %v4354_v31 = vpop.f32.mrb[102].mxu1  ;;  %v7427_v28 = vld [vmem:[#allocation141_spill] sm:$0xff]  ;;  %v7430_v1 = vld [vmem:[#allocation59_spill] sm:$0xff] }
 0x342   :  { %v4355_v12 = vpop.f32.mrb[103].mxu1  ;;  %v2826_v46 = vadd.f32 %v7428_v45, %v7427_v28  ;;  %v7441_v45 = vld [vmem:[#allocation52_spill] sm:$0xff] }
 0x343   :  { %v3805_v19 = vadd.f32 %v3804_v21, %v3774_v41  ;;  %v2968_v17 = vadd.f32 %v4353_v60, %v2807_v52  ;;  %v4356_v50 = vadd.f32 %v4355_v12, %v4354_v31  ;;  %v7429_v21 = vld [vmem:[#allocation144_spill] sm:$0xff]  ;;  %v7431_v31 = vld [vmem:[#allocation51_spill] sm:$0xff] }
 0x344   :  { %v2831_v41 = vadd.f32 %v7430_v1, %v7429_v21 }
 0x345   :  { %v3034_v5 = vmax.f32 %v2968_v17, 0.0  ;;  %v2971_v15 = vadd.f32 %v4356_v50, %v2810_v29  ;;  %v7433_v17 = vld [vmem:[#allocation9_spill] sm:$0xff] }
 0x347   :  { %v3775_v47 = vmul.f32 %v3698_v24, %v3034_v5  ;;  %v3035_v20 = vmax.f32 %v2971_v15, 0.0  ;;  %v4357_v10 = vpop.f32.mrb[104].mxu1 }
 0x348   :  { %v4358_v54 = vpop.f32.mrb[105].mxu1 }
 0x349   :  { %v3806_v53 = vadd.f32 %v3805_v19, %v3775_v47  ;;  %v3776_v22 = vmul.f32 %v7421_v33, %v3035_v20  ;;  %v4359_v16 = vadd.f32 %v4358_v54, %v4357_v10  ;;  %v4360_v43 = vpop.f32.mrb[106].mxu1  ;;  %v7432_v19 = vld [vmem:[#allocation143_spill] sm:$0xff]  ;;  %v3738_v10 = vpop.permute.xlu1 %3737  ;;  %v7435_v33 = vld [vmem:[#allocation60_spill] sm:$0xff] }
 0x34a   :  { %v4361_v49 = vpop.f32.mrb[107].mxu1  ;;  %v2834_v50 = vadd.f32 %v7433_v17, %v7432_v19 }
 0x34b   :  { %v3807_v11 = vadd.f32 %v3806_v53, %v3776_v22  ;;  %v2976_v8 = vadd.f32 %v4359_v16, %v2815_v6  ;;  %v4362_v48 = vadd.f32 %v4361_v49, %v4360_v43  ;;  %v7434_v53 = vld [vmem:[#allocation146_spill] sm:$0xff]  ;;  %v7436_v43 = vld [vmem:[#allocation3_spill] sm:$0xff] }
 0x34c   :  { %v2839_v22 = vadd.f32 %v7435_v33, %v7434_v53 }
 0x34d   :  { %v3036_v55 = vmax.f32 %v2976_v8, 0.0  ;;  %v2979_v56 = vadd.f32 %v4362_v48, %v2818_v27  ;;  %v7438_v8 = vld [vmem:[#allocation132_spill] sm:$0xff] }
 0x34f   :  { %v3777_v18 = vmul.f32 %v3708_v7, %v3036_v55  ;;  %v3037_v9 = vmax.f32 %v2979_v56, 0.0  ;;  %v4363_v39 = vpop.f32.mrb[108].mxu1 }
 0x350   :  { %v4364_v37 = vpop.f32.mrb[109].mxu1 }
 0x351   :  { %v3808_v57 = vadd.f32 %v3807_v11, %v3777_v18  ;;  %v3778_v35 = vmul.f32 %v7426_v62, %v3037_v9  ;;  %v4365_v2 = vadd.f32 %v4364_v37, %v4363_v39  ;;  %v4366_v3 = vpop.f32.mrb[110].mxu1  ;;  %v7437_v11 = vld [vmem:[#allocation145_spill] sm:$0xff]  ;;  %v3743_v18 = vpop.permute.xlu1 %3742  ;;  %v7440_v62 = vld [vmem:[#allocation10_spill] sm:$0xff] }
 0x352   :  { %v4367_v13 = vpop.f32.mrb[111].mxu1  ;;  %v2842_v48 = vadd.f32 %v7438_v8, %v7437_v11 }
 0x353   :  { %v3809_v36 = vadd.f32 %v3808_v57, %v3778_v35  ;;  %v2984_v44 = vadd.f32 %v4365_v2, %v2823_v23  ;;  %v4368_v30 = vadd.f32 %v4367_v13, %v4366_v3  ;;  %v7439_v57 = vld [vmem:[#allocation148_spill] sm:$0xff] }
 0x354   :  { %v2847_v35 = vadd.f32 %v7440_v62, %v7439_v57 }
 0x355   :  { %v3038_v26 = vmax.f32 %v2984_v44, 0.0  ;;  %v2987_v59 = vadd.f32 %v4368_v30, %v2826_v46  ;;  %v3748_v28 = vpop.permute.xlu1 %3747  ;;  %v3557_v46 = vrot.slane %v7441_v45, 4  ;;  %v7442_v44 = vld [vmem:[#allocation147_spill] sm:$0xff] }
 0x356   :  { %v7443_v30 = vld [vmem:[#allocation63_spill] sm:$0xff] }
 0x357   :  { %v3779_v61 = vmul.f32 %v3718_v58, %v3038_v26  ;;  %v3039_v4 = vmax.f32 %v2987_v59, 0.0  ;;  %v4369_v63 = vpop.f32.mrb[112].mxu1  ;;  %v2850_v26 = vadd.f32 %v7443_v30, %v7442_v44 }
 0x358   :  { %v4370_v52 = vpop.f32.mrb[113].mxu1 }
 0x359   :  { %v3810_v60 = vadd.f32 %v3809_v36, %v3779_v61  ;;  %v3780_v12 = vmul.f32 %v7431_v31, %v3039_v4  ;;  %v4371_v25 = vadd.f32 %v4370_v52, %v4369_v63  ;;  %v4372_v14 = vpop.f32.mrb[114].mxu1  ;;  %v3558_v52 = vadd.f32 %v3557_v46, %v7441_v45 }
 0x35a   :  { %v4373_v29 = vpop.f32.mrb[115].mxu1 }
 0x35b   :  { %v3811_v5 = vadd.f32 %v3810_v60, %v3780_v12  ;;  %v2992_v15 = vadd.f32 %v4371_v25, %v2831_v41  ;;  %v4374_v24 = vadd.f32 %v4373_v29, %v4372_v14  ;;  %v3753_v41 = vpop.permute.xlu1 %3752  ;;  %v3559_v12 = vrot.slane %v3558_v52, 2 }
 0x35c   :  { %v3831_v14 = vlaneseq }
 0x35d   :  { %v3040_v47 = vmax.f32 %v2992_v15, 0.0  ;;  %v2995_v20 = vadd.f32 %v4374_v24, %v2834_v50  ;;  %v3560_v19 = vadd.f32 %v3559_v12, %v3558_v52 }
 0x35e   :  { %v3832_v50 = vshrl.u32 %v3831_v14, 7 }
 0x35f   :  { %v3781_v54 = vmul.f32 %v3728_v51, %v3040_v47  ;;  %v3041_v34 = vmax.f32 %v2995_v20, 0.0  ;;  %v4375_v32 = vpop.f32.mrb[116].mxu1  ;;  %v3561_v15 = vrot.slane %v3560_v19, 1 }
 0x360   :  { %v4376_v6 = vpop.f32.mrb[117].mxu1  ;;  %v3833_v47 = vsub.s32 0, %v3832_v50 }
 0x361   :  { %v3812_v16 = vadd.f32 %v3811_v5, %v3781_v54  ;;  %v3782_v49 = vmul.f32 %v7436_v43, %v3041_v34  ;;  %v4377_v40 = vadd.f32 %v4376_v6, %v4375_v32  ;;  %v4378_v42 = vpop.f32.mrb[118].mxu1  ;;  %v3562_v54 = vadd.f32 %v3561_v15, %v3560_v19 }
 0x362   :  { %v4379_v27 = vpop.f32.mrb[119].mxu1 }
 0x363   :  { %v3813_v7 = vadd.f32 %v3812_v16, %v3782_v49  ;;  %v3000_v55 = vadd.f32 %v4377_v40, %v2839_v22  ;;  %v4380_v56 = vadd.f32 %v4379_v27, %v4378_v42 }
 0x365   :  { %v3042_v9 = vmax.f32 %v3000_v55, 0.0  ;;  %v3003_v39 = vadd.f32 %v4380_v56, %v2842_v48 }
 0x367   :  { %v3783_v37 = vmul.f32 %v3738_v10, %v3042_v9  ;;  %v3043_v0 = vmax.f32 %v3003_v39, 0.0  ;;  %v4381_v38 = vpop.f32.mrb[120].mxu1  ;;  %v3829_v10 = vpop.permute.xlu0 %3828 }
 0x368   :  { %v4382_v23 = vpop.f32.mrb[121].mxu1  ;;  %v3834_v32 = vrot.slane %v3829_v10, %v3833_v47 }
 0x369   :  { %v3814_v2 = vadd.f32 %v3813_v7, %v3783_v37  ;;  %v3784_v3 = vmul.f32 %v3743_v18, %v3043_v0  ;;  %v4383_v58 = vadd.f32 %v4382_v23, %v4381_v38  ;;  %v4384_v13 = vpop.f32.mrb[122].mxu1 }
 0x36a   :  { %v4385_v36 = vpop.f32.mrb[123].mxu1 }
 0x36b   :  { %v3815_v59 = vadd.f32 %v3814_v2, %v3784_v3  ;;  %v3008_v61 = vadd.f32 %v4383_v58, %v2847_v35  ;;  %v4386_v4 = vadd.f32 %v4385_v36, %v4384_v13 }
 0x36d   :  { %v3044_v63 = vmax.f32 %v3008_v61, 0.0  ;;  %v3011_v51 = vadd.f32 %v4386_v4, %v2850_v26 }
 0x36f   :  { %v3785_v21 = vmul.f32 %v3748_v28, %v3044_v63  ;;  %v3045_v1 = vmax.f32 %v3011_v51, 0.0 }
 0x371   :  { %v3816_v60 = vadd.f32 %v3815_v59, %v3785_v21  ;;  %v3786_v31 = vmul.f32 %v3753_v41, %v3045_v1 }
 0x373   :  { %v3817_v25 = vadd.f32 %v3816_v60, %v3786_v31 }
 0x375   :  { %v3818_v29 = vrot.slane %v3817_v25, 4 }
 0x377   :  { %v3819_v17 = vadd.f32 %v3818_v29, %v3817_v25 }
 0x379   :  { %v3820_v5 = vrot.slane %v3819_v17, 2 }
 0x37b   :  { %v3821_v24 = vadd.f32 %v3820_v5, %v3819_v17 }
 0x37d   :  { %v3822_v20 = vrot.slane %v3821_v24, 1 }
 0x37f   :  { %v3823_v34 = vadd.f32 %v3822_v20, %v3821_v24 }
 0x381   :  { %v3824_v6 = vadd.f32 %v3823_v34, %v3562_v54 }
 0x383   :  { %v3835_v53 = vadd.f32 %v3834_v32, %v3824_v6 }
 0x385   :  { %3836 = vst [vmem:[%s7110_s8] sm:$0x1] %v3835_v53 }

</bundles_post_ra>
